<compile_context>
chip_gen: v6e
topology: v6e:2x2x1
jax: 0.10.0
libtpu: 0.0.40
codegen_flags: <defaults>
</compile_context>

<pallas_src>
import functools

import jax
import jax.numpy as jnp
from jax.experimental import pallas as pl
from jax.experimental.pallas import tpu as pltpu

INPUT_SIZE = 28
HIDDEN = 64
NUM_CLASSES = 10
NUM_LAYERS = 2

# PyTorch gate-block order [i, f, g, o] -> kernel order [i, f, o, g]
_GATE_PERM = jnp.array([0, 1, 3, 2], dtype=jnp.int32)


# ------------------------------ fused RNN kernel ------------------------------
def _rnn_kernel(x_ref, w0_ref, whh0_ref, b0_ref,
                w1_hbm, whh1_hbm, b1_hbm,
                wlin_ref, blin_ref,
                pred_ref,
                xg_scr, seq_scr, w1_vmem, whh1_vmem, b1_vmem, dma_sem,
                *, seq_len, batch):
    T, B, H = seq_len, batch, HIDDEN
    f32, bf16 = jnp.float32, jnp.bfloat16
    G = 2 * H                      # 128: width of one gate block (fwd|bwd halves)

    # ---- prefetch layer-1 weights behind the layer-0 work (manual DMA) ----
    cp_w1 = pltpu.make_async_copy(w1_hbm, w1_vmem, dma_sem.at[0])
    cp_whh1 = pltpu.make_async_copy(whh1_hbm, whh1_vmem, dma_sem.at[1])
    cp_b1 = pltpu.make_async_copy(b1_hbm, b1_vmem, dma_sem.at[2])
    cp_w1.start(); cp_whh1.start(); cp_b1.start()

    # Hoisted lane masks: the fwd direction owns the first H lanes of every
    # 128-wide gate block and of the 2H-wide state vector.
    fwd_gate = (jax.lax.broadcasted_iota(jnp.int32, (B, 8 * H), 1) % G) < H
    fwd_half = jax.lax.broadcasted_iota(jnp.int32, (B, G), 1) < H

    def run_layer(whh, store_seq):
        """Fused fwd+bwd LSTM recurrence over T steps.

        Gate columns (8H = 512, every slice 128-lane aligned):
            [ i_f i_r | f_f f_r | o_f o_r | g_f g_r ]    (each sub-block H=64)
        State h/c is (B, 2H): fwd direction in lanes [:H], bwd in lanes [H:].
        Processing step t: fwd consumes time t, bwd consumes time T-1-t.
        """
        h = jnp.zeros((B, G), bf16)        # bf16 carry feeds the MXU directly
        c = jnp.zeros((B, G), f32)
        h_first = h
        for t in range(T):                 # static unroll: full scheduler visibility
            # B is a multiple of 8 -> these row blocks are tile-aligned loads.
            xg = jnp.where(fwd_gate,
                           xg_scr[t * B:(t + 1) * B, :],
                           xg_scr[(T - 1 - t) * B:(T - t) * B, :])
            gates = xg + jnp.dot(h, whh, preferred_element_type=f32)   # (B, 8H)
            sig = jax.nn.sigmoid(gates[:, :3 * G])    # one EUP pass covers i, f, o
            i_g = sig[:, 0 * G:1 * G]
            f_g = sig[:, 1 * G:2 * G]
            o_g = sig[:, 2 * G:3 * G]
            g_g = jnp.tanh(gates[:, 3 * G:4 * G])
            c = f_g * c + i_g * g_g
            h32 = o_g * jnp.tanh(c)
            h = h32.astype(bf16)
            if store_seq:
                # Single store per step: fwd half valid for time t, bwd half
                # valid for time T-1-t (resolved lane-wise after the loop).
                seq_scr[t * B:(t + 1) * B, :] = h32
            if t == 0:
                h_first = h
        return h, h_first

    # ---- layer 0: single hoisted input projection (both directions + biases) ----
    xg_scr[...] = (jnp.dot(x_ref[...], w0_ref[...], preferred_element_type=f32)
                   + b0_ref[...])
    run_layer(whh0_ref[...], store_seq=True)

    # Layer-0 output y0(time t) = [fwd half of step t | bwd half of step T-1-t]
    y0 = jnp.concatenate(
        [jnp.where(fwd_half,
                   seq_scr[t * B:(t + 1) * B, :],
                   seq_scr[(T - 1 - t) * B:(T - t) * B, :]) for t in range(T)],
        axis=0).astype(bf16)                                   # (T*B, 2H)

    # ---- layer 1: wait for the prefetched weights, then project + recur ----
    # (nn.LSTM inter-layer dropout p=0.2 is inactive in eval mode — identity.)
    cp_w1.wait(); cp_whh1.wait(); cp_b1.wait()
    xg_scr[...] = (jnp.dot(y0, w1_vmem[...], preferred_element_type=f32)
                   + b1_vmem[...])
    h_last, h_first = run_layer(whh1_vmem[...], store_seq=False)

    # ---- linear head on output[:, -1, :] = [h_fwd(T-1) | h_bwd(T-1)] ----
    # fwd hidden at last timestep = final carry; bwd hidden at last timestep =
    # carry captured at processing step 0 (bwd starts at the last timestep).
    y_last = jnp.where(fwd_half, h_last, h_first)              # bf16 (B, 2H)
    pred_ref[...] = (jnp.dot(y_last, wlin_ref[...], preferred_element_type=f32)
                     + blin_ref[...]).astype(pred_ref.dtype)


def _rnn_pallas(x2d, kp, *, seq_len, batch):
    kernel = functools.partial(_rnn_kernel, seq_len=seq_len, batch=batch)
    vmem = pl.BlockSpec(memory_space=pltpu.MemorySpace.VMEM)
    hbm = pl.BlockSpec(memory_space=pl.ANY)        # layer-1 weights: manual prefetch
    return pl.pallas_call(
        kernel,
        out_shape=jax.ShapeDtypeStruct((batch, NUM_CLASSES), jnp.float32),
        in_specs=[vmem,                 # x2d
                  vmem, vmem, vmem,     # w0, whh0, b0   (needed immediately)
                  hbm, hbm, hbm,        # w1, whh1, b1   (prefetched in-kernel)
                  vmem, vmem],          # wlin, blin     (tiny)
        out_specs=vmem,
        scratch_shapes=[
            pltpu.VMEM((seq_len * batch, 8 * HIDDEN), jnp.float32),   # gate proj (both dirs)
            pltpu.VMEM((seq_len * batch, 2 * HIDDEN), jnp.float32),   # layer-0 hidden seq
            pltpu.VMEM((2 * HIDDEN, 8 * HIDDEN), jnp.bfloat16),       # w1   landing buffer
            pltpu.VMEM((2 * HIDDEN, 8 * HIDDEN), jnp.bfloat16),       # whh1 landing buffer
            pltpu.VMEM((1, 8 * HIDDEN), jnp.float32),                 # b1   landing buffer
            pltpu.SemaphoreType.DMA((3,)),
        ],
    )(x2d,
      kp["w0"], kp["whh0"], kp["b0"],
      kp["w1"], kp["whh1"], kp["b1"],
      kp["wlin"], kp["blin"])


@jax.jit
def rnn_forward(x, kparams):
    """x: (B, T, 28) batch-first, like the PyTorch module. Returns (B, 10) f32."""
    B, T, Din = x.shape
    B_pad = ((B + 7) // 8) * 8                     # sublane-tile aligned batch
    x_t = jnp.transpose(x, (1, 0, 2))              # (T, B, Din)
    if B_pad != B:
        x_t = jnp.pad(x_t, ((0, 0), (0, B_pad - B), (0, 0)))
    x2d = x_t.reshape(T * B_pad, Din).astype(jnp.bfloat16)
    pred = _rnn_pallas(x2d, kparams, seq_len=T, batch=B_pad)
    return pred[:B]


# ------------------------------ parameter setup ------------------------------
def init_params(key):
    """PyTorch-layout parameters (f32), default nn.LSTM/Linear init U(-k, k)."""
    params = {}
    k_lstm = 1.0 / jnp.sqrt(jnp.float32(HIDDEN))

    def u(k, shape, bound):
        return jax.random.uniform(k, shape, jnp.float32, minval=-bound, maxval=bound)

    keys = jax.random.split(key, 4 * 2 * NUM_LAYERS + 2)
    ki = iter(range(len(keys)))
    for layer in range(NUM_LAYERS):
        din = INPUT_SIZE if layer == 0 else 2 * HIDDEN
        lp = {}
        for tag in ("f", "r"):                       # forward / reverse direction
            lp[f"w_ih_{tag}"] = u(keys[next(ki)], (4 * HIDDEN, din), k_lstm)
            lp[f"w_hh_{tag}"] = u(keys[next(ki)], (4 * HIDDEN, HIDDEN), k_lstm)
            b_ih = u(keys[next(ki)], (4 * HIDDEN,), k_lstm)
            b_hh = u(keys[next(ki)], (4 * HIDDEN,), k_lstm)
            lp[f"b_{tag}"] = b_ih + b_hh
        params[f"l{layer}"] = lp
    k_lin = 1.0 / jnp.sqrt(jnp.float32(2 * HIDDEN))
    params["w_lin"] = u(keys[next(ki)], (NUM_CLASSES, 2 * HIDDEN), k_lin)
    params["b_lin"] = u(keys[next(ki)], (NUM_CLASSES,), k_lin)
    return params


def _pack_gates(a, b):
    """a, b: (Din, 4H) columns in PyTorch gate order [i|f|g|o] for the fwd (a)
    and bwd (b) direction -> (Din, 8H) laid out
    [a_i b_i | a_f b_f | a_o b_o | a_g b_g]  (each sub-block HIDDEN wide)."""
    din = a.shape[0]
    a4 = jnp.take(a.reshape(din, 4, HIDDEN), _GATE_PERM, axis=1)
    b4 = jnp.take(b.reshape(din, 4, HIDDEN), _GATE_PERM, axis=1)
    return jnp.stack([a4, b4], axis=2).reshape(din, 8 * HIDDEN)


def pack_params(params):
    """Repack PyTorch-layout params into the fused-kernel layout (bf16 weights)."""
    kp = {}
    for layer in range(NUM_LAYERS):
        p = params[f"l{layer}"]
        wih_f, wih_r = p["w_ih_f"].T, p["w_ih_r"].T        # (Din, 4H)
        whh_f, whh_r = p["w_hh_f"].T, p["w_hh_r"].T        # (H, 4H)
        zh = jnp.zeros_like(whh_f)
        # Single packed input projection (both directions, no zero columns).
        kp[f"w{layer}"] = _pack_gates(wih_f, wih_r).astype(jnp.bfloat16)
        # Block-diagonal recurrent weight: rows [:H] = fwd h, rows [H:] = bwd h.
        kp[f"whh{layer}"] = jnp.concatenate(
            [_pack_gates(whh_f, zh), _pack_gates(zh, whh_r)],
            axis=0).astype(jnp.bfloat16)
        kp[f"b{layer}"] = _pack_gates(                     # (1, 8H) f32
            p["b_f"].reshape(1, 4 * HIDDEN),
            p["b_r"].reshape(1, 4 * HIDDEN)).astype(jnp.float32)
    kp["wlin"] = params["w_lin"].T.astype(jnp.bfloat16)     # (2H, 10)
    kp["blin"] = params["b_lin"].reshape(1, NUM_CLASSES).astype(jnp.float32)
    return kp


# ---------------------------- pure-JAX f32 reference ----------------------------
def rnn_reference(x, params):
    """Straightforward f32 reference with PyTorch nn.LSTM eval-mode semantics."""
    B = x.shape[0]

    def cell(x_t, h, c, w_ih, w_hh, b):
        gates = x_t @ w_ih.T + h @ w_hh.T + b
        i, f, g, o = jnp.split(gates, 4, axis=-1)
        c = jax.nn.sigmoid(f) * c + jax.nn.sigmoid(i) * jnp.tanh(g)
        h = jax.nn.sigmoid(o) * jnp.tanh(c)
        return h, c

    def run_dir(seq, w_ih, w_hh, b):
        h = jnp.zeros((B, HIDDEN), jnp.float32)
        c = jnp.zeros((B, HIDDEN), jnp.float32)
        outs = []
        for t in range(seq.shape[0]):
            h, c = cell(seq[t], h, c, w_ih, w_hh, b)
            outs.append(h)
        return jnp.stack(outs)

    seq = jnp.transpose(x, (1, 0, 2)).astype(jnp.float32)   # (T, B, Din)
    for layer in range(NUM_LAYERS):
        p = params[f"l{layer}"]
        fwd = run_dir(seq, p["w_ih_f"], p["w_hh_f"], p["b_f"])
        bwd = run_dir(seq[::-1], p["w_ih_r"], p["w_hh_r"], p["b_r"])[::-1]
        seq = jnp.concatenate([fwd, bwd], axis=-1)
    return seq[-1] @ params["w_lin"].T + params["b_lin"]


if __name__ == "__main__":
    key = jax.random.PRNGKey(0)
    k_x, k_p = jax.random.split(key)

    B, T = 2, 8  # small seq length; feature dim fixed at 28 by the module
    x = jax.random.normal(k_x, (B, T, INPUT_SIZE), dtype=jnp.float32)

    params = init_params(k_p)        # PyTorch-layout f32
    kparams = pack_params(params)    # fused-kernel layout (bf16 weights)

    pred = rnn_forward(x, kparams)
    pred = jax.block_until_ready(pred)

    assert pred.shape == (B, NUM_CLASSES), pred.shape
    assert pred.dtype == jnp.float32, pred.dtype

    ref = rnn_reference(x, params)
    err = float(jnp.max(jnp.abs(pred - ref)))
    assert err < 5e-2, f"max abs error vs f32 reference too large: {err}"

    print("KERNEL_OK")
</pallas_src>

<mosaic_0001>
module attributes {stable_mosaic.version = 11 : i64} {
  func.func @_rnn_kernel(%arg0: memref<64x28xbf16, #tpu.memory_space<vmem>>, %arg1: memref<28x512xbf16, #tpu.memory_space<vmem>>, %arg2: memref<128x512xbf16, #tpu.memory_space<vmem>>, %arg3: memref<1x512xf32, #tpu.memory_space<vmem>>, %arg4: memref<128x512xbf16, #tpu.memory_space<any>>, %arg5: memref<128x512xbf16, #tpu.memory_space<any>>, %arg6: memref<1x512xf32, #tpu.memory_space<any>>, %arg7: memref<128x10xbf16, #tpu.memory_space<vmem>>, %arg8: memref<1x10xf32, #tpu.memory_space<vmem>>, %arg9: memref<8x10xf32, #tpu.memory_space<vmem>>, %arg10: memref<64x512xf32, #tpu.memory_space<vmem>>, %arg11: memref<64x128xf32, #tpu.memory_space<vmem>>, %arg12: memref<128x512xbf16, #tpu.memory_space<vmem>>, %arg13: memref<128x512xbf16, #tpu.memory_space<vmem>>, %arg14: memref<1x512xf32, #tpu.memory_space<vmem>>, %arg15: memref<3x!tpu.dma_semaphore, #tpu.memory_space<semaphore_mem>>) attributes {dimension_semantics = [], scalar_prefetch = 0 : i64, scratch_operands = 6 : i64, tpu.core_type = #tpu.core_type<tc>} {
    %c0_i32 = arith.constant 0 : i32
    %0 = tpu.memref_slice %arg15[%c0_i32] : memref<3x!tpu.dma_semaphore, #tpu.memory_space<semaphore_mem>> -> memref<1x!tpu.dma_semaphore, #tpu.memory_space<semaphore_mem>>
    %1 = tpu.memref_squeeze %0 : memref<1x!tpu.dma_semaphore, #tpu.memory_space<semaphore_mem>> -> memref<!tpu.dma_semaphore, #tpu.memory_space<semaphore_mem>>
    tpu.enqueue_dma source(%arg4 : memref<128x512xbf16, #tpu.memory_space<any>>) target(%arg12 : memref<128x512xbf16, #tpu.memory_space<vmem>>) target_semaphore(%1 : memref<!tpu.dma_semaphore, #tpu.memory_space<semaphore_mem>>)
    %c1_i32 = arith.constant 1 : i32
    %2 = tpu.memref_slice %arg15[%c1_i32] : memref<3x!tpu.dma_semaphore, #tpu.memory_space<semaphore_mem>> -> memref<1x!tpu.dma_semaphore, #tpu.memory_space<semaphore_mem>>
    %3 = tpu.memref_squeeze %2 : memref<1x!tpu.dma_semaphore, #tpu.memory_space<semaphore_mem>> -> memref<!tpu.dma_semaphore, #tpu.memory_space<semaphore_mem>>
    tpu.enqueue_dma source(%arg5 : memref<128x512xbf16, #tpu.memory_space<any>>) target(%arg13 : memref<128x512xbf16, #tpu.memory_space<vmem>>) target_semaphore(%3 : memref<!tpu.dma_semaphore, #tpu.memory_space<semaphore_mem>>)
    %c2_i32 = arith.constant 2 : i32
    %4 = tpu.memref_slice %arg15[%c2_i32] : memref<3x!tpu.dma_semaphore, #tpu.memory_space<semaphore_mem>> -> memref<1x!tpu.dma_semaphore, #tpu.memory_space<semaphore_mem>>
    %5 = tpu.memref_squeeze %4 : memref<1x!tpu.dma_semaphore, #tpu.memory_space<semaphore_mem>> -> memref<!tpu.dma_semaphore, #tpu.memory_space<semaphore_mem>>
    tpu.enqueue_dma source(%arg6 : memref<1x512xf32, #tpu.memory_space<any>>) target(%arg14 : memref<1x512xf32, #tpu.memory_space<vmem>>) target_semaphore(%5 : memref<!tpu.dma_semaphore, #tpu.memory_space<semaphore_mem>>)
    %6 = tpu.iota {dimensions = array<i32: 1>} : vector<8x512xi32>
    %c128_i32 = arith.constant 128 : i32
    %c0_i32_0 = arith.constant 0 : i32
    %7 = arith.cmpi eq, %c128_i32, %c0_i32_0 : i32
    %c1_i32_1 = arith.constant 1 : i32
    %8 = arith.select %7, %c1_i32_1, %c128_i32 : i32
    %9 = vector.broadcast %8 : i32 to vector<8x512xi32>
    %10 = arith.remsi %6, %9 : vector<8x512xi32>
    %c0_i32_2 = arith.constant 0 : i32
    %11 = vector.broadcast %c0_i32_2 : i32 to vector<8x512xi32>
    %12 = arith.cmpi ne, %10, %11 : vector<8x512xi32>
    %c0_i32_3 = arith.constant 0 : i32
    %13 = vector.broadcast %c0_i32_3 : i32 to vector<8x512xi32>
    %14 = arith.cmpi slt, %10, %13 : vector<8x512xi32>
    %c0_i32_4 = arith.constant 0 : i32
    %15 = arith.cmpi slt, %8, %c0_i32_4 : i32
    %16 = vector.broadcast %15 : i1 to vector<8x512xi1>
    %17 = vector.broadcast %16 : vector<8x512xi1> to vector<8x512xi1>
    %18 = arith.xori %14, %17 : vector<8x512xi1>
    %19 = arith.andi %18, %12 : vector<8x512xi1>
    %20 = vector.broadcast %8 : i32 to vector<8x512xi32>
    %21 = arith.addi %10, %20 : vector<8x512xi32>
    %22 = arith.select %19, %21, %10 : vector<8x512xi1>, vector<8x512xi32>
    %c64_i32 = arith.constant 64 : i32
    %23 = vector.broadcast %c64_i32 : i32 to vector<8x512xi32>
    %24 = arith.cmpi slt, %22, %23 : vector<8x512xi32>
    %25 = tpu.iota {dimensions = array<i32: 1>} : vector<8x128xi32>
    %c64_i32_5 = arith.constant 64 : i32
    %26 = vector.broadcast %c64_i32_5 : i32 to vector<8x128xi32>
    %27 = arith.cmpi slt, %25, %26 : vector<8x128xi32>
    %c0 = arith.constant 0 : index
    %c0_6 = arith.constant 0 : index
    %28 = vector.load %arg0[%c0, %c0_6] : memref<64x28xbf16, #tpu.memory_space<vmem>>, vector<64x28xbf16>
    %c0_7 = arith.constant 0 : index
    %c0_8 = arith.constant 0 : index
    %29 = vector.load %arg1[%c0_7, %c0_8] : memref<28x512xbf16, #tpu.memory_space<vmem>>, vector<28x512xbf16>
    %cst = arith.constant dense<0.000000e+00> : vector<64x512xf32>
    %30 = tpu.matmul %28, %29, %cst {dimension_numbers = #tpu.dot_dimension_numbers<[1], [0], [0], [1], [0, 0, 1, 1], [], []>} : vector<64x28xbf16>, vector<28x512xbf16>, vector<64x512xf32> -> vector<64x512xf32>
    %c0_9 = arith.constant 0 : index
    %c0_10 = arith.constant 0 : index
    %31 = vector.load %arg3[%c0_9, %c0_10] : memref<1x512xf32, #tpu.memory_space<vmem>>, vector<1x512xf32>
    %32 = vector.broadcast %31 : vector<1x512xf32> to vector<64x512xf32>
    %33 = arith.addf %30, %32 : vector<64x512xf32>
    %c0_11 = arith.constant 0 : index
    %c0_12 = arith.constant 0 : index
    %34 = vector.load %arg10[%c0_11, %c0_12] : memref<64x512xf32, #tpu.memory_space<vmem>>, vector<64x512xf32>
    tpu.vector_store %arg10[%c0_11, %c0_12], %33 {strides = array<i32>} : memref<64x512xf32, #tpu.memory_space<vmem>>, vector<64x512xf32>,
    %c0_13 = arith.constant 0 : index
    %c0_14 = arith.constant 0 : index
    %35 = vector.load %arg2[%c0_13, %c0_14] : memref<128x512xbf16, #tpu.memory_space<vmem>>, vector<128x512xbf16>
    %cst_15 = arith.constant 0.000000e+00 : bf16
    %36 = vector.broadcast %cst_15 : bf16 to vector<8x128xbf16>
    %cst_16 = arith.constant 0.000000e+00 : f32
    %37 = vector.broadcast %cst_16 : f32 to vector<8x128xf32>
    %c0_17 = arith.constant 0 : index
    %c0_18 = arith.constant 0 : index
    %38 = vector.load %arg10[%c0_17, %c0_18] : memref<64x512xf32, #tpu.memory_space<vmem>>, vector<8x512xf32>
    %c56 = arith.constant 56 : index
    %c0_19 = arith.constant 0 : index
    %39 = vector.load %arg10[%c56, %c0_19] : memref<64x512xf32, #tpu.memory_space<vmem>>, vector<8x512xf32>
    %40 = arith.select %24, %38, %39 : vector<8x512xi1>, vector<8x512xf32>
    %cst_20 = arith.constant dense<0.000000e+00> : vector<8x512xf32>
    %41 = tpu.matmul %36, %35, %cst_20 {dimension_numbers = #tpu.dot_dimension_numbers<[1], [0], [0], [1], [0, 0, 1, 1], [], []>} : vector<8x128xbf16>, vector<128x512xbf16>, vector<8x512xf32> -> vector<8x512xf32>
    %42 = arith.addf %40, %41 : vector<8x512xf32>
    %43 = vector.extract_strided_slice %42 {offsets = [0, 0], sizes = [8, 384], strides = [1, 1]} : vector<8x512xf32> to vector<8x384xf32>
    %44 = arith.negf %43 : vector<8x384xf32>
    %45 = math.exp %44 : vector<8x384xf32>
    %cst_21 = arith.constant 1.000000e+00 : f32
    %46 = vector.broadcast %cst_21 : f32 to vector<8x384xf32>
    %47 = arith.addf %46, %45 : vector<8x384xf32>
    %48 = arith.divf %46, %47 : vector<8x384xf32>
    %49 = vector.extract_strided_slice %48 {offsets = [0, 0], sizes = [8, 128], strides = [1, 1]} : vector<8x384xf32> to vector<8x128xf32>
    %50 = vector.extract_strided_slice %48 {offsets = [0, 128], sizes = [8, 128], strides = [1, 1]} : vector<8x384xf32> to vector<8x128xf32>
    %51 = vector.extract_strided_slice %48 {offsets = [0, 256], sizes = [8, 128], strides = [1, 1]} : vector<8x384xf32> to vector<8x128xf32>
    %52 = vector.extract_strided_slice %42 {offsets = [0, 384], sizes = [8, 128], strides = [1, 1]} : vector<8x512xf32> to vector<8x128xf32>
    %53 = math.tanh %52 : vector<8x128xf32>
    %54 = arith.mulf %50, %37 : vector<8x128xf32>
    %55 = arith.mulf %49, %53 : vector<8x128xf32>
    %56 = arith.addf %54, %55 : vector<8x128xf32>
    %57 = math.tanh %56 : vector<8x128xf32>
    %58 = arith.mulf %51, %57 : vector<8x128xf32>
    %59 = arith.truncf %58 : vector<8x128xf32> to vector<8x128xbf16>
    %c0_22 = arith.constant 0 : index
    %c0_23 = arith.constant 0 : index
    %60 = vector.load %arg11[%c0_22, %c0_23] : memref<64x128xf32, #tpu.memory_space<vmem>>, vector<8x128xf32>
    tpu.vector_store %arg11[%c0_22, %c0_23], %58 {strides = array<i32>} : memref<64x128xf32, #tpu.memory_space<vmem>>, vector<8x128xf32>,
    %c8 = arith.constant 8 : index
    %c0_24 = arith.constant 0 : index
    %61 = vector.load %arg10[%c8, %c0_24] : memref<64x512xf32, #tpu.memory_space<vmem>>, vector<8x512xf32>
    %c48 = arith.constant 48 : index
    %c0_25 = arith.constant 0 : index
    %62 = vector.load %arg10[%c48, %c0_25] : memref<64x512xf32, #tpu.memory_space<vmem>>, vector<8x512xf32>
    %63 = arith.select %24, %61, %62 : vector<8x512xi1>, vector<8x512xf32>
    %cst_26 = arith.constant dense<0.000000e+00> : vector<8x512xf32>
    %64 = tpu.matmul %59, %35, %cst_26 {dimension_numbers = #tpu.dot_dimension_numbers<[1], [0], [0], [1], [0, 0, 1, 1], [], []>} : vector<8x128xbf16>, vector<128x512xbf16>, vector<8x512xf32> -> vector<8x512xf32>
    %65 = arith.addf %63, %64 : vector<8x512xf32>
    %66 = vector.extract_strided_slice %65 {offsets = [0, 0], sizes = [8, 384], strides = [1, 1]} : vector<8x512xf32> to vector<8x384xf32>
    %67 = arith.negf %66 : vector<8x384xf32>
    %68 = math.exp %67 : vector<8x384xf32>
    %cst_27 = arith.constant 1.000000e+00 : f32
    %69 = vector.broadcast %cst_27 : f32 to vector<8x384xf32>
    %70 = arith.addf %69, %68 : vector<8x384xf32>
    %71 = arith.divf %69, %70 : vector<8x384xf32>
    %72 = vector.extract_strided_slice %71 {offsets = [0, 0], sizes = [8, 128], strides = [1, 1]} : vector<8x384xf32> to vector<8x128xf32>
    %73 = vector.extract_strided_slice %71 {offsets = [0, 128], sizes = [8, 128], strides = [1, 1]} : vector<8x384xf32> to vector<8x128xf32>
    %74 = vector.extract_strided_slice %71 {offsets = [0, 256], sizes = [8, 128], strides = [1, 1]} : vector<8x384xf32> to vector<8x128xf32>
    %75 = vector.extract_strided_slice %65 {offsets = [0, 384], sizes = [8, 128], strides = [1, 1]} : vector<8x512xf32> to vector<8x128xf32>
    %76 = math.tanh %75 : vector<8x128xf32>
    %77 = arith.mulf %73, %56 : vector<8x128xf32>
    %78 = arith.mulf %72, %76 : vector<8x128xf32>
    %79 = arith.addf %77, %78 : vector<8x128xf32>
    %80 = math.tanh %79 : vector<8x128xf32>
    %81 = arith.mulf %74, %80 : vector<8x128xf32>
    %82 = arith.truncf %81 : vector<8x128xf32> to vector<8x128xbf16>
    %c8_28 = arith.constant 8 : index
    %c0_29 = arith.constant 0 : index
    %83 = vector.load %arg11[%c8_28, %c0_29] : memref<64x128xf32, #tpu.memory_space<vmem>>, vector<8x128xf32>
    tpu.vector_store %arg11[%c8_28, %c0_29], %81 {strides = array<i32>} : memref<64x128xf32, #tpu.memory_space<vmem>>, vector<8x128xf32>,
    %c16 = arith.constant 16 : index
    %c0_30 = arith.constant 0 : index
    %84 = vector.load %arg10[%c16, %c0_30] : memref<64x512xf32, #tpu.memory_space<vmem>>, vector<8x512xf32>
    %c40 = arith.constant 40 : index
    %c0_31 = arith.constant 0 : index
    %85 = vector.load %arg10[%c40, %c0_31] : memref<64x512xf32, #tpu.memory_space<vmem>>, vector<8x512xf32>
    %86 = arith.select %24, %84, %85 : vector<8x512xi1>, vector<8x512xf32>
    %cst_32 = arith.constant dense<0.000000e+00> : vector<8x512xf32>
    %87 = tpu.matmul %82, %35, %cst_32 {dimension_numbers = #tpu.dot_dimension_numbers<[1], [0], [0], [1], [0, 0, 1, 1], [], []>} : vector<8x128xbf16>, vector<128x512xbf16>, vector<8x512xf32> -> vector<8x512xf32>
    %88 = arith.addf %86, %87 : vector<8x512xf32>
    %89 = vector.extract_strided_slice %88 {offsets = [0, 0], sizes = [8, 384], strides = [1, 1]} : vector<8x512xf32> to vector<8x384xf32>
    %90 = arith.negf %89 : vector<8x384xf32>
    %91 = math.exp %90 : vector<8x384xf32>
    %cst_33 = arith.constant 1.000000e+00 : f32
    %92 = vector.broadcast %cst_33 : f32 to vector<8x384xf32>
    %93 = arith.addf %92, %91 : vector<8x384xf32>
    %94 = arith.divf %92, %93 : vector<8x384xf32>
    %95 = vector.extract_strided_slice %94 {offsets = [0, 0], sizes = [8, 128], strides = [1, 1]} : vector<8x384xf32> to vector<8x128xf32>
    %96 = vector.extract_strided_slice %94 {offsets = [0, 128], sizes = [8, 128], strides = [1, 1]} : vector<8x384xf32> to vector<8x128xf32>
    %97 = vector.extract_strided_slice %94 {offsets = [0, 256], sizes = [8, 128], strides = [1, 1]} : vector<8x384xf32> to vector<8x128xf32>
    %98 = vector.extract_strided_slice %88 {offsets = [0, 384], sizes = [8, 128], strides = [1, 1]} : vector<8x512xf32> to vector<8x128xf32>
    %99 = math.tanh %98 : vector<8x128xf32>
    %100 = arith.mulf %96, %79 : vector<8x128xf32>
    %101 = arith.mulf %95, %99 : vector<8x128xf32>
    %102 = arith.addf %100, %101 : vector<8x128xf32>
    %103 = math.tanh %102 : vector<8x128xf32>
    %104 = arith.mulf %97, %103 : vector<8x128xf32>
    %105 = arith.truncf %104 : vector<8x128xf32> to vector<8x128xbf16>
    %c16_34 = arith.constant 16 : index
    %c0_35 = arith.constant 0 : index
    %106 = vector.load %arg11[%c16_34, %c0_35] : memref<64x128xf32, #tpu.memory_space<vmem>>, vector<8x128xf32>
    tpu.vector_store %arg11[%c16_34, %c0_35], %104 {strides = array<i32>} : memref<64x128xf32, #tpu.memory_space<vmem>>, vector<8x128xf32>,
    %c24 = arith.constant 24 : index
    %c0_36 = arith.constant 0 : index
    %107 = vector.load %arg10[%c24, %c0_36] : memref<64x512xf32, #tpu.memory_space<vmem>>, vector<8x512xf32>
    %c32 = arith.constant 32 : index
    %c0_37 = arith.constant 0 : index
    %108 = vector.load %arg10[%c32, %c0_37] : memref<64x512xf32, #tpu.memory_space<vmem>>, vector<8x512xf32>
    %109 = arith.select %24, %107, %108 : vector<8x512xi1>, vector<8x512xf32>
    %cst_38 = arith.constant dense<0.000000e+00> : vector<8x512xf32>
    %110 = tpu.matmul %105, %35, %cst_38 {dimension_numbers = #tpu.dot_dimension_numbers<[1], [0], [0], [1], [0, 0, 1, 1], [], []>} : vector<8x128xbf16>, vector<128x512xbf16>, vector<8x512xf32> -> vector<8x512xf32>
    %111 = arith.addf %109, %110 : vector<8x512xf32>
    %112 = vector.extract_strided_slice %111 {offsets = [0, 0], sizes = [8, 384], strides = [1, 1]} : vector<8x512xf32> to vector<8x384xf32>
    %113 = arith.negf %112 : vector<8x384xf32>
    %114 = math.exp %113 : vector<8x384xf32>
    %cst_39 = arith.constant 1.000000e+00 : f32
    %115 = vector.broadcast %cst_39 : f32 to vector<8x384xf32>
    %116 = arith.addf %115, %114 : vector<8x384xf32>
    %117 = arith.divf %115, %116 : vector<8x384xf32>
    %118 = vector.extract_strided_slice %117 {offsets = [0, 0], sizes = [8, 128], strides = [1, 1]} : vector<8x384xf32> to vector<8x128xf32>
    %119 = vector.extract_strided_slice %117 {offsets = [0, 128], sizes = [8, 128], strides = [1, 1]} : vector<8x384xf32> to vector<8x128xf32>
    %120 = vector.extract_strided_slice %117 {offsets = [0, 256], sizes = [8, 128], strides = [1, 1]} : vector<8x384xf32> to vector<8x128xf32>
    %121 = vector.extract_strided_slice %111 {offsets = [0, 384], sizes = [8, 128], strides = [1, 1]} : vector<8x512xf32> to vector<8x128xf32>
    %122 = math.tanh %121 : vector<8x128xf32>
    %123 = arith.mulf %119, %102 : vector<8x128xf32>
    %124 = arith.mulf %118, %122 : vector<8x128xf32>
    %125 = arith.addf %123, %124 : vector<8x128xf32>
    %126 = math.tanh %125 : vector<8x128xf32>
    %127 = arith.mulf %120, %126 : vector<8x128xf32>
    %128 = arith.truncf %127 : vector<8x128xf32> to vector<8x128xbf16>
    %c24_40 = arith.constant 24 : index
    %c0_41 = arith.constant 0 : index
    %129 = vector.load %arg11[%c24_40, %c0_41] : memref<64x128xf32, #tpu.memory_space<vmem>>, vector<8x128xf32>
    tpu.vector_store %arg11[%c24_40, %c0_41], %127 {strides = array<i32>} : memref<64x128xf32, #tpu.memory_space<vmem>>, vector<8x128xf32>,
    %c32_42 = arith.constant 32 : index
    %c0_43 = arith.constant 0 : index
    %130 = vector.load %arg10[%c32_42, %c0_43] : memref<64x512xf32, #tpu.memory_space<vmem>>, vector<8x512xf32>
    %c24_44 = arith.constant 24 : index
    %c0_45 = arith.constant 0 : index
    %131 = vector.load %arg10[%c24_44, %c0_45] : memref<64x512xf32, #tpu.memory_space<vmem>>, vector<8x512xf32>
    %132 = arith.select %24, %130, %131 : vector<8x512xi1>, vector<8x512xf32>
    %cst_46 = arith.constant dense<0.000000e+00> : vector<8x512xf32>
    %133 = tpu.matmul %128, %35, %cst_46 {dimension_numbers = #tpu.dot_dimension_numbers<[1], [0], [0], [1], [0, 0, 1, 1], [], []>} : vector<8x128xbf16>, vector<128x512xbf16>, vector<8x512xf32> -> vector<8x512xf32>
    %134 = arith.addf %132, %133 : vector<8x512xf32>
    %135 = vector.extract_strided_slice %134 {offsets = [0, 0], sizes = [8, 384], strides = [1, 1]} : vector<8x512xf32> to vector<8x384xf32>
    %136 = arith.negf %135 : vector<8x384xf32>
    %137 = math.exp %136 : vector<8x384xf32>
    %cst_47 = arith.constant 1.000000e+00 : f32
    %138 = vector.broadcast %cst_47 : f32 to vector<8x384xf32>
    %139 = arith.addf %138, %137 : vector<8x384xf32>
    %140 = arith.divf %138, %139 : vector<8x384xf32>
    %141 = vector.extract_strided_slice %140 {offsets = [0, 0], sizes = [8, 128], strides = [1, 1]} : vector<8x384xf32> to vector<8x128xf32>
    %142 = vector.extract_strided_slice %140 {offsets = [0, 128], sizes = [8, 128], strides = [1, 1]} : vector<8x384xf32> to vector<8x128xf32>
    %143 = vector.extract_strided_slice %140 {offsets = [0, 256], sizes = [8, 128], strides = [1, 1]} : vector<8x384xf32> to vector<8x128xf32>
    %144 = vector.extract_strided_slice %134 {offsets = [0, 384], sizes = [8, 128], strides = [1, 1]} : vector<8x512xf32> to vector<8x128xf32>
    %145 = math.tanh %144 : vector<8x128xf32>
    %146 = arith.mulf %142, %125 : vector<8x128xf32>
    %147 = arith.mulf %141, %145 : vector<8x128xf32>
    %148 = arith.addf %146, %147 : vector<8x128xf32>
    %149 = math.tanh %148 : vector<8x128xf32>
    %150 = arith.mulf %143, %149 : vector<8x128xf32>
    %151 = arith.truncf %150 : vector<8x128xf32> to vector<8x128xbf16>
    %c32_48 = arith.constant 32 : index
    %c0_49 = arith.constant 0 : index
    %152 = vector.load %arg11[%c32_48, %c0_49] : memref<64x128xf32, #tpu.memory_space<vmem>>, vector<8x128xf32>
    tpu.vector_store %arg11[%c32_48, %c0_49], %150 {strides = array<i32>} : memref<64x128xf32, #tpu.memory_space<vmem>>, vector<8x128xf32>,
    %c40_50 = arith.constant 40 : index
    %c0_51 = arith.constant 0 : index
    %153 = vector.load %arg10[%c40_50, %c0_51] : memref<64x512xf32, #tpu.memory_space<vmem>>, vector<8x512xf32>
    %c16_52 = arith.constant 16 : index
    %c0_53 = arith.constant 0 : index
    %154 = vector.load %arg10[%c16_52, %c0_53] : memref<64x512xf32, #tpu.memory_space<vmem>>, vector<8x512xf32>
    %155 = arith.select %24, %153, %154 : vector<8x512xi1>, vector<8x512xf32>
    %cst_54 = arith.constant dense<0.000000e+00> : vector<8x512xf32>
    %156 = tpu.matmul %151, %35, %cst_54 {dimension_numbers = #tpu.dot_dimension_numbers<[1], [0], [0], [1], [0, 0, 1, 1], [], []>} : vector<8x128xbf16>, vector<128x512xbf16>, vector<8x512xf32> -> vector<8x512xf32>
    %157 = arith.addf %155, %156 : vector<8x512xf32>
    %158 = vector.extract_strided_slice %157 {offsets = [0, 0], sizes = [8, 384], strides = [1, 1]} : vector<8x512xf32> to vector<8x384xf32>
    %159 = arith.negf %158 : vector<8x384xf32>
    %160 = math.exp %159 : vector<8x384xf32>
    %cst_55 = arith.constant 1.000000e+00 : f32
    %161 = vector.broadcast %cst_55 : f32 to vector<8x384xf32>
    %162 = arith.addf %161, %160 : vector<8x384xf32>
    %163 = arith.divf %161, %162 : vector<8x384xf32>
    %164 = vector.extract_strided_slice %163 {offsets = [0, 0], sizes = [8, 128], strides = [1, 1]} : vector<8x384xf32> to vector<8x128xf32>
    %165 = vector.extract_strided_slice %163 {offsets = [0, 128], sizes = [8, 128], strides = [1, 1]} : vector<8x384xf32> to vector<8x128xf32>
    %166 = vector.extract_strided_slice %163 {offsets = [0, 256], sizes = [8, 128], strides = [1, 1]} : vector<8x384xf32> to vector<8x128xf32>
    %167 = vector.extract_strided_slice %157 {offsets = [0, 384], sizes = [8, 128], strides = [1, 1]} : vector<8x512xf32> to vector<8x128xf32>
    %168 = math.tanh %167 : vector<8x128xf32>
    %169 = arith.mulf %165, %148 : vector<8x128xf32>
    %170 = arith.mulf %164, %168 : vector<8x128xf32>
    %171 = arith.addf %169, %170 : vector<8x128xf32>
    %172 = math.tanh %171 : vector<8x128xf32>
    %173 = arith.mulf %166, %172 : vector<8x128xf32>
    %174 = arith.truncf %173 : vector<8x128xf32> to vector<8x128xbf16>
    %c40_56 = arith.constant 40 : index
    %c0_57 = arith.constant 0 : index
    %175 = vector.load %arg11[%c40_56, %c0_57] : memref<64x128xf32, #tpu.memory_space<vmem>>, vector<8x128xf32>
    tpu.vector_store %arg11[%c40_56, %c0_57], %173 {strides = array<i32>} : memref<64x128xf32, #tpu.memory_space<vmem>>, vector<8x128xf32>,
    %c48_58 = arith.constant 48 : index
    %c0_59 = arith.constant 0 : index
    %176 = vector.load %arg10[%c48_58, %c0_59] : memref<64x512xf32, #tpu.memory_space<vmem>>, vector<8x512xf32>
    %c8_60 = arith.constant 8 : index
    %c0_61 = arith.constant 0 : index
    %177 = vector.load %arg10[%c8_60, %c0_61] : memref<64x512xf32, #tpu.memory_space<vmem>>, vector<8x512xf32>
    %178 = arith.select %24, %176, %177 : vector<8x512xi1>, vector<8x512xf32>
    %cst_62 = arith.constant dense<0.000000e+00> : vector<8x512xf32>
    %179 = tpu.matmul %174, %35, %cst_62 {dimension_numbers = #tpu.dot_dimension_numbers<[1], [0], [0], [1], [0, 0, 1, 1], [], []>} : vector<8x128xbf16>, vector<128x512xbf16>, vector<8x512xf32> -> vector<8x512xf32>
    %180 = arith.addf %178, %179 : vector<8x512xf32>
    %181 = vector.extract_strided_slice %180 {offsets = [0, 0], sizes = [8, 384], strides = [1, 1]} : vector<8x512xf32> to vector<8x384xf32>
    %182 = arith.negf %181 : vector<8x384xf32>
    %183 = math.exp %182 : vector<8x384xf32>
    %cst_63 = arith.constant 1.000000e+00 : f32
    %184 = vector.broadcast %cst_63 : f32 to vector<8x384xf32>
    %185 = arith.addf %184, %183 : vector<8x384xf32>
    %186 = arith.divf %184, %185 : vector<8x384xf32>
    %187 = vector.extract_strided_slice %186 {offsets = [0, 0], sizes = [8, 128], strides = [1, 1]} : vector<8x384xf32> to vector<8x128xf32>
    %188 = vector.extract_strided_slice %186 {offsets = [0, 128], sizes = [8, 128], strides = [1, 1]} : vector<8x384xf32> to vector<8x128xf32>
    %189 = vector.extract_strided_slice %186 {offsets = [0, 256], sizes = [8, 128], strides = [1, 1]} : vector<8x384xf32> to vector<8x128xf32>
    %190 = vector.extract_strided_slice %180 {offsets = [0, 384], sizes = [8, 128], strides = [1, 1]} : vector<8x512xf32> to vector<8x128xf32>
    %191 = math.tanh %190 : vector<8x128xf32>
    %192 = arith.mulf %188, %171 : vector<8x128xf32>
    %193 = arith.mulf %187, %191 : vector<8x128xf32>
    %194 = arith.addf %192, %193 : vector<8x128xf32>
    %195 = math.tanh %194 : vector<8x128xf32>
    %196 = arith.mulf %189, %195 : vector<8x128xf32>
    %197 = arith.truncf %196 : vector<8x128xf32> to vector<8x128xbf16>
    %c48_64 = arith.constant 48 : index
    %c0_65 = arith.constant 0 : index
    %198 = vector.load %arg11[%c48_64, %c0_65] : memref<64x128xf32, #tpu.memory_space<vmem>>, vector<8x128xf32>
    tpu.vector_store %arg11[%c48_64, %c0_65], %196 {strides = array<i32>} : memref<64x128xf32, #tpu.memory_space<vmem>>, vector<8x128xf32>,
    %c56_66 = arith.constant 56 : index
    %c0_67 = arith.constant 0 : index
    %199 = vector.load %arg10[%c56_66, %c0_67] : memref<64x512xf32, #tpu.memory_space<vmem>>, vector<8x512xf32>
    %c0_68 = arith.constant 0 : index
    %c0_69 = arith.constant 0 : index
    %200 = vector.load %arg10[%c0_68, %c0_69] : memref<64x512xf32, #tpu.memory_space<vmem>>, vector<8x512xf32>
    %201 = arith.select %24, %199, %200 : vector<8x512xi1>, vector<8x512xf32>
    %cst_70 = arith.constant dense<0.000000e+00> : vector<8x512xf32>
    %202 = tpu.matmul %197, %35, %cst_70 {dimension_numbers = #tpu.dot_dimension_numbers<[1], [0], [0], [1], [0, 0, 1, 1], [], []>} : vector<8x128xbf16>, vector<128x512xbf16>, vector<8x512xf32> -> vector<8x512xf32>
    %203 = arith.addf %201, %202 : vector<8x512xf32>
    %204 = vector.extract_strided_slice %203 {offsets = [0, 0], sizes = [8, 384], strides = [1, 1]} : vector<8x512xf32> to vector<8x384xf32>
    %205 = arith.negf %204 : vector<8x384xf32>
    %206 = math.exp %205 : vector<8x384xf32>
    %cst_71 = arith.constant 1.000000e+00 : f32
    %207 = vector.broadcast %cst_71 : f32 to vector<8x384xf32>
    %208 = arith.addf %207, %206 : vector<8x384xf32>
    %209 = arith.divf %207, %208 : vector<8x384xf32>
    %210 = vector.extract_strided_slice %209 {offsets = [0, 0], sizes = [8, 128], strides = [1, 1]} : vector<8x384xf32> to vector<8x128xf32>
    %211 = vector.extract_strided_slice %209 {offsets = [0, 128], sizes = [8, 128], strides = [1, 1]} : vector<8x384xf32> to vector<8x128xf32>
    %212 = vector.extract_strided_slice %209 {offsets = [0, 256], sizes = [8, 128], strides = [1, 1]} : vector<8x384xf32> to vector<8x128xf32>
    %213 = vector.extract_strided_slice %203 {offsets = [0, 384], sizes = [8, 128], strides = [1, 1]} : vector<8x512xf32> to vector<8x128xf32>
    %214 = math.tanh %213 : vector<8x128xf32>
    %215 = arith.mulf %211, %194 : vector<8x128xf32>
    %216 = arith.mulf %210, %214 : vector<8x128xf32>
    %217 = arith.addf %215, %216 : vector<8x128xf32>
    %218 = math.tanh %217 : vector<8x128xf32>
    %219 = arith.mulf %212, %218 : vector<8x128xf32>
    %c56_72 = arith.constant 56 : index
    %c0_73 = arith.constant 0 : index
    %220 = vector.load %arg11[%c56_72, %c0_73] : memref<64x128xf32, #tpu.memory_space<vmem>>, vector<8x128xf32>
    tpu.vector_store %arg11[%c56_72, %c0_73], %219 {strides = array<i32>} : memref<64x128xf32, #tpu.memory_space<vmem>>, vector<8x128xf32>,
    %c0_74 = arith.constant 0 : index
    %c0_75 = arith.constant 0 : index
    %221 = vector.load %arg11[%c0_74, %c0_75] : memref<64x128xf32, #tpu.memory_space<vmem>>, vector<8x128xf32>
    %c56_76 = arith.constant 56 : index
    %c0_77 = arith.constant 0 : index
    %222 = vector.load %arg11[%c56_76, %c0_77] : memref<64x128xf32, #tpu.memory_space<vmem>>, vector<8x128xf32>
    %223 = arith.select %27, %221, %222 : vector<8x128xi1>, vector<8x128xf32>
    %c8_78 = arith.constant 8 : index
    %c0_79 = arith.constant 0 : index
    %224 = vector.load %arg11[%c8_78, %c0_79] : memref<64x128xf32, #tpu.memory_space<vmem>>, vector<8x128xf32>
    %c48_80 = arith.constant 48 : index
    %c0_81 = arith.constant 0 : index
    %225 = vector.load %arg11[%c48_80, %c0_81] : memref<64x128xf32, #tpu.memory_space<vmem>>, vector<8x128xf32>
    %226 = arith.select %27, %224, %225 : vector<8x128xi1>, vector<8x128xf32>
    %c16_82 = arith.constant 16 : index
    %c0_83 = arith.constant 0 : index
    %227 = vector.load %arg11[%c16_82, %c0_83] : memref<64x128xf32, #tpu.memory_space<vmem>>, vector<8x128xf32>
    %c40_84 = arith.constant 40 : index
    %c0_85 = arith.constant 0 : index
    %228 = vector.load %arg11[%c40_84, %c0_85] : memref<64x128xf32, #tpu.memory_space<vmem>>, vector<8x128xf32>
    %229 = arith.select %27, %227, %228 : vector<8x128xi1>, vector<8x128xf32>
    %c24_86 = arith.constant 24 : index
    %c0_87 = arith.constant 0 : index
    %230 = vector.load %arg11[%c24_86, %c0_87] : memref<64x128xf32, #tpu.memory_space<vmem>>, vector<8x128xf32>
    %c32_88 = arith.constant 32 : index
    %c0_89 = arith.constant 0 : index
    %231 = vector.load %arg11[%c32_88, %c0_89] : memref<64x128xf32, #tpu.memory_space<vmem>>, vector<8x128xf32>
    %232 = arith.select %27, %230, %231 : vector<8x128xi1>, vector<8x128xf32>
    %c32_90 = arith.constant 32 : index
    %c0_91 = arith.constant 0 : index
    %233 = vector.load %arg11[%c32_90, %c0_91] : memref<64x128xf32, #tpu.memory_space<vmem>>, vector<8x128xf32>
    %c24_92 = arith.constant 24 : index
    %c0_93 = arith.constant 0 : index
    %234 = vector.load %arg11[%c24_92, %c0_93] : memref<64x128xf32, #tpu.memory_space<vmem>>, vector<8x128xf32>
    %235 = arith.select %27, %233, %234 : vector<8x128xi1>, vector<8x128xf32>
    %c40_94 = arith.constant 40 : index
    %c0_95 = arith.constant 0 : index
    %236 = vector.load %arg11[%c40_94, %c0_95] : memref<64x128xf32, #tpu.memory_space<vmem>>, vector<8x128xf32>
    %c16_96 = arith.constant 16 : index
    %c0_97 = arith.constant 0 : index
    %237 = vector.load %arg11[%c16_96, %c0_97] : memref<64x128xf32, #tpu.memory_space<vmem>>, vector<8x128xf32>
    %238 = arith.select %27, %236, %237 : vector<8x128xi1>, vector<8x128xf32>
    %c48_98 = arith.constant 48 : index
    %c0_99 = arith.constant 0 : index
    %239 = vector.load %arg11[%c48_98, %c0_99] : memref<64x128xf32, #tpu.memory_space<vmem>>, vector<8x128xf32>
    %c8_100 = arith.constant 8 : index
    %c0_101 = arith.constant 0 : index
    %240 = vector.load %arg11[%c8_100, %c0_101] : memref<64x128xf32, #tpu.memory_space<vmem>>, vector<8x128xf32>
    %241 = arith.select %27, %239, %240 : vector<8x128xi1>, vector<8x128xf32>
    %c56_102 = arith.constant 56 : index
    %c0_103 = arith.constant 0 : index
    %242 = vector.load %arg11[%c56_102, %c0_103] : memref<64x128xf32, #tpu.memory_space<vmem>>, vector<8x128xf32>
    %c0_104 = arith.constant 0 : index
    %c0_105 = arith.constant 0 : index
    %243 = vector.load %arg11[%c0_104, %c0_105] : memref<64x128xf32, #tpu.memory_space<vmem>>, vector<8x128xf32>
    %244 = arith.select %27, %242, %243 : vector<8x128xi1>, vector<8x128xf32>
    %245 = tpu.concatenate %223, %226, %229, %232, %235, %238, %241, %244 in 0 : vector<8x128xf32>, vector<8x128xf32>, vector<8x128xf32>, vector<8x128xf32>, vector<8x128xf32>, vector<8x128xf32>, vector<8x128xf32>, vector<8x128xf32> -> vector<64x128xf32>
    %246 = arith.truncf %245 : vector<64x128xf32> to vector<64x128xbf16>
    %c0_i32_106 = arith.constant 0 : i32
    %247 = tpu.memref_slice %arg15[%c0_i32_106] : memref<3x!tpu.dma_semaphore, #tpu.memory_space<semaphore_mem>> -> memref<1x!tpu.dma_semaphore, #tpu.memory_space<semaphore_mem>>
    %248 = tpu.memref_squeeze %247 : memref<1x!tpu.dma_semaphore, #tpu.memory_space<semaphore_mem>> -> memref<!tpu.dma_semaphore, #tpu.memory_space<semaphore_mem>>
    tpu.wait_dma2 semaphore(%248 : memref<!tpu.dma_semaphore, #tpu.memory_space<semaphore_mem>>) src(%arg4 : memref<128x512xbf16, #tpu.memory_space<any>>) dst(%arg12 : memref<128x512xbf16, #tpu.memory_space<vmem>>)
    %c1_i32_107 = arith.constant 1 : i32
    %249 = tpu.memref_slice %arg15[%c1_i32_107] : memref<3x!tpu.dma_semaphore, #tpu.memory_space<semaphore_mem>> -> memref<1x!tpu.dma_semaphore, #tpu.memory_space<semaphore_mem>>
    %250 = tpu.memref_squeeze %249 : memref<1x!tpu.dma_semaphore, #tpu.memory_space<semaphore_mem>> -> memref<!tpu.dma_semaphore, #tpu.memory_space<semaphore_mem>>
    tpu.wait_dma2 semaphore(%250 : memref<!tpu.dma_semaphore, #tpu.memory_space<semaphore_mem>>) src(%arg5 : memref<128x512xbf16, #tpu.memory_space<any>>) dst(%arg13 : memref<128x512xbf16, #tpu.memory_space<vmem>>)
    %c2_i32_108 = arith.constant 2 : i32
    %251 = tpu.memref_slice %arg15[%c2_i32_108] : memref<3x!tpu.dma_semaphore, #tpu.memory_space<semaphore_mem>> -> memref<1x!tpu.dma_semaphore, #tpu.memory_space<semaphore_mem>>
    %252 = tpu.memref_squeeze %251 : memref<1x!tpu.dma_semaphore, #tpu.memory_space<semaphore_mem>> -> memref<!tpu.dma_semaphore, #tpu.memory_space<semaphore_mem>>
    tpu.wait_dma2 semaphore(%252 : memref<!tpu.dma_semaphore, #tpu.memory_space<semaphore_mem>>) src(%arg6 : memref<1x512xf32, #tpu.memory_space<any>>) dst(%arg14 : memref<1x512xf32, #tpu.memory_space<vmem>>)
    %c0_109 = arith.constant 0 : index
    %c0_110 = arith.constant 0 : index
    %253 = vector.load %arg12[%c0_109, %c0_110] : memref<128x512xbf16, #tpu.memory_space<vmem>>, vector<128x512xbf16>
    %cst_111 = arith.constant dense<0.000000e+00> : vector<64x512xf32>
    %254 = tpu.matmul %246, %253, %cst_111 {dimension_numbers = #tpu.dot_dimension_numbers<[1], [0], [0], [1], [0, 0, 1, 1], [], []>} : vector<64x128xbf16>, vector<128x512xbf16>, vector<64x512xf32> -> vector<64x512xf32>
    %c0_112 = arith.constant 0 : index
    %c0_113 = arith.constant 0 : index
    %255 = vector.load %arg14[%c0_112, %c0_113] : memref<1x512xf32, #tpu.memory_space<vmem>>, vector<1x512xf32>
    %256 = vector.broadcast %255 : vector<1x512xf32> to vector<64x512xf32>
    %257 = arith.addf %254, %256 : vector<64x512xf32>
    %c0_114 = arith.constant 0 : index
    %c0_115 = arith.constant 0 : index
    %258 = vector.load %arg10[%c0_114, %c0_115] : memref<64x512xf32, #tpu.memory_space<vmem>>, vector<64x512xf32>
    tpu.vector_store %arg10[%c0_114, %c0_115], %257 {strides = array<i32>} : memref<64x512xf32, #tpu.memory_space<vmem>>, vector<64x512xf32>,
    %c0_116 = arith.constant 0 : index
    %c0_117 = arith.constant 0 : index
    %259 = vector.load %arg13[%c0_116, %c0_117] : memref<128x512xbf16, #tpu.memory_space<vmem>>, vector<128x512xbf16>
    %cst_118 = arith.constant 0.000000e+00 : bf16
    %260 = vector.broadcast %cst_118 : bf16 to vector<8x128xbf16>
    %cst_119 = arith.constant 0.000000e+00 : f32
    %261 = vector.broadcast %cst_119 : f32 to vector<8x128xf32>
    %c0_120 = arith.constant 0 : index
    %c0_121 = arith.constant 0 : index
    %262 = vector.load %arg10[%c0_120, %c0_121] : memref<64x512xf32, #tpu.memory_space<vmem>>, vector<8x512xf32>
    %c56_122 = arith.constant 56 : index
    %c0_123 = arith.constant 0 : index
    %263 = vector.load %arg10[%c56_122, %c0_123] : memref<64x512xf32, #tpu.memory_space<vmem>>, vector<8x512xf32>
    %264 = arith.select %24, %262, %263 : vector<8x512xi1>, vector<8x512xf32>
    %cst_124 = arith.constant dense<0.000000e+00> : vector<8x512xf32>
    %265 = tpu.matmul %260, %259, %cst_124 {dimension_numbers = #tpu.dot_dimension_numbers<[1], [0], [0], [1], [0, 0, 1, 1], [], []>} : vector<8x128xbf16>, vector<128x512xbf16>, vector<8x512xf32> -> vector<8x512xf32>
    %266 = arith.addf %264, %265 : vector<8x512xf32>
    %267 = vector.extract_strided_slice %266 {offsets = [0, 0], sizes = [8, 384], strides = [1, 1]} : vector<8x512xf32> to vector<8x384xf32>
    %268 = arith.negf %267 : vector<8x384xf32>
    %269 = math.exp %268 : vector<8x384xf32>
    %cst_125 = arith.constant 1.000000e+00 : f32
    %270 = vector.broadcast %cst_125 : f32 to vector<8x384xf32>
    %271 = arith.addf %270, %269 : vector<8x384xf32>
    %272 = arith.divf %270, %271 : vector<8x384xf32>
    %273 = vector.extract_strided_slice %272 {offsets = [0, 0], sizes = [8, 128], strides = [1, 1]} : vector<8x384xf32> to vector<8x128xf32>
    %274 = vector.extract_strided_slice %272 {offsets = [0, 128], sizes = [8, 128], strides = [1, 1]} : vector<8x384xf32> to vector<8x128xf32>
    %275 = vector.extract_strided_slice %272 {offsets = [0, 256], sizes = [8, 128], strides = [1, 1]} : vector<8x384xf32> to vector<8x128xf32>
    %276 = vector.extract_strided_slice %266 {offsets = [0, 384], sizes = [8, 128], strides = [1, 1]} : vector<8x512xf32> to vector<8x128xf32>
    %277 = math.tanh %276 : vector<8x128xf32>
    %278 = arith.mulf %274, %261 : vector<8x128xf32>
    %279 = arith.mulf %273, %277 : vector<8x128xf32>
    %280 = arith.addf %278, %279 : vector<8x128xf32>
    %281 = math.tanh %280 : vector<8x128xf32>
    %282 = arith.mulf %275, %281 : vector<8x128xf32>
    %283 = arith.truncf %282 : vector<8x128xf32> to vector<8x128xbf16>
    %c8_126 = arith.constant 8 : index
    %c0_127 = arith.constant 0 : index
    %284 = vector.load %arg10[%c8_126, %c0_127] : memref<64x512xf32, #tpu.memory_space<vmem>>, vector<8x512xf32>
    %c48_128 = arith.constant 48 : index
    %c0_129 = arith.constant 0 : index
    %285 = vector.load %arg10[%c48_128, %c0_129] : memref<64x512xf32, #tpu.memory_space<vmem>>, vector<8x512xf32>
    %286 = arith.select %24, %284, %285 : vector<8x512xi1>, vector<8x512xf32>
    %cst_130 = arith.constant dense<0.000000e+00> : vector<8x512xf32>
    %287 = tpu.matmul %283, %259, %cst_130 {dimension_numbers = #tpu.dot_dimension_numbers<[1], [0], [0], [1], [0, 0, 1, 1], [], []>} : vector<8x128xbf16>, vector<128x512xbf16>, vector<8x512xf32> -> vector<8x512xf32>
    %288 = arith.addf %286, %287 : vector<8x512xf32>
    %289 = vector.extract_strided_slice %288 {offsets = [0, 0], sizes = [8, 384], strides = [1, 1]} : vector<8x512xf32> to vector<8x384xf32>
    %290 = arith.negf %289 : vector<8x384xf32>
    %291 = math.exp %290 : vector<8x384xf32>
    %cst_131 = arith.constant 1.000000e+00 : f32
    %292 = vector.broadcast %cst_131 : f32 to vector<8x384xf32>
    %293 = arith.addf %292, %291 : vector<8x384xf32>
    %294 = arith.divf %292, %293 : vector<8x384xf32>
    %295 = vector.extract_strided_slice %294 {offsets = [0, 0], sizes = [8, 128], strides = [1, 1]} : vector<8x384xf32> to vector<8x128xf32>
    %296 = vector.extract_strided_slice %294 {offsets = [0, 128], sizes = [8, 128], strides = [1, 1]} : vector<8x384xf32> to vector<8x128xf32>
    %297 = vector.extract_strided_slice %294 {offsets = [0, 256], sizes = [8, 128], strides = [1, 1]} : vector<8x384xf32> to vector<8x128xf32>
    %298 = vector.extract_strided_slice %288 {offsets = [0, 384], sizes = [8, 128], strides = [1, 1]} : vector<8x512xf32> to vector<8x128xf32>
    %299 = math.tanh %298 : vector<8x128xf32>
    %300 = arith.mulf %296, %280 : vector<8x128xf32>
    %301 = arith.mulf %295, %299 : vector<8x128xf32>
    %302 = arith.addf %300, %301 : vector<8x128xf32>
    %303 = math.tanh %302 : vector<8x128xf32>
    %304 = arith.mulf %297, %303 : vector<8x128xf32>
    %305 = arith.truncf %304 : vector<8x128xf32> to vector<8x128xbf16>
    %c16_132 = arith.constant 16 : index
    %c0_133 = arith.constant 0 : index
    %306 = vector.load %arg10[%c16_132, %c0_133] : memref<64x512xf32, #tpu.memory_space<vmem>>, vector<8x512xf32>
    %c40_134 = arith.constant 40 : index
    %c0_135 = arith.constant 0 : index
    %307 = vector.load %arg10[%c40_134, %c0_135] : memref<64x512xf32, #tpu.memory_space<vmem>>, vector<8x512xf32>
    %308 = arith.select %24, %306, %307 : vector<8x512xi1>, vector<8x512xf32>
    %cst_136 = arith.constant dense<0.000000e+00> : vector<8x512xf32>
    %309 = tpu.matmul %305, %259, %cst_136 {dimension_numbers = #tpu.dot_dimension_numbers<[1], [0], [0], [1], [0, 0, 1, 1], [], []>} : vector<8x128xbf16>, vector<128x512xbf16>, vector<8x512xf32> -> vector<8x512xf32>
    %310 = arith.addf %308, %309 : vector<8x512xf32>
    %311 = vector.extract_strided_slice %310 {offsets = [0, 0], sizes = [8, 384], strides = [1, 1]} : vector<8x512xf32> to vector<8x384xf32>
    %312 = arith.negf %311 : vector<8x384xf32>
    %313 = math.exp %312 : vector<8x384xf32>
    %cst_137 = arith.constant 1.000000e+00 : f32
    %314 = vector.broadcast %cst_137 : f32 to vector<8x384xf32>
    %315 = arith.addf %314, %313 : vector<8x384xf32>
    %316 = arith.divf %314, %315 : vector<8x384xf32>
    %317 = vector.extract_strided_slice %316 {offsets = [0, 0], sizes = [8, 128], strides = [1, 1]} : vector<8x384xf32> to vector<8x128xf32>
    %318 = vector.extract_strided_slice %316 {offsets = [0, 128], sizes = [8, 128], strides = [1, 1]} : vector<8x384xf32> to vector<8x128xf32>
    %319 = vector.extract_strided_slice %316 {offsets = [0, 256], sizes = [8, 128], strides = [1, 1]} : vector<8x384xf32> to vector<8x128xf32>
    %320 = vector.extract_strided_slice %310 {offsets = [0, 384], sizes = [8, 128], strides = [1, 1]} : vector<8x512xf32> to vector<8x128xf32>
    %321 = math.tanh %320 : vector<8x128xf32>
    %322 = arith.mulf %318, %302 : vector<8x128xf32>
    %323 = arith.mulf %317, %321 : vector<8x128xf32>
    %324 = arith.addf %322, %323 : vector<8x128xf32>
    %325 = math.tanh %324 : vector<8x128xf32>
    %326 = arith.mulf %319, %325 : vector<8x128xf32>
    %327 = arith.truncf %326 : vector<8x128xf32> to vector<8x128xbf16>
    %c24_138 = arith.constant 24 : index
    %c0_139 = arith.constant 0 : index
    %328 = vector.load %arg10[%c24_138, %c0_139] : memref<64x512xf32, #tpu.memory_space<vmem>>, vector<8x512xf32>
    %c32_140 = arith.constant 32 : index
    %c0_141 = arith.constant 0 : index
    %329 = vector.load %arg10[%c32_140, %c0_141] : memref<64x512xf32, #tpu.memory_space<vmem>>, vector<8x512xf32>
    %330 = arith.select %24, %328, %329 : vector<8x512xi1>, vector<8x512xf32>
    %cst_142 = arith.constant dense<0.000000e+00> : vector<8x512xf32>
    %331 = tpu.matmul %327, %259, %cst_142 {dimension_numbers = #tpu.dot_dimension_numbers<[1], [0], [0], [1], [0, 0, 1, 1], [], []>} : vector<8x128xbf16>, vector<128x512xbf16>, vector<8x512xf32> -> vector<8x512xf32>
    %332 = arith.addf %330, %331 : vector<8x512xf32>
    %333 = vector.extract_strided_slice %332 {offsets = [0, 0], sizes = [8, 384], strides = [1, 1]} : vector<8x512xf32> to vector<8x384xf32>
    %334 = arith.negf %333 : vector<8x384xf32>
    %335 = math.exp %334 : vector<8x384xf32>
    %cst_143 = arith.constant 1.000000e+00 : f32
    %336 = vector.broadcast %cst_143 : f32 to vector<8x384xf32>
    %337 = arith.addf %336, %335 : vector<8x384xf32>
    %338 = arith.divf %336, %337 : vector<8x384xf32>
    %339 = vector.extract_strided_slice %338 {offsets = [0, 0], sizes = [8, 128], strides = [1, 1]} : vector<8x384xf32> to vector<8x128xf32>
    %340 = vector.extract_strided_slice %338 {offsets = [0, 128], sizes = [8, 128], strides = [1, 1]} : vector<8x384xf32> to vector<8x128xf32>
    %341 = vector.extract_strided_slice %338 {offsets = [0, 256], sizes = [8, 128], strides = [1, 1]} : vector<8x384xf32> to vector<8x128xf32>
    %342 = vector.extract_strided_slice %332 {offsets = [0, 384], sizes = [8, 128], strides = [1, 1]} : vector<8x512xf32> to vector<8x128xf32>
    %343 = math.tanh %342 : vector<8x128xf32>
    %344 = arith.mulf %340, %324 : vector<8x128xf32>
    %345 = arith.mulf %339, %343 : vector<8x128xf32>
    %346 = arith.addf %344, %345 : vector<8x128xf32>
    %347 = math.tanh %346 : vector<8x128xf32>
    %348 = arith.mulf %341, %347 : vector<8x128xf32>
    %349 = arith.truncf %348 : vector<8x128xf32> to vector<8x128xbf16>
    %c32_144 = arith.constant 32 : index
    %c0_145 = arith.constant 0 : index
    %350 = vector.load %arg10[%c32_144, %c0_145] : memref<64x512xf32, #tpu.memory_space<vmem>>, vector<8x512xf32>
    %c24_146 = arith.constant 24 : index
    %c0_147 = arith.constant 0 : index
    %351 = vector.load %arg10[%c24_146, %c0_147] : memref<64x512xf32, #tpu.memory_space<vmem>>, vector<8x512xf32>
    %352 = arith.select %24, %350, %351 : vector<8x512xi1>, vector<8x512xf32>
    %cst_148 = arith.constant dense<0.000000e+00> : vector<8x512xf32>
    %353 = tpu.matmul %349, %259, %cst_148 {dimension_numbers = #tpu.dot_dimension_numbers<[1], [0], [0], [1], [0, 0, 1, 1], [], []>} : vector<8x128xbf16>, vector<128x512xbf16>, vector<8x512xf32> -> vector<8x512xf32>
    %354 = arith.addf %352, %353 : vector<8x512xf32>
    %355 = vector.extract_strided_slice %354 {offsets = [0, 0], sizes = [8, 384], strides = [1, 1]} : vector<8x512xf32> to vector<8x384xf32>
    %356 = arith.negf %355 : vector<8x384xf32>
    %357 = math.exp %356 : vector<8x384xf32>
    %cst_149 = arith.constant 1.000000e+00 : f32
    %358 = vector.broadcast %cst_149 : f32 to vector<8x384xf32>
    %359 = arith.addf %358, %357 : vector<8x384xf32>
    %360 = arith.divf %358, %359 : vector<8x384xf32>
    %361 = vector.extract_strided_slice %360 {offsets = [0, 0], sizes = [8, 128], strides = [1, 1]} : vector<8x384xf32> to vector<8x128xf32>
    %362 = vector.extract_strided_slice %360 {offsets = [0, 128], sizes = [8, 128], strides = [1, 1]} : vector<8x384xf32> to vector<8x128xf32>
    %363 = vector.extract_strided_slice %360 {offsets = [0, 256], sizes = [8, 128], strides = [1, 1]} : vector<8x384xf32> to vector<8x128xf32>
    %364 = vector.extract_strided_slice %354 {offsets = [0, 384], sizes = [8, 128], strides = [1, 1]} : vector<8x512xf32> to vector<8x128xf32>
    %365 = math.tanh %364 : vector<8x128xf32>
    %366 = arith.mulf %362, %346 : vector<8x128xf32>
    %367 = arith.mulf %361, %365 : vector<8x128xf32>
    %368 = arith.addf %366, %367 : vector<8x128xf32>
    %369 = math.tanh %368 : vector<8x128xf32>
    %370 = arith.mulf %363, %369 : vector<8x128xf32>
    %371 = arith.truncf %370 : vector<8x128xf32> to vector<8x128xbf16>
    %c40_150 = arith.constant 40 : index
    %c0_151 = arith.constant 0 : index
    %372 = vector.load %arg10[%c40_150, %c0_151] : memref<64x512xf32, #tpu.memory_space<vmem>>, vector<8x512xf32>
    %c16_152 = arith.constant 16 : index
    %c0_153 = arith.constant 0 : index
    %373 = vector.load %arg10[%c16_152, %c0_153] : memref<64x512xf32, #tpu.memory_space<vmem>>, vector<8x512xf32>
    %374 = arith.select %24, %372, %373 : vector<8x512xi1>, vector<8x512xf32>
    %cst_154 = arith.constant dense<0.000000e+00> : vector<8x512xf32>
    %375 = tpu.matmul %371, %259, %cst_154 {dimension_numbers = #tpu.dot_dimension_numbers<[1], [0], [0], [1], [0, 0, 1, 1], [], []>} : vector<8x128xbf16>, vector<128x512xbf16>, vector<8x512xf32> -> vector<8x512xf32>
    %376 = arith.addf %374, %375 : vector<8x512xf32>
    %377 = vector.extract_strided_slice %376 {offsets = [0, 0], sizes = [8, 384], strides = [1, 1]} : vector<8x512xf32> to vector<8x384xf32>
    %378 = arith.negf %377 : vector<8x384xf32>
    %379 = math.exp %378 : vector<8x384xf32>
    %cst_155 = arith.constant 1.000000e+00 : f32
    %380 = vector.broadcast %cst_155 : f32 to vector<8x384xf32>
    %381 = arith.addf %380, %379 : vector<8x384xf32>
    %382 = arith.divf %380, %381 : vector<8x384xf32>
    %383 = vector.extract_strided_slice %382 {offsets = [0, 0], sizes = [8, 128], strides = [1, 1]} : vector<8x384xf32> to vector<8x128xf32>
    %384 = vector.extract_strided_slice %382 {offsets = [0, 128], sizes = [8, 128], strides = [1, 1]} : vector<8x384xf32> to vector<8x128xf32>
    %385 = vector.extract_strided_slice %382 {offsets = [0, 256], sizes = [8, 128], strides = [1, 1]} : vector<8x384xf32> to vector<8x128xf32>
    %386 = vector.extract_strided_slice %376 {offsets = [0, 384], sizes = [8, 128], strides = [1, 1]} : vector<8x512xf32> to vector<8x128xf32>
    %387 = math.tanh %386 : vector<8x128xf32>
    %388 = arith.mulf %384, %368 : vector<8x128xf32>
    %389 = arith.mulf %383, %387 : vector<8x128xf32>
    %390 = arith.addf %388, %389 : vector<8x128xf32>
    %391 = math.tanh %390 : vector<8x128xf32>
    %392 = arith.mulf %385, %391 : vector<8x128xf32>
    %393 = arith.truncf %392 : vector<8x128xf32> to vector<8x128xbf16>
    %c48_156 = arith.constant 48 : index
    %c0_157 = arith.constant 0 : index
    %394 = vector.load %arg10[%c48_156, %c0_157] : memref<64x512xf32, #tpu.memory_space<vmem>>, vector<8x512xf32>
    %c8_158 = arith.constant 8 : index
    %c0_159 = arith.constant 0 : index
    %395 = vector.load %arg10[%c8_158, %c0_159] : memref<64x512xf32, #tpu.memory_space<vmem>>, vector<8x512xf32>
    %396 = arith.select %24, %394, %395 : vector<8x512xi1>, vector<8x512xf32>
    %cst_160 = arith.constant dense<0.000000e+00> : vector<8x512xf32>
    %397 = tpu.matmul %393, %259, %cst_160 {dimension_numbers = #tpu.dot_dimension_numbers<[1], [0], [0], [1], [0, 0, 1, 1], [], []>} : vector<8x128xbf16>, vector<128x512xbf16>, vector<8x512xf32> -> vector<8x512xf32>
    %398 = arith.addf %396, %397 : vector<8x512xf32>
    %399 = vector.extract_strided_slice %398 {offsets = [0, 0], sizes = [8, 384], strides = [1, 1]} : vector<8x512xf32> to vector<8x384xf32>
    %400 = arith.negf %399 : vector<8x384xf32>
    %401 = math.exp %400 : vector<8x384xf32>
    %cst_161 = arith.constant 1.000000e+00 : f32
    %402 = vector.broadcast %cst_161 : f32 to vector<8x384xf32>
    %403 = arith.addf %402, %401 : vector<8x384xf32>
    %404 = arith.divf %402, %403 : vector<8x384xf32>
    %405 = vector.extract_strided_slice %404 {offsets = [0, 0], sizes = [8, 128], strides = [1, 1]} : vector<8x384xf32> to vector<8x128xf32>
    %406 = vector.extract_strided_slice %404 {offsets = [0, 128], sizes = [8, 128], strides = [1, 1]} : vector<8x384xf32> to vector<8x128xf32>
    %407 = vector.extract_strided_slice %404 {offsets = [0, 256], sizes = [8, 128], strides = [1, 1]} : vector<8x384xf32> to vector<8x128xf32>
    %408 = vector.extract_strided_slice %398 {offsets = [0, 384], sizes = [8, 128], strides = [1, 1]} : vector<8x512xf32> to vector<8x128xf32>
    %409 = math.tanh %408 : vector<8x128xf32>
    %410 = arith.mulf %406, %390 : vector<8x128xf32>
    %411 = arith.mulf %405, %409 : vector<8x128xf32>
    %412 = arith.addf %410, %411 : vector<8x128xf32>
    %413 = math.tanh %412 : vector<8x128xf32>
    %414 = arith.mulf %407, %413 : vector<8x128xf32>
    %415 = arith.truncf %414 : vector<8x128xf32> to vector<8x128xbf16>
    %c56_162 = arith.constant 56 : index
    %c0_163 = arith.constant 0 : index
    %416 = vector.load %arg10[%c56_162, %c0_163] : memref<64x512xf32, #tpu.memory_space<vmem>>, vector<8x512xf32>
    %c0_164 = arith.constant 0 : index
    %c0_165 = arith.constant 0 : index
    %417 = vector.load %arg10[%c0_164, %c0_165] : memref<64x512xf32, #tpu.memory_space<vmem>>, vector<8x512xf32>
    %418 = arith.select %24, %416, %417 : vector<8x512xi1>, vector<8x512xf32>
    %cst_166 = arith.constant dense<0.000000e+00> : vector<8x512xf32>
    %419 = tpu.matmul %415, %259, %cst_166 {dimension_numbers = #tpu.dot_dimension_numbers<[1], [0], [0], [1], [0, 0, 1, 1], [], []>} : vector<8x128xbf16>, vector<128x512xbf16>, vector<8x512xf32> -> vector<8x512xf32>
    %420 = arith.addf %418, %419 : vector<8x512xf32>
    %421 = vector.extract_strided_slice %420 {offsets = [0, 0], sizes = [8, 384], strides = [1, 1]} : vector<8x512xf32> to vector<8x384xf32>
    %422 = arith.negf %421 : vector<8x384xf32>
    %423 = math.exp %422 : vector<8x384xf32>
    %cst_167 = arith.constant 1.000000e+00 : f32
    %424 = vector.broadcast %cst_167 : f32 to vector<8x384xf32>
    %425 = arith.addf %424, %423 : vector<8x384xf32>
    %426 = arith.divf %424, %425 : vector<8x384xf32>
    %427 = vector.extract_strided_slice %426 {offsets = [0, 0], sizes = [8, 128], strides = [1, 1]} : vector<8x384xf32> to vector<8x128xf32>
    %428 = vector.extract_strided_slice %426 {offsets = [0, 128], sizes = [8, 128], strides = [1, 1]} : vector<8x384xf32> to vector<8x128xf32>
    %429 = vector.extract_strided_slice %426 {offsets = [0, 256], sizes = [8, 128], strides = [1, 1]} : vector<8x384xf32> to vector<8x128xf32>
    %430 = vector.extract_strided_slice %420 {offsets = [0, 384], sizes = [8, 128], strides = [1, 1]} : vector<8x512xf32> to vector<8x128xf32>
    %431 = math.tanh %430 : vector<8x128xf32>
    %432 = arith.mulf %428, %412 : vector<8x128xf32>
    %433 = arith.mulf %427, %431 : vector<8x128xf32>
    %434 = arith.addf %432, %433 : vector<8x128xf32>
    %435 = math.tanh %434 : vector<8x128xf32>
    %436 = arith.mulf %429, %435 : vector<8x128xf32>
    %437 = arith.truncf %436 : vector<8x128xf32> to vector<8x128xbf16>
    %438 = arith.select %27, %437, %283 : vector<8x128xi1>, vector<8x128xbf16>
    %c0_168 = arith.constant 0 : index
    %c0_169 = arith.constant 0 : index
    %439 = vector.load %arg7[%c0_168, %c0_169] : memref<128x10xbf16, #tpu.memory_space<vmem>>, vector<128x10xbf16>
    %cst_170 = arith.constant dense<0.000000e+00> : vector<8x10xf32>
    %440 = tpu.matmul %438, %439, %cst_170 {dimension_numbers = #tpu.dot_dimension_numbers<[1], [0], [0], [1], [0, 0, 1, 1], [], []>} : vector<8x128xbf16>, vector<128x10xbf16>, vector<8x10xf32> -> vector<8x10xf32>
    %c0_171 = arith.constant 0 : index
    %c0_172 = arith.constant 0 : index
    %441 = vector.load %arg8[%c0_171, %c0_172] : memref<1x10xf32, #tpu.memory_space<vmem>>, vector<1x10xf32>
    %442 = vector.broadcast %441 : vector<1x10xf32> to vector<8x10xf32>
    %443 = arith.addf %440, %442 : vector<8x10xf32>
    %c0_173 = arith.constant 0 : index
    %c0_174 = arith.constant 0 : index
    %444 = vector.load %arg9[%c0_173, %c0_174] : memref<8x10xf32, #tpu.memory_space<vmem>>, vector<8x10xf32>
    tpu.vector_store %arg9[%c0_173, %c0_174], %443 {strides = array<i32>} : memref<8x10xf32, #tpu.memory_space<vmem>>, vector<8x10xf32>,
    return
  }
}

</mosaic_0001>

<bundles_post_ra>
// kernel: rnn_forward.1
= control target key start
LH: loop header
LB: loop body
LE: loop exit
PB: predicated region body
PF: predicated region fallthrough
CT: control target
= control target key end

     0   :  { %14 = vsyncpa [#allocation9], 0  ;;  %s4136_s30 = smov [#allocation8]   ;;  %s5949_s0 = inlined_call_operand.vmem [shape: bf16[64,28], index: 0, kind: input, shape index: {}]   ;;  %s5950_s1 = inlined_call_operand.vmem [shape: bf16[28,512], index: 1, kind: input, shape index: {}]   ;;  %s5951_s2 = inlined_call_operand.hbm [shape: bf16[128,512], index: 2, kind: input, shape index: {}]   ;;  %s5952_s3 = inlined_call_operand.vmem [shape: f32[1,512], index: 3, kind: input, shape index: {}]   ;;  %s5953_s4 = inlined_call_operand.hbm [shape: bf16[128,512], index: 4, kind: input, shape index: {}]   ;;  %s5954_s5 = inlined_call_operand.hbm [shape: bf16[128,512], index: 5, kind: input, shape index: {}]   ;;  %s5955_s6 = inlined_call_operand.vmem [shape: f32[1,512], index: 6, kind: input, shape index: {}]   ;;  %s5956_s7 = inlined_call_operand.vmem [shape: bf16[128,10], index: 7, kind: input, shape index: {}]   ;;  %s5957_s8 = inlined_call_operand.vmem [shape: f32[1,10], index: 8, kind: input, shape index: {}]   ;;  %s5958_s9 = inlined_call_operand.vmem [shape: f32[8,10], index: 9, kind: output, shape index: {}]  }
   0x1   :  { %s24_s10 = sshll.u32 %s4136_s30, 4  ;;  %s25_s10 = int_to_ptr.vmem [resolvable:$true] %s24_s10 }
   0x2   :  { %s4076_s11 = scalar_lea.vmem %s25_s10, 4096  ;;  %p4081_p1 = scmp.lt.s32.totalorder %s25_s10, %s25_s10 }
   0x3   :  { %p4077_p0 = scmp.ne.s32.totalorder %s25_s10, %s4076_s11  ;;  %p4082_p2 = scmp.lt.s32.totalorder %s4076_s11, %s4076_s11 }
   0x5   :  { %p4083_p3 = por %p4082_p2, %p4081_p1 }
   0x7   :  { %p4084_p4 = pnand %p4083_p3, %p4077_p0 }
   0x9   :  { %4087 = shalt.err (!%p4084_p4)
}
   0xa   :  { %s4137_s12 = smov 256   ;;  %s4138_s13 = smov 16  }
   0xb   :  { %30 = dma.hbm_to_vmem [thread:$0]  %s5951_s2, 4096, %s25_s10, [#allocation9], %s4137_s12, %s4137_s12, %s4138_s13  }
   0xc   :  { %4128 = dma.done.wait [#allocation9], 4096  }
   0xd   :  { %4129 = vsyncadd [#allocation9], 4294963200  ;;  %s4139_s16 = smov [#allocation4]   ;;  %s4140_s18 = smov [#allocation5]  }
   0xe   :  { %s48_s17 = sshll.u32 %s4139_s16, 4  ;;  %s60_s19 = sshll.u32 %s4140_s18, 4  ;;  %s49_s17 = int_to_ptr.vmem [resolvable:$true] %s48_s17  ;;  %s61_s19 = int_to_ptr.vmem [resolvable:$true] %s60_s19 }
   0xf   :  { %s4096_s20 = scalar_lea.vmem %s49_s17, 4096  ;;  %p4101_p6 = scmp.lt.s32.totalorder %s49_s17, %s49_s17 }
  0x10   :  { %p4097_p5 = scmp.ne.s32.totalorder %s49_s17, %s4096_s20  ;;  %p4102_p7 = scmp.lt.s32.totalorder %s4096_s20, %s4096_s20 }
  0x12   :  { %p4103_p8 = por %p4102_p7, %p4101_p6 }
  0x14   :  { %p4104_p9 = pnand %p4103_p8, %p4097_p5 }
  0x16   :  { %4107 = shalt.err (!%p4104_p9)  }
  0x17   :  { %51 = dma.hbm_to_vmem [thread:$0]  %s5953_s4, 4096, %s49_s17, [#allocation7] }
  0x18   :  { %s4116_s2 = scalar_lea.vmem %s61_s19, 4096  ;;  %p4121_p11 = scmp.lt.s32.totalorder %s61_s19, %s61_s19 }
  0x19   :  { %p4117_p10 = scmp.ne.s32.totalorder %s61_s19, %s4116_s2  ;;  %p4122_p12 = scmp.lt.s32.totalorder %s4116_s2, %s4116_s2 }
  0x1b   :  { %p4123_p13 = por %p4122_p12, %p4121_p11 }
  0x1d   :  { %p4124_p0 = pnand %p4123_p13, %p4117_p10 }
  0x1f   :  { %4127 = shalt.err (!%p4124_p0)  }
  0x20   :  { %63 = dma.hbm_to_vmem [thread:$0]  %s5954_s5, 4096, %s61_s19, [#allocation7 + $0x1]  ;;  %v83_v0 = vld [vmem:[%s5955_s6] sm:$0xf] }
  0x21   :  { %84 = vst [vmem:[#allocation6] sm:$0xf] %v83_v0 }
  0x22   :  { %110 = vsyncadd [#allocation7 + $0x2], 64  ;;  %vm276_vm0 = vcmask 1045504   ;;  %v3580_v1 = vld [vmem:[%s5950_s1 + $0x24] ss:$16 sps:$4 sm:$0x3f]   ;;  %v111_v48 = vlaneseq }
  0x23   :  { %v3582_v2 = vld [vmem:[%s5950_s1 + $0x2c] ss:$16 sps:$4 sm:$0x3f]   ;;  %v3584_v3 = vld [vmem:[%s5950_s1 + $0x20] ss:$16 sps:$4 sm:$0x3f]   ;;  %3377 = vmatprep.subr.msk.bf16.mxu0 %vm276_vm0, %v3580_v1 }
  0x24   :  { %v3585_v4 = vld [vmem:[%s5950_s1 + $0x28] ss:$16 sps:$4 sm:$0x3f]   ;;  %3382 = vmatprep.subr.msk.bf16.mxu1 %vm276_vm0, %v3582_v2  ;;  %v278_v5 = vsel %vm276_vm0, %v3584_v3, 0  ;;  %v3586_v6 = vld [vmem:[%s5950_s1 + $0x4] ss:$16 sps:$4 sm:$0xff]  }
  0x25   :  { %v5963_v7 = vmov 0   ;;  %302 = vmatpush1.bf16.msra.mxu0 %v278_v5  ;;  %v284_v8 = vsel %vm276_vm0, %v3585_v4, 0  ;;  %v3588_v9 = vld [vmem:[%s5950_s1 + $0xc] ss:$16 sps:$4 sm:$0xff]   ;;  %v3590_v10 = vld [vmem:[%s5950_s1] ss:$16 sps:$4 sm:$0xff]  }
  0x26   :  { %321 = vmatprep.mubr.bf16.mxu0 %v5963_v7  ;;  %394 = vmatprep.mubr.bf16.mxu1 %v5963_v7  ;;  %v3591_v11 = vld [vmem:[%s5950_s1 + $0x8] ss:$16 sps:$4 sm:$0xff]   ;;  %v3592_v12 = vld [vmem:[%s5949_s0] sm:$0xff]   ;;  %vm263_vm1 = vcmask 228352   ;;  %v4241_v16 = vld [vmem:[#allocation8 + $0xe8] ss:$16 sps:$4 sm:$0xff]  }
  0x27   :  { %375 = vmatpush1.bf16.msra.mxu1 %v284_v8  ;;  %303 = vmatprep.subr.bf16.mxu0 %v3586_v6  ;;  %v4235_v13 = vld [vmem:[#allocation8 + $0xe4] ss:$16 sps:$4 sm:$0xff]   ;;  %v4237_v14 = vld [vmem:[#allocation8 + $0xec] ss:$16 sps:$4 sm:$0xff]   ;;  %v4239_v15 = vld [vmem:[#allocation8 + $0xe0] ss:$16 sps:$4 sm:$0xff]  }
  0x28   :  { %376 = vmatprep.subr.bf16.mxu1 %v3588_v9  ;;  %6038 = vst [vmem:[#allocation21_spill] sm:$0xff] %v4235_v13  ;;  %6039 = vst [vmem:[#allocation22_spill] sm:$0xff] %v4237_v14  ;;  %v4244_v17 = vld [vmem:[#allocation8 + $0xc4] ss:$16 sps:$4 sm:$0xff]   ;;  %v4247_v18 = vld [vmem:[#allocation8 + $0xcc] ss:$16 sps:$4 sm:$0xff]  }
  0x29   :  { %304 = vmatpush1.bf16.msra.mxu0 %v3590_v10  ;;  %v4250_v19 = vld [vmem:[#allocation8 + $0xc0] ss:$16 sps:$4 sm:$0xff]   ;;  %v4254_v20 = vld [vmem:[#allocation8 + $0xc8] ss:$16 sps:$4 sm:$0xff]   ;;  %v4258_v21 = vld [vmem:[#allocation8 + $0xa4] ss:$16 sps:$4 sm:$0xff]  }
  0x2a   :  { %671 = vmatprep.subr.bf16.mxu0 %v4235_v13  ;;  %v4262_v22 = vld [vmem:[#allocation8 + $0xac] ss:$16 sps:$4 sm:$0xff]   ;;  %v3605_v23 = vld [vmem:[%s5949_s0 + $0x8] sm:$0xff]   ;;  %v4269_v24 = vld [vmem:[#allocation8 + $0xa0] ss:$16 sps:$4 sm:$0xff]   ;;  %v4394_v49 = vshrl.u32 %v111_v48, 7 }
  0x2b   :  { %377 = vmatpush1.bf16.msra.mxu1 %v3591_v11  ;;  %v4273_v25 = vld [vmem:[#allocation8 + $0xa8] ss:$16 sps:$4 sm:$0xff]   ;;  %v4275_v26 = vld [vmem:[#allocation8 + $0x84] ss:$16 sps:$4 sm:$0xff]   ;;  %v4278_v27 = vld [vmem:[#allocation8 + $0x8c] ss:$16 sps:$4 sm:$0xff]  }
  0x2c   :  { %712 = vmatprep.subr.bf16.mxu1 %v4237_v14  ;;  %3378 = vmatmul.mubr.msk.bf16.vlgmr.msra.gmra.mxu0 %vm263_vm1, %v3592_v12  ;;  %v4283_v28 = vld [vmem:[#allocation8 + $0x80] ss:$16 sps:$4 sm:$0xff]   ;;  %v4285_v29 = vld [vmem:[#allocation8 + $0x88] ss:$16 sps:$4 sm:$0xff]   ;;  %v4289_v30 = vld [vmem:[#allocation8 + $0x64] ss:$16 sps:$4 sm:$0xff]  }
  0x2d   :  { %672 = vmatpush1.bf16.msra.mxu0 %v4239_v15  ;;  %331 = vmatprep.mubr.bf16.mxu0 %v5963_v7  ;;  %v4293_v31 = vld [vmem:[#allocation8 + $0x6c] ss:$16 sps:$4 sm:$0xff]   ;;  %v4299_v33 = vld [vmem:[#allocation8 + $0x60] ss:$16 sps:$4 sm:$0xff]   ;;  %v4302_v34 = vld [vmem:[#allocation8 + $0x68] ss:$16 sps:$4 sm:$0xff]  }
  0x2e   :  { %3383 = vmatmul.mubr.msk.bf16.vlgmr.msra.gmra.mxu1 %vm263_vm1, %v3592_v12  ;;  %673 = vmatprep.subr.bf16.mxu0 %v4244_v17  ;;  %v3618_v32 = vld [vmem:[%s5949_s0 + $0x10] sm:$0xff]   ;;  %v4306_v35 = vld [vmem:[#allocation8 + $0x44] ss:$16 sps:$4 sm:$0xff]   ;;  %v4318_v38 = vld [vmem:[#allocation8 + $0x48] ss:$16 sps:$4 sm:$0xff]   ;;  %6041 = vst [vmem:[#allocation24_spill] sm:$0xff] %v4394_v49 }
  0x2f   :  { %713 = vmatpush1.bf16.msra.mxu1 %v4241_v16  ;;  %404 = vmatprep.mubr.bf16.mxu1 %v5963_v7  ;;  %v4309_v36 = vld [vmem:[#allocation8 + $0x4c] ss:$16 sps:$4 sm:$0xff]   ;;  %v4314_v37 = vld [vmem:[#allocation8 + $0x40] ss:$16 sps:$4 sm:$0xff]   ;;  %v4320_v39 = vld [vmem:[#allocation8 + $0x24] ss:$16 sps:$4 sm:$0xff]  }
  0x30   :  { %714 = vmatprep.subr.bf16.mxu1 %v4247_v18  ;;  %v4324_v40 = vld [vmem:[#allocation8 + $0x2c] ss:$16 sps:$4 sm:$0xff]   ;;  %v3631_v41 = vld [vmem:[%s5949_s0 + $0x18] sm:$0xff]   ;;  %v4331_v42 = vld [vmem:[#allocation8 + $0x20] ss:$16 sps:$4 sm:$0xff]   ;;  %v5962_v50 = vsub.s32 2, %v4394_v49 }
  0x31   :  { %674 = vmatpush1.bf16.msra.mxu0 %v4250_v19  ;;  %v4335_v43 = vld [vmem:[#allocation8 + $0x28] ss:$16 sps:$4 sm:$0xff]   ;;  %v4337_v44 = vld [vmem:[#allocation8 + $0x4] ss:$16 sps:$4 sm:$0xff]   ;;  %v4340_v45 = vld [vmem:[#allocation8 + $0xc] ss:$16 sps:$4 sm:$0xff]  }
  0x32   :  { %675 = vmatprep.subr.bf16.mxu0 %v4258_v21  ;;  %v4345_v46 = vld [vmem:[#allocation8] ss:$16 sps:$4 sm:$0xff]   ;;  %v4349_v47 = vld [vmem:[#allocation8 + $0x8] ss:$16 sps:$4 sm:$0xff]   ;;  %v5961_v51 = vsub.s32 0, %v4394_v49  ;;  %v5960_v54 = vsub.s32 3, %v4394_v49 }
  0x33   :  { %715 = vmatpush1.bf16.msra.mxu1 %v4254_v20  ;;  %6040 = vst [vmem:[#allocation23_spill] sm:$0xff] %v4349_v47  ;;  %v185_v52 = vld [vmem:[%s5952_s3] sm:$0xf]  ;;  %v5959_v56 = vsub.s32 1, %v4394_v49  ;;  %v4433_v4 = vand.u32 127, %v111_v48 }
  0x34   :  { %716 = vmatprep.subr.bf16.mxu1 %v4262_v22  ;;  %3379 = vmatmul.mubr.msk.bf16.gmra.mxu0 %vm263_vm1, %v3605_v23  ;;  %v4409_v57 = vrot.slane %v185_v52, %v5962_v50  ;;  %v4415_v59 = vrot.slane %v185_v52, %v5961_v51  ;;  %v4421_v61 = vrot.slane %v185_v52, %v5960_v54 }
  0x35   :  { %676 = vmatpush1.bf16.msra.mxu0 %v4269_v24  ;;  %341 = vmatprep.mubr.bf16.mxu0 %v5963_v7  ;;  %v4425_v63 = vrot.slane %v185_v52, %v5959_v56  ;;  %6042 = vst [vmem:[#allocation25_spill] sm:$0xff] %v4433_v4  ;;  %vm164_vm2 = vcmp.lt.s32.totalorder %v4433_v4, 64 }
  0x36   :  { %3384 = vmatmul.mubr.msk.bf16.gmra.mxu1 %vm263_vm1, %v3605_v23  ;;  %677 = vmatprep.subr.bf16.mxu0 %v4275_v26 }
  0x37   :  { %717 = vmatpush1.bf16.msra.mxu1 %v4273_v25  ;;  %414 = vmatprep.mubr.bf16.mxu1 %v5963_v7 }
  0x38   :  { %718 = vmatprep.subr.bf16.mxu1 %v4278_v27 }
  0x39   :  { %678 = vmatpush1.bf16.msra.mxu0 %v4283_v28 }
  0x3a   :  { %679 = vmatprep.subr.bf16.mxu0 %v4289_v30 }
  0x3b   :  { %719 = vmatpush1.bf16.msra.mxu1 %v4285_v29 }
  0x3c   :  { %720 = vmatprep.subr.bf16.mxu1 %v4293_v31  ;;  %3380 = vmatmul.mubr.msk.bf16.gmra.mxu0 %vm263_vm1, %v3618_v32 }
  0x3d   :  { %680 = vmatpush1.bf16.msra.mxu0 %v4299_v33  ;;  %351 = vmatprep.mubr.bf16.mxu0 %v5963_v7 }
  0x3e   :  { %3385 = vmatmul.mubr.msk.bf16.gmra.mxu1 %vm263_vm1, %v3618_v32  ;;  %681 = vmatprep.subr.bf16.mxu0 %v4306_v35  ;;  %v114_v32 = vadd.s32 256, %v4433_v4 }
  0x3f   :  { %721 = vmatpush1.bf16.msra.mxu1 %v4302_v34  ;;  %424 = vmatprep.mubr.bf16.mxu1 %v5963_v7 }
  0x40   :  { %722 = vmatprep.subr.bf16.mxu1 %v4309_v36  ;;  %v134_v54 = vand.u32 127, %v114_v32 }
  0x41   :  { %682 = vmatpush1.bf16.msra.mxu0 %v4314_v37 }
  0x42   :  { %683 = vmatprep.subr.bf16.mxu0 %v4320_v39  ;;  %vm4469_vm3 = vcmp.lt.s32.totalorder %v134_v54, 64 }
  0x43   :  { %723 = vmatpush1.bf16.msra.mxu1 %v4318_v38 }
  0x44   :  { %724 = vmatprep.subr.bf16.mxu1 %v4324_v40  ;;  %3381 = vmatmul.mubr.msk.bf16.gmra.mxu0 %vm263_vm1, %v3631_v41 }
  0x45   :  { %684 = vmatpush1.bf16.msra.mxu0 %v4331_v42  ;;  %703 = vmatprep.mubr.bf16.mxu0 %v5963_v7 }
  0x46   :  { %3386 = vmatmul.mubr.msk.bf16.gmra.mxu1 %vm263_vm1, %v3631_v41  ;;  %685 = vmatprep.subr.bf16.mxu0 %v4337_v44  ;;  %v113_v41 = vadd.s32 128, %v4433_v4 }
  0x47   :  { %725 = vmatpush1.bf16.msra.mxu1 %v4335_v43  ;;  %744 = vmatprep.mubr.bf16.mxu1 %v5963_v7 }
  0x48   :  { %726 = vmatprep.subr.bf16.mxu1 %v4340_v45  ;;  %v127_v51 = vand.u32 127, %v113_v41 }
  0x49   :  { %686 = vmatpush1.bf16.msra.mxu0 %v4345_v46 }
  0x4a   :  { %795 = vmatprep.subr.bf16.mxu0 %v4235_v13  ;;  %vm4473_vm4 = vcmp.lt.s32.totalorder %v127_v51, 64 }
  0x4b   :  { %727 = vmatpush1.bf16.msra.mxu1 %v4349_v47 }
  0x4c   :  { %836 = vmatprep.subr.bf16.mxu1 %v4237_v14  ;;  %704 = vmatmul.mubr.bf16.vlgmr.msra.gmra.mxu0 %v5963_v7 }
  0x4d   :  { %796 = vmatpush1.bf16.msra.mxu0 %v4239_v15  ;;  %827 = vmatprep.mubr.bf16.mxu0 %v5963_v7 }
  0x4e   :  { %745 = vmatmul.mubr.bf16.vlgmr.msra.gmra.mxu1 %v5963_v7  ;;  %797 = vmatprep.subr.bf16.mxu0 %v4244_v17 }
  0x4f   :  { %837 = vmatpush1.bf16.msra.mxu1 %v4241_v16  ;;  %868 = vmatprep.mubr.bf16.mxu1 %v5963_v7 }
  0x50   :  { %838 = vmatprep.subr.bf16.mxu1 %v4247_v18 }
  0x51   :  { %798 = vmatpush1.bf16.msra.mxu0 %v4250_v19 }
  0x52   :  { %799 = vmatprep.subr.bf16.mxu0 %v4258_v21 }
  0x53   :  { %839 = vmatpush1.bf16.msra.mxu1 %v4254_v20 }
  0x54   :  { %840 = vmatprep.subr.bf16.mxu1 %v4262_v22 }
  0x55   :  { %800 = vmatpush1.bf16.msra.mxu0 %v4269_v24 }
  0x56   :  { %801 = vmatprep.subr.bf16.mxu0 %v4275_v26 }
  0x57   :  { %841 = vmatpush1.bf16.msra.mxu1 %v4273_v25 }
  0x58   :  { %842 = vmatprep.subr.bf16.mxu1 %v4278_v27 }
  0x59   :  { %802 = vmatpush1.bf16.msra.mxu0 %v4283_v28 }
  0x5a   :  { %803 = vmatprep.subr.bf16.mxu0 %v4289_v30 }
  0x5b   :  { %843 = vmatpush1.bf16.msra.mxu1 %v4285_v29 }
  0x5c   :  { %844 = vmatprep.subr.bf16.mxu1 %v4293_v31 }
  0x5d   :  { %804 = vmatpush1.bf16.msra.mxu0 %v4299_v33 }
  0x5e   :  { %805 = vmatprep.subr.bf16.mxu0 %v4306_v35 }
  0x5f   :  { %845 = vmatpush1.bf16.msra.mxu1 %v4302_v34 }
  0x60   :  { %846 = vmatprep.subr.bf16.mxu1 %v4309_v36 }
  0x61   :  { %806 = vmatpush1.bf16.msra.mxu0 %v4314_v37 }
  0x62   :  { %807 = vmatprep.subr.bf16.mxu0 %v4320_v39 }
  0x63   :  { %847 = vmatpush1.bf16.msra.mxu1 %v4318_v38 }
  0x64   :  { %848 = vmatprep.subr.bf16.mxu1 %v4324_v40 }
  0x65   :  { %808 = vmatpush1.bf16.msra.mxu0 %v4331_v42 }
  0x66   :  { %809 = vmatprep.subr.bf16.mxu0 %v4337_v44 }
  0x67   :  { %849 = vmatpush1.bf16.msra.mxu1 %v4335_v43 }
  0x68   :  { %850 = vmatprep.subr.bf16.mxu1 %v4340_v45 }
  0x69   :  { %810 = vmatpush1.bf16.msra.mxu0 %v4345_v46 }
  0x6a   :  { %919 = vmatprep.subr.bf16.mxu0 %v4235_v13 }
  0x6b   :  { %851 = vmatpush1.bf16.msra.mxu1 %v4349_v47 }
  0x6c   :  { %960 = vmatprep.subr.bf16.mxu1 %v4237_v14 }
  0xec   :  { %v4401_v53 = vpop.f32.mrf.mxu0 }
  0xee   :  { %v4404_v55 = vpop.f32.mrf.mxu1  ;;  %v4411_v58 = vpop.f32.mrf.mxu0 }
  0xf0   :  { %v4417_v60 = vpop.f32.mrf.mxu1  ;;  %v327_v62 = vpop.f32.mrf.mxu0 }
  0xf1   :  { %v4428_v0 = vadd.f32 %v327_v62, %v4415_v59  ;;  %v115_v62 = vadd.s32 384, %v4433_v4 }
  0xf2   :  { %v400_v1 = vpop.f32.mrf.mxu1  ;;  %v329_v3 = vpop.f32.mrf.mxu0 }
  0xf3   :  { %v4431_v2 = vadd.f32 %v400_v1, %v4409_v57  ;;  %v4436_v5 = vadd.f32 %v329_v3, %v4425_v63  ;;  %v141_v7 = vand.u32 127, %v115_v62 }
  0xf4   :  { %v402_v6 = vpop.f32.mrf.mxu1  ;;  %v333_v9 = vpop.f32.mrf.mxu0 }
  0xf5   :  { %v4439_v8 = vadd.f32 %v402_v6, %v4421_v61  ;;  %v334_v10 = vadd.f32 %v333_v9, %v4415_v59  ;;  %vm4480_vm5 = vcmp.lt.s32.totalorder %v141_v7, 64 }
  0xf6   :  { %v406_v11 = vpop.f32.mrf.mxu1  ;;  %v335_v23 = vpop.f32.mrf.mxu0 }
  0xf7   :  { %6043 = vst [vmem:[#allocation26_spill] sm:$0xff] %v4439_v8  ;;  %v4443_v12 = vadd.f32 %v406_v11, %v4409_v57  ;;  %v4448_v48 = vadd.f32 %v335_v23, %v4425_v63 }
  0xf8   :  { %v408_v52 = vpop.f32.mrf.mxu1  ;;  %v337_v3 = vpop.f32.mrf.mxu0 }
  0xf9   :  { %v4452_v1 = vadd.f32 %v408_v52, %v4421_v61  ;;  %v338_v6 = vadd.f32 %v337_v3, %v4415_v59 }
  0xfa   :  { %v410_v9 = vpop.f32.mrf.mxu1  ;;  %v339_v56 = vpop.f32.mrf.mxu0 }
  0xfb   :  { %6044 = vst [vmem:[#allocation27_spill] sm:$0xff] %v4452_v1  ;;  %v4456_v11 = vadd.f32 %v410_v9, %v4409_v57  ;;  %v4459_v50 = vadd.f32 %v339_v56, %v4425_v63 }
  0xfc   :  { %v412_v23 = vpop.f32.mrf.mxu1  ;;  %v343_v52 = vpop.f32.mrf.mxu0 }
  0xfd   :  { %6045 = vst [vmem:[#allocation28_spill] sm:$0xff] %v4456_v11  ;;  %6046 = vst [vmem:[#allocation29_spill] sm:$0xff] %v4459_v50  ;;  %v4462_v49 = vadd.f32 %v412_v23, %v4421_v61  ;;  %v344_v3 = vadd.f32 %v343_v52, %v4415_v59 }
  0xfe   :  { %v416_v14 = vpop.f32.mrf.mxu1  ;;  %v345_v13 = vpop.f32.mrf.mxu0 }
  0xff   :  { %6047 = vst [vmem:[#allocation30_spill] sm:$0xff] %v4462_v49  ;;  %v4467_v9 = vadd.f32 %v416_v14, %v4409_v57  ;;  %v4478_v41 = vadd.f32 %v345_v13, %v4425_v63  ;;  %v4486_v14 = vsel %vm164_vm2, %v338_v6, %v344_v3  ;;  %v4490_v54 = vsel %vm164_vm2, %v344_v3, %v338_v6 }
 0x100   :  { %v418_v62 = vpop.f32.mrf.mxu1  ;;  %6056 = vst [vmem:[#allocation33_spill] sm:$0xff] %v4486_v14  ;;  %6057 = vst [vmem:[#allocation34_spill] sm:$0xff] %v4490_v54  ;;  %v347_v52 = vpop.f32.mrf.mxu0 }
 0x101   :  { %6048 = vst [vmem:[#allocation31_spill] sm:$0xff] %v4467_v9  ;;  %6053 = vst [vmem:[#allocation32_spill] sm:$0xff] %v4478_v41  ;;  %v4493_v51 = vadd.f32 %v418_v62, %v4421_v61  ;;  %v348_v14 = vadd.f32 %v347_v52, %v4415_v59  ;;  %v324_v41 = vadd.f32 %v4401_v53, %v4415_v59 }
 0x102   :  { %v420_v47 = vpop.f32.mrf.mxu1  ;;  %v349_v7 = vpop.f32.mrf.mxu0 }
 0x103   :  { %6058 = vst [vmem:[#allocation35_spill] sm:$0xff] %v4493_v51  ;;  %v4513_v62 = vadd.f32 %v420_v47, %v4409_v57  ;;  %v4524_v6 = vadd.f32 %v349_v7, %v4425_v63  ;;  %v4528_v3 = vsel %vm164_vm2, %v334_v10, %v348_v14  ;;  %v4532_v47 = vsel %vm164_vm2, %v348_v14, %v334_v10 }
 0x104   :  { %v422_v54 = vpop.f32.mrf.mxu1  ;;  %6059 = vst [vmem:[#allocation36_spill] sm:$0xff] %v4532_v47  ;;  %v353_v52 = vpop.f32.mrf.mxu0 }
 0x105   :  { %v4535_v9 = vadd.f32 %v422_v54, %v4421_v61  ;;  %v354_v51 = vadd.f32 %v353_v52, %v4415_v59 }
 0x106   :  { %v426_v49 = vpop.f32.mrf.mxu1  ;;  %v355_v13 = vpop.f32.mrf.mxu0 }
 0x107   :  { %6060 = vst [vmem:[#allocation37_spill] sm:$0xff] %v4535_v9  ;;  %v4555_v54 = vadd.f32 %v426_v49, %v4409_v57  ;;  %v4566_v10 = vadd.f32 %v355_v13, %v4425_v63  ;;  %v4571_v49 = vsel %vm164_vm2, %v4428_v0, %v354_v51  ;;  %v4576_v14 = vsel %vm164_vm2, %v354_v51, %v4428_v0 }
 0x108   :  { %v428_v47 = vpop.f32.mrf.mxu1  ;;  %6061 = vst [vmem:[#allocation38_spill] sm:$0xff] %v4576_v14  ;;  %v357_v11 = vpop.f32.mrf.mxu0  ;;  %v4602_v14 = vadd.f32 %v4404_v55, %v4409_v57  ;;  %v4617_v13 = vadd.f32 %v4411_v58, %v4425_v63 }
 0x109   :  { %v4579_v52 = vadd.f32 %v428_v47, %v4421_v61  ;;  %v358_v0 = vadd.f32 %v357_v11, %v4415_v59  ;;  %v4630_v59 = vadd.f32 %v4417_v60, %v4421_v61 }
 0x10a   :  { %v430_v51 = vpop.f32.mrf.mxu1  ;;  %6062 = vst [vmem:[#allocation39_spill] sm:$0xff] %v4602_v14  ;;  %v359_v53 = vpop.f32.mrf.mxu0  ;;  %6064 = vst [vmem:[#allocation41_spill] sm:$0xff] %v4617_v13 }
 0x10b   :  { %v4605_v7 = vadd.f32 %v430_v51, %v4409_v57  ;;  %v4620_v55 = vadd.f32 %v359_v53, %v4425_v63  ;;  %v507_v51 = vsel %vm164_vm2, %v324_v41, %v358_v0  ;;  %v4626_v47 = vsel %vm164_vm2, %v358_v0, %v324_v41  ;;  %6067 = vst [vmem:[#allocation44_spill] sm:$0xff] %v4630_v59 }
 0x10c   :  { %v432_v57 = vpop.f32.mrf.mxu1  ;;  %6066 = vst [vmem:[#allocation43_spill] sm:$0xff] %v4626_v47  ;;  %v705_v58 = vpop.f32.mrf.mxu0 }
 0x10d   :  { %6063 = vst [vmem:[#allocation40_spill] sm:$0xff] %v4605_v7  ;;  %6065 = vst [vmem:[#allocation42_spill] sm:$0xff] %v4620_v55  ;;  %v4633_v11 = vadd.f32 %v432_v57, %v4421_v61  ;;  %v753_v53 = vadd.f32 %v705_v58, %v507_v51  ;;  %v508_v41 = vsel %vm4473_vm4, %v4617_v13, %v4620_v55 }
 0x10e   :  { %v746_v50 = vpop.f32.mrf.mxu1  ;;  %v707_v61 = vpop.f32.mrf.mxu0  ;;  %v509_v60 = vsel %vm4469_vm3, %v4602_v14, %v4605_v7 }
 0x10f   :  { %6068 = vst [vmem:[#allocation45_spill] sm:$0xff] %v4633_v11  ;;  %v3419_v57 = vmul.f32 -1.442695, %v753_v53  ;;  %v754_v63 = vadd.f32 %v707_v61, %v508_v41  ;;  %v755_v13 = vadd.f32 %v746_v50, %v509_v60  ;;  %v510_v53 = vsel %vm4480_vm5, %v4630_v59, %v4633_v11 }
 0x110   :  { %v748_v51 = vpop.f32.mrf.mxu1  ;;  %v709_v58 = vpop.f32.mrf.mxu0  ;;  %v6076_v11 = vsel %vm4480_vm5, %v4439_v8, %v4579_v52 }
 0x111   :  { %3644 = vpow2.f32 %v3419_v57  ;;  %v3420_v47 = vmul.f32 -1.442695, %v754_v63  ;;  %v3421_v41 = vmul.f32 -1.442695, %v755_v13  ;;  %v756_v58 = vadd.f32 %v748_v51, %v510_v53 }
 0x112   :  { %v750_v4 = vpop.f32.mrf.mxu1  ;;  %v710_v9 = vpop.f32.mrf.mxu0 }
 0x113   :  { %3646 = vpow2.f32 %v3420_v47 }
 0x114   :  { %v751_v1 = vpop.f32.mrf.mxu1  ;;  %3648 = vpow2.f32 %v3421_v41 }
 0x11e   :  { %v3645_v61 = vpop.eup %3644 }
 0x11f   :  { %v766_v57 = vadd.f32 1.0, %v3645_v61  ;;  %v6072_v61 = vld [vmem:[#allocation21_spill] sm:$0xff] }
 0x120   :  { %v3647_v63 = vpop.eup %3646 }
 0x121   :  { %3650 = vrcp.f32 %v766_v57  ;;  %v767_v4 = vadd.f32 1.0, %v3647_v63  ;;  %v3649_v1 = vpop.eup %3648 }
 0x122   :  { %3652 = vtanh.f32 %v756_v58  ;;  %v768_v50 = vadd.f32 1.0, %v3649_v1  ;;  %v6073_v58 = vld [vmem:[#allocation22_spill] sm:$0xff] }
 0x123   :  { %3654 = vrcp.f32 %v767_v4 }
 0x124   :  { %3656 = vrcp.f32 %v768_v50  ;;  %v6074_v50 = vsel %vm4473_vm4, %v4436_v5, %v4566_v10 }
 0x12e   :  { %v3651_v9 = vpop.eup %3650 }
 0x12f   :  { %v3653_v47 = vpop.eup %3652 }
 0x130   :  { %v3655_v0 = vpop.eup %3654  ;;  %v777_v14 = vmul.f32 %v3653_v47, %v3651_v9 }
 0x131   :  { %v776_v60 = vmul.f32 0.0, %v3655_v0  ;;  %v3657_v13 = vpop.eup %3656  ;;  %v6071_v0 = vld [vmem:[#allocation23_spill] sm:$0xff] }
 0x133   :  { %v4659_v7 = vadd.f32 %v777_v14, %v776_v60  ;;  %v6070_v14 = vmov 0  }
 0x135   :  { %3658 = vtanh.f32 %v4659_v7 }
 0x142   :  { %v3659_v51 = vpop.eup %3658 }
 0x143   :  { %v4662_v53 = vmul.f32 %v3659_v51, %v3657_v13 }
 0x145   :  { %6069 = vst [vmem:[#allocation46_spill] sm:$0xff] %v4662_v53  ;;  %v781_v41 = vpack.c.bf16 %v4662_v53, %v4662_v53 }
 0x147   :  { %828 = vmatmul.mubr.bf16.vlgmr.msra.gmra.mxu0 %v781_v41  ;;  %869 = vmatmul.mubr.bf16.vlgmr.msra.gmra.mxu1 %v781_v41 }
 0x148   :  { %920 = vmatpush1.bf16.msra.mxu0 %v4239_v15  ;;  %961 = vmatpush1.bf16.msra.mxu1 %v4241_v16 }
 0x149   :  { %921 = vmatprep.subr.bf16.mxu0 %v4244_v17  ;;  %962 = vmatprep.subr.bf16.mxu1 %v4247_v18 }
 0x14a   :  { %951 = vmatprep.mubr.bf16.mxu0 %v6070_v14  ;;  %992 = vmatprep.mubr.bf16.mxu1 %v6070_v14 }
 0x14c   :  { %922 = vmatpush1.bf16.msra.mxu0 %v4250_v19  ;;  %963 = vmatpush1.bf16.msra.mxu1 %v4254_v20 }
 0x14d   :  { %923 = vmatprep.subr.bf16.mxu0 %v4258_v21  ;;  %964 = vmatprep.subr.bf16.mxu1 %v4262_v22 }
 0x150   :  { %924 = vmatpush1.bf16.msra.mxu0 %v4269_v24  ;;  %965 = vmatpush1.bf16.msra.mxu1 %v4273_v25 }
 0x151   :  { %925 = vmatprep.subr.bf16.mxu0 %v4275_v26  ;;  %966 = vmatprep.subr.bf16.mxu1 %v4278_v27 }
 0x154   :  { %926 = vmatpush1.bf16.msra.mxu0 %v4283_v28  ;;  %967 = vmatpush1.bf16.msra.mxu1 %v4285_v29 }
 0x155   :  { %927 = vmatprep.subr.bf16.mxu0 %v4289_v30  ;;  %968 = vmatprep.subr.bf16.mxu1 %v4293_v31 }
 0x158   :  { %928 = vmatpush1.bf16.msra.mxu0 %v4299_v33  ;;  %969 = vmatpush1.bf16.msra.mxu1 %v4302_v34 }
 0x159   :  { %929 = vmatprep.subr.bf16.mxu0 %v4306_v35  ;;  %970 = vmatprep.subr.bf16.mxu1 %v4309_v36 }
 0x15c   :  { %930 = vmatpush1.bf16.msra.mxu0 %v4314_v37  ;;  %971 = vmatpush1.bf16.msra.mxu1 %v4318_v38 }
 0x15d   :  { %931 = vmatprep.subr.bf16.mxu0 %v4320_v39  ;;  %972 = vmatprep.subr.bf16.mxu1 %v4324_v40 }
 0x160   :  { %932 = vmatpush1.bf16.msra.mxu0 %v4331_v42  ;;  %973 = vmatpush1.bf16.msra.mxu1 %v4335_v43 }
 0x161   :  { %933 = vmatprep.subr.bf16.mxu0 %v4337_v44  ;;  %974 = vmatprep.subr.bf16.mxu1 %v4340_v45 }
 0x164   :  { %934 = vmatpush1.bf16.msra.mxu0 %v4345_v46  ;;  %975 = vmatpush1.bf16.msra.mxu1 %v6071_v0 }
 0x165   :  { %1043 = vmatprep.subr.bf16.mxu0 %v6072_v61  ;;  %1084 = vmatprep.subr.bf16.mxu1 %v6073_v58 }
 0x207   :  { %v829_v57 = vpop.f32.mrf.mxu0  ;;  %v870_v63 = vpop.f32.mrf.mxu1 }
 0x208   :  { %v877_v4 = vadd.f32 %v829_v57, %v4571_v49  ;;  %v6075_v49 = vsel %vm4469_vm3, %v4431_v2, %v4555_v54 }
 0x209   :  { %v831_v1 = vpop.f32.mrf.mxu0  ;;  %v872_v9 = vpop.f32.mrf.mxu1  ;;  %v879_v57 = vadd.f32 %v870_v63, %v6075_v49 }
 0x20a   :  { %v3422_v47 = vmul.f32 -1.442695, %v877_v4  ;;  %v878_v60 = vadd.f32 %v831_v1, %v6074_v50  ;;  %v880_v1 = vadd.f32 %v872_v9, %v6076_v11 }
 0x20b   :  { %v833_v13 = vpop.f32.mrf.mxu0  ;;  %v874_v51 = vpop.f32.mrf.mxu1  ;;  %v3424_v4 = vmul.f32 -1.442695, %v879_v57 }
 0x20c   :  { %3660 = vpow2.f32 %v3422_v47  ;;  %v3423_v41 = vmul.f32 -1.442695, %v878_v60 }
 0x20d   :  { %v834_v53 = vpop.f32.mrf.mxu0  ;;  %v875_v59 = vpop.f32.mrf.mxu1 }
 0x20e   :  { %3662 = vpow2.f32 %v3423_v41 }
 0x20f   :  { %3664 = vpow2.f32 %v3424_v4 }
 0x210   :  { %3666 = vtanh.f32 %v880_v1 }
 0x219   :  { %v3661_v50 = vpop.eup %3660 }
 0x21a   :  { %v890_v13 = vadd.f32 1.0, %v3661_v50 }
 0x21b   :  { %v3663_v47 = vpop.eup %3662 }
 0x21c   :  { %3668 = vrcp.f32 %v890_v13  ;;  %v891_v59 = vadd.f32 1.0, %v3663_v47  ;;  %v3665_v53 = vpop.eup %3664 }
 0x21d   :  { %v3667_v60 = vpop.eup %3666  ;;  %v892_v49 = vadd.f32 1.0, %v3665_v53 }
 0x21e   :  { %3670 = vrcp.f32 %v891_v59 }
 0x21f   :  { %3672 = vrcp.f32 %v892_v49 }
 0x229   :  { %v3669_v51 = vpop.eup %3668 }
 0x22a   :  { %v901_v41 = vmul.f32 %v3669_v51, %v3667_v60  ;;  %v6078_v60 = vsel %vm4473_vm4, %v4448_v48, %v4524_v6 }
 0x22b   :  { %v3671_v63 = vpop.eup %3670 }
 0x22c   :  { %v900_v57 = vmul.f32 %v3671_v63, %v4659_v7  ;;  %v3673_v11 = vpop.eup %3672 }
 0x22e   :  { %v4717_v55 = vadd.f32 %v901_v41, %v900_v57 }
 0x230   :  { %3674 = vtanh.f32 %v4717_v55 }
 0x23d   :  { %v3675_v9 = vpop.eup %3674 }
 0x23e   :  { %v4720_v4 = vmul.f32 %v3675_v9, %v3673_v11 }
 0x240   :  { %6077 = vst [vmem:[#allocation23_spill] sm:$0xff] %v4720_v4  ;;  %v905_v1 = vpack.c.bf16 %v4720_v4, %v4720_v4 }
 0x242   :  { %952 = vmatmul.mubr.bf16.vlgmr.msra.gmra.mxu0 %v905_v1  ;;  %993 = vmatmul.mubr.bf16.vlgmr.msra.gmra.mxu1 %v905_v1 }
 0x243   :  { %1044 = vmatpush1.bf16.msra.mxu0 %v4239_v15  ;;  %1085 = vmatpush1.bf16.msra.mxu1 %v4241_v16 }
 0x244   :  { %1045 = vmatprep.subr.bf16.mxu0 %v4244_v17  ;;  %1086 = vmatprep.subr.bf16.mxu1 %v4247_v18 }
 0x245   :  { %1075 = vmatprep.mubr.bf16.mxu0 %v6070_v14  ;;  %1116 = vmatprep.mubr.bf16.mxu1 %v6070_v14 }
 0x247   :  { %1046 = vmatpush1.bf16.msra.mxu0 %v4250_v19  ;;  %1087 = vmatpush1.bf16.msra.mxu1 %v4254_v20 }
 0x248   :  { %1047 = vmatprep.subr.bf16.mxu0 %v4258_v21  ;;  %1088 = vmatprep.subr.bf16.mxu1 %v4262_v22 }
 0x24b   :  { %1048 = vmatpush1.bf16.msra.mxu0 %v4269_v24  ;;  %1089 = vmatpush1.bf16.msra.mxu1 %v4273_v25 }
 0x24c   :  { %1049 = vmatprep.subr.bf16.mxu0 %v4275_v26  ;;  %1090 = vmatprep.subr.bf16.mxu1 %v4278_v27 }
 0x24f   :  { %1050 = vmatpush1.bf16.msra.mxu0 %v4283_v28  ;;  %1091 = vmatpush1.bf16.msra.mxu1 %v4285_v29 }
 0x250   :  { %1051 = vmatprep.subr.bf16.mxu0 %v4289_v30  ;;  %1092 = vmatprep.subr.bf16.mxu1 %v4293_v31 }
 0x253   :  { %1052 = vmatpush1.bf16.msra.mxu0 %v4299_v33  ;;  %1093 = vmatpush1.bf16.msra.mxu1 %v4302_v34 }
 0x254   :  { %1053 = vmatprep.subr.bf16.mxu0 %v4306_v35  ;;  %1094 = vmatprep.subr.bf16.mxu1 %v4309_v36 }
 0x257   :  { %1054 = vmatpush1.bf16.msra.mxu0 %v4314_v37  ;;  %1095 = vmatpush1.bf16.msra.mxu1 %v4318_v38 }
 0x258   :  { %1055 = vmatprep.subr.bf16.mxu0 %v4320_v39  ;;  %1096 = vmatprep.subr.bf16.mxu1 %v4324_v40 }
 0x25b   :  { %1056 = vmatpush1.bf16.msra.mxu0 %v4331_v42  ;;  %1097 = vmatpush1.bf16.msra.mxu1 %v4335_v43 }
 0x25c   :  { %1057 = vmatprep.subr.bf16.mxu0 %v4337_v44  ;;  %1098 = vmatprep.subr.bf16.mxu1 %v4340_v45 }
 0x25f   :  { %1058 = vmatpush1.bf16.msra.mxu0 %v4345_v46  ;;  %1099 = vmatpush1.bf16.msra.mxu1 %v6071_v0 }
 0x260   :  { %1167 = vmatprep.subr.bf16.mxu0 %v6072_v61  ;;  %1208 = vmatprep.subr.bf16.mxu1 %v6073_v58 }
 0x302   :  { %v953_v7 = vpop.f32.mrf.mxu0  ;;  %v994_v50 = vpop.f32.mrf.mxu1 }
 0x303   :  { %v1001_v13 = vadd.f32 %v953_v7, %v4528_v3  ;;  %v6079_v3 = vsel %vm4469_vm3, %v4443_v12, %v4513_v62  ;;  %v6080_v7 = vld [vmem:[#allocation27_spill] sm:$0xff] }
 0x304   :  { %v955_v47 = vpop.f32.mrf.mxu0  ;;  %v996_v59 = vpop.f32.mrf.mxu1  ;;  %v1003_v9 = vadd.f32 %v994_v50, %v6079_v3 }
 0x305   :  { %v3425_v53 = vmul.f32 -1.442695, %v1001_v13  ;;  %v1002_v51 = vadd.f32 %v955_v47, %v6078_v60  ;;  %v6081_v13 = vld [vmem:[#allocation37_spill] sm:$0xff] }
 0x306   :  { %v957_v41 = vpop.f32.mrf.mxu0  ;;  %v998_v63 = vpop.f32.mrf.mxu1  ;;  %v3427_v1 = vmul.f32 -1.442695, %v1003_v9  ;;  %v6082_v4 = vsel %vm4480_vm5, %v6080_v7, %v6081_v13 }
 0x307   :  { %3676 = vpow2.f32 %v3425_v53  ;;  %v3426_v49 = vmul.f32 -1.442695, %v1002_v51  ;;  %v1004_v47 = vadd.f32 %v996_v59, %v6082_v4 }
 0x308   :  { %v958_v57 = vpop.f32.mrf.mxu0  ;;  %v999_v11 = vpop.f32.mrf.mxu1 }
 0x309   :  { %3678 = vpow2.f32 %v3426_v49 }
 0x30a   :  { %3680 = vpow2.f32 %v3427_v1 }
 0x30b   :  { %3682 = vtanh.f32 %v1004_v47 }
 0x314   :  { %v3677_v60 = vpop.eup %3676 }
 0x315   :  { %v1014_v41 = vadd.f32 1.0, %v3677_v60 }
 0x316   :  { %v3679_v53 = vpop.eup %3678 }
 0x317   :  { %3684 = vrcp.f32 %v1014_v41  ;;  %v1015_v51 = vadd.f32 1.0, %v3679_v53  ;;  %v3681_v63 = vpop.eup %3680 }
 0x318   :  { %v3683_v49 = vpop.eup %3682  ;;  %v1016_v3 = vadd.f32 1.0, %v3681_v63 }
 0x319   :  { %3686 = vrcp.f32 %v1015_v51 }
 0x31a   :  { %3688 = vrcp.f32 %v1016_v3  ;;  %v6090_v3 = vld [vmem:[#allocation30_spill] sm:$0xff] }
 0x324   :  { %v3685_v57 = vpop.eup %3684 }
 0x325   :  { %v1025_v11 = vmul.f32 %v3685_v57, %v3683_v49  ;;  %v6088_v49 = vld [vmem:[#allocation31_spill] sm:$0xff] }
 0x326   :  { %v3687_v50 = vpop.eup %3686 }
 0x327   :  { %v1024_v9 = vmul.f32 %v3687_v50, %v4717_v55  ;;  %v3689_v4 = vpop.eup %3688 }
 0x329   :  { %v4775_v8 = vadd.f32 %v1025_v11, %v1024_v9  ;;  %v6091_v9 = vld [vmem:[#allocation35_spill] sm:$0xff] }
 0x32b   :  { %3690 = vtanh.f32 %v4775_v8 }
 0x338   :  { %v3691_v59 = vpop.eup %3690 }
 0x339   :  { %v4778_v1 = vmul.f32 %v3691_v59, %v3689_v4  ;;  %v6092_v4 = vsel %vm4480_vm5, %v6090_v3, %v6091_v9 }
 0x33b   :  { %v1029_v47 = vpack.c.bf16 %v4778_v1, %v4778_v1 }
 0x33d   :  { %1076 = vmatmul.mubr.bf16.vlgmr.msra.gmra.mxu0 %v1029_v47  ;;  %1117 = vmatmul.mubr.bf16.vlgmr.msra.gmra.mxu1 %v1029_v47 }
 0x33e   :  { %1168 = vmatpush1.bf16.msra.mxu0 %v4239_v15  ;;  %1209 = vmatpush1.bf16.msra.mxu1 %v4241_v16 }
 0x33f   :  { %1169 = vmatprep.subr.bf16.mxu0 %v4244_v17  ;;  %1210 = vmatprep.subr.bf16.mxu1 %v4247_v18  ;;  %v6083_v17 = vld [vmem:[#allocation33_spill] sm:$0xff] }
 0x340   :  { %1199 = vmatprep.mubr.bf16.mxu0 %v6070_v14  ;;  %1240 = vmatprep.mubr.bf16.mxu1 %v6070_v14 }
 0x342   :  { %1170 = vmatpush1.bf16.msra.mxu0 %v4250_v19  ;;  %1211 = vmatpush1.bf16.msra.mxu1 %v4254_v20 }
 0x343   :  { %1171 = vmatprep.subr.bf16.mxu0 %v4258_v21  ;;  %1212 = vmatprep.subr.bf16.mxu1 %v4262_v22  ;;  %v6084_v22 = vld [vmem:[#allocation29_spill] sm:$0xff] }
 0x346   :  { %1172 = vmatpush1.bf16.msra.mxu0 %v4269_v24  ;;  %1213 = vmatpush1.bf16.msra.mxu1 %v4273_v25  ;;  %v6085_v24 = vld [vmem:[#allocation32_spill] sm:$0xff] }
 0x347   :  { %1173 = vmatprep.subr.bf16.mxu0 %v4275_v26  ;;  %1214 = vmatprep.subr.bf16.mxu1 %v4278_v27  ;;  %v6086_v55 = vsel %vm4473_vm4, %v6084_v22, %v6085_v24 }
 0x34a   :  { %1174 = vmatpush1.bf16.msra.mxu0 %v4283_v28  ;;  %1215 = vmatpush1.bf16.msra.mxu1 %v4285_v29 }
 0x34b   :  { %1175 = vmatprep.subr.bf16.mxu0 %v4289_v30  ;;  %1216 = vmatprep.subr.bf16.mxu1 %v4293_v31 }
 0x34e   :  { %1176 = vmatpush1.bf16.msra.mxu0 %v4299_v33  ;;  %1217 = vmatpush1.bf16.msra.mxu1 %v4302_v34 }
 0x34f   :  { %1177 = vmatprep.subr.bf16.mxu0 %v4306_v35  ;;  %1218 = vmatprep.subr.bf16.mxu1 %v4309_v36 }
 0x352   :  { %1178 = vmatpush1.bf16.msra.mxu0 %v4314_v37  ;;  %1219 = vmatpush1.bf16.msra.mxu1 %v4318_v38 }
 0x353   :  { %1179 = vmatprep.subr.bf16.mxu0 %v4320_v39  ;;  %1220 = vmatprep.subr.bf16.mxu1 %v4324_v40 }
 0x356   :  { %1180 = vmatpush1.bf16.msra.mxu0 %v4331_v42  ;;  %1221 = vmatpush1.bf16.msra.mxu1 %v4335_v43 }
 0x357   :  { %1181 = vmatprep.subr.bf16.mxu0 %v4337_v44  ;;  %1222 = vmatprep.subr.bf16.mxu1 %v4340_v45 }
 0x35a   :  { %1182 = vmatpush1.bf16.msra.mxu0 %v4345_v46  ;;  %1223 = vmatpush1.bf16.msra.mxu1 %v6071_v0 }
 0x35b   :  { %1291 = vmatprep.subr.bf16.mxu0 %v6072_v61  ;;  %1332 = vmatprep.subr.bf16.mxu1 %v6073_v58  ;;  %v6087_v58 = vld [vmem:[#allocation28_spill] sm:$0xff] }
 0x35c   :  { %v6089_v57 = vsel %vm4469_vm3, %v6087_v58, %v6088_v49 }
 0x3fd   :  { %v1077_v15 = vpop.f32.mrf.mxu0  ;;  %v1118_v16 = vpop.f32.mrf.mxu1 }
 0x3fe   :  { %v1125_v18 = vadd.f32 %v1077_v15, %v6083_v17  ;;  %v1127_v11 = vadd.f32 %v1118_v16, %v6089_v57 }
 0x3ff   :  { %v1079_v19 = vpop.f32.mrf.mxu0  ;;  %v1120_v20 = vpop.f32.mrf.mxu1 }
 0x400   :  { %v3428_v21 = vmul.f32 -1.442695, %v1125_v18  ;;  %v1126_v60 = vadd.f32 %v1079_v19, %v6086_v55  ;;  %v3430_v50 = vmul.f32 -1.442695, %v1127_v11  ;;  %v1128_v59 = vadd.f32 %v1120_v20, %v6092_v4  ;;  %v4840_v11 = vld [vmem:[#allocation8 + $0xe0] ss:$16 sps:$4 sm:$0xff]  }
 0x401   :  { %v1081_v41 = vpop.f32.mrf.mxu0  ;;  %v1122_v53 = vpop.f32.mrf.mxu1  ;;  %v4849_v4 = vld [vmem:[#allocation8 + $0xcc] ss:$16 sps:$4 sm:$0xff]  }
 0x402   :  { %3692 = vpow2.f32 %v3428_v21  ;;  %v3429_v51 = vmul.f32 -1.442695, %v1126_v60 }
 0x403   :  { %v1082_v61 = vpop.f32.mrf.mxu0  ;;  %v1123_v63 = vpop.f32.mrf.mxu1 }
 0x404   :  { %3694 = vpow2.f32 %v3429_v51 }
 0x405   :  { %3696 = vpow2.f32 %v3430_v50  ;;  %v4843_v50 = vld [vmem:[#allocation8 + $0xe8] ss:$16 sps:$4 sm:$0xff]  }
 0x406   :  { %3698 = vtanh.f32 %v1128_v59  ;;  %v4854_v59 = vld [vmem:[#allocation8 + $0xc0] ss:$16 sps:$4 sm:$0xff]  }
 0x40f   :  { %v3693_v47 = vpop.eup %3692 }
 0x410   :  { %v1138_v15 = vadd.f32 1.0, %v3693_v47  ;;  %v4857_v47 = vld [vmem:[#allocation8 + $0xc8] ss:$16 sps:$4 sm:$0xff]  }
 0x411   :  { %v3695_v17 = vpop.eup %3694 }
 0x412   :  { %3700 = vrcp.f32 %v1138_v15  ;;  %v1139_v18 = vadd.f32 1.0, %v3695_v17  ;;  %v3697_v19 = vpop.eup %3696  ;;  %v4860_v15 = vld [vmem:[#allocation8 + $0xa4] ss:$16 sps:$4 sm:$0xff]   ;;  %v4863_v17 = vld [vmem:[#allocation8 + $0xac] ss:$16 sps:$4 sm:$0xff]  }
 0x413   :  { %v3699_v21 = vpop.eup %3698  ;;  %v1140_v41 = vadd.f32 1.0, %v3697_v19 }
 0x414   :  { %3702 = vrcp.f32 %v1139_v18  ;;  %v4866_v18 = vld [vmem:[#allocation8 + $0xa0] ss:$16 sps:$4 sm:$0xff]  }
 0x415   :  { %3704 = vrcp.f32 %v1140_v41 }
 0x41f   :  { %v3701_v55 = vpop.eup %3700 }
 0x420   :  { %v1149_v60 = vmul.f32 %v3701_v55, %v3699_v21 }
 0x421   :  { %v3703_v16 = vpop.eup %3702 }
 0x422   :  { %v1148_v53 = vmul.f32 %v3703_v16, %v4775_v8  ;;  %v3705_v20 = vpop.eup %3704  ;;  %v4846_v8 = vld [vmem:[#allocation8 + $0xc4] ss:$16 sps:$4 sm:$0xff]  }
 0x424   :  { %v4833_v51 = vadd.f32 %v1149_v60, %v1148_v53 }
 0x426   :  { %3706 = vtanh.f32 %v4833_v51 }
 0x433   :  { %v3707_v61 = vpop.eup %3706 }
 0x434   :  { %v4836_v63 = vmul.f32 %v3707_v61, %v3705_v20 }
 0x436   :  { %v1153_v57 = vpack.c.bf16 %v4836_v63, %v4836_v63 }
 0x438   :  { %1200 = vmatmul.mubr.bf16.vlgmr.msra.gmra.mxu0 %v1153_v57  ;;  %1241 = vmatmul.mubr.bf16.vlgmr.msra.gmra.mxu1 %v1153_v57 }
 0x439   :  { %1292 = vmatpush1.bf16.msra.mxu0 %v4840_v11  ;;  %1333 = vmatpush1.bf16.msra.mxu1 %v4843_v50 }
 0x43a   :  { %1293 = vmatprep.subr.bf16.mxu0 %v4846_v8  ;;  %1334 = vmatprep.subr.bf16.mxu1 %v4849_v4 }
 0x43b   :  { %1323 = vmatprep.mubr.bf16.mxu0 %v6070_v14  ;;  %1364 = vmatprep.mubr.bf16.mxu1 %v6070_v14 }
 0x43d   :  { %1294 = vmatpush1.bf16.msra.mxu0 %v4854_v59  ;;  %1335 = vmatpush1.bf16.msra.mxu1 %v4857_v47 }
 0x43e   :  { %1295 = vmatprep.subr.bf16.mxu0 %v4860_v15  ;;  %1336 = vmatprep.subr.bf16.mxu1 %v4863_v17 }
 0x441   :  { %1296 = vmatpush1.bf16.msra.mxu0 %v4866_v18  ;;  %1337 = vmatpush1.bf16.msra.mxu1 %v4273_v25  ;;  %v4890_v25 = vld [vmem:[#allocation8 + $0xe4] ss:$16 sps:$4 sm:$0xff]  }
 0x442   :  { %1297 = vmatprep.subr.bf16.mxu0 %v4275_v26  ;;  %1338 = vmatprep.subr.bf16.mxu1 %v4278_v27  ;;  %v4893_v26 = vld [vmem:[#allocation8 + $0xec] ss:$16 sps:$4 sm:$0xff]  }
 0x445   :  { %1298 = vmatpush1.bf16.msra.mxu0 %v4283_v28  ;;  %1339 = vmatpush1.bf16.msra.mxu1 %v4285_v29  ;;  %v6093_v29 = vld [vmem:[#allocation34_spill] sm:$0xff] }
 0x446   :  { %1299 = vmatprep.subr.bf16.mxu0 %v4289_v30  ;;  %1340 = vmatprep.subr.bf16.mxu1 %v4293_v31 }
 0x449   :  { %1300 = vmatpush1.bf16.msra.mxu0 %v4299_v33  ;;  %1341 = vmatpush1.bf16.msra.mxu1 %v4302_v34 }
 0x44a   :  { %1301 = vmatprep.subr.bf16.mxu0 %v4306_v35  ;;  %1342 = vmatprep.subr.bf16.mxu1 %v4309_v36  ;;  %v6094_v35 = vsel %vm4473_vm4, %v6085_v24, %v6084_v22 }
 0x44d   :  { %1302 = vmatpush1.bf16.msra.mxu0 %v4314_v37  ;;  %1343 = vmatpush1.bf16.msra.mxu1 %v4318_v38 }
 0x44e   :  { %1303 = vmatprep.subr.bf16.mxu0 %v4320_v39  ;;  %1344 = vmatprep.subr.bf16.mxu1 %v4324_v40 }
 0x451   :  { %1304 = vmatpush1.bf16.msra.mxu0 %v4331_v42  ;;  %1345 = vmatpush1.bf16.msra.mxu1 %v4335_v43  ;;  %v6095_v43 = vsel %vm4469_vm3, %v6088_v49, %v6087_v58 }
 0x452   :  { %1305 = vmatprep.subr.bf16.mxu0 %v4337_v44  ;;  %1346 = vmatprep.subr.bf16.mxu1 %v4340_v45 }
 0x455   :  { %1306 = vmatpush1.bf16.msra.mxu0 %v4345_v46  ;;  %1347 = vmatpush1.bf16.msra.mxu1 %v6071_v0  ;;  %v6096_v46 = vsel %vm4480_vm5, %v6091_v9, %v6090_v3 }
 0x456   :  { %1415 = vmatprep.subr.bf16.mxu0 %v4890_v25  ;;  %1456 = vmatprep.subr.bf16.mxu1 %v4893_v26 }
 0x4f8   :  { %v1201_v27 = vpop.f32.mrf.mxu0  ;;  %v1242_v28 = vpop.f32.mrf.mxu1 }
 0x4f9   :  { %v1249_v30 = vadd.f32 %v1201_v27, %v6093_v29  ;;  %v1251_v44 = vadd.f32 %v1242_v28, %v6095_v43  ;;  %v4934_v27 = vld [vmem:[#allocation8 + $0x84] ss:$16 sps:$4 sm:$0xff]   ;;  %v4937_v28 = vld [vmem:[#allocation8 + $0x8c] ss:$16 sps:$4 sm:$0xff]   ;;  %v4940_v29 = vld [vmem:[#allocation8 + $0x80] ss:$16 sps:$4 sm:$0xff]  }
 0x4fa   :  { %v1203_v31 = vpop.f32.mrf.mxu0  ;;  %v1244_v33 = vpop.f32.mrf.mxu1  ;;  %v4976_v43 = vld [vmem:[#allocation8 + $0x20] ss:$16 sps:$4 sm:$0xff]  }
 0x4fb   :  { %v3431_v34 = vmul.f32 -1.442695, %v1249_v30  ;;  %v1250_v36 = vadd.f32 %v1203_v31, %v6094_v35  ;;  %v3433_v45 = vmul.f32 -1.442695, %v1251_v44  ;;  %v1252_v0 = vadd.f32 %v1244_v33, %v6096_v46  ;;  %v4943_v30 = vld [vmem:[#allocation8 + $0x88] ss:$16 sps:$4 sm:$0xff]  }
 0x4fc   :  { %v1205_v37 = vpop.f32.mrf.mxu0  ;;  %v1246_v38 = vpop.f32.mrf.mxu1  ;;  %v4946_v31 = vld [vmem:[#allocation8 + $0x64] ss:$16 sps:$4 sm:$0xff]   ;;  %v4949_v33 = vld [vmem:[#allocation8 + $0x6c] ss:$16 sps:$4 sm:$0xff]   ;;  %v4955_v35 = vld [vmem:[#allocation8 + $0x68] ss:$16 sps:$4 sm:$0xff]  }
 0x4fd   :  { %3708 = vpow2.f32 %v3431_v34  ;;  %v3432_v39 = vmul.f32 -1.442695, %v1250_v36  ;;  %v4952_v34 = vld [vmem:[#allocation8 + $0x60] ss:$16 sps:$4 sm:$0xff]   ;;  %v4958_v36 = vld [vmem:[#allocation8 + $0x44] ss:$16 sps:$4 sm:$0xff]  }
 0x4fe   :  { %v1206_v40 = vpop.f32.mrf.mxu0  ;;  %v1247_v42 = vpop.f32.mrf.mxu1  ;;  %v4961_v37 = vld [vmem:[#allocation8 + $0x4c] ss:$16 sps:$4 sm:$0xff]   ;;  %v4964_v38 = vld [vmem:[#allocation8 + $0x40] ss:$16 sps:$4 sm:$0xff]   ;;  %v4979_v44 = vld [vmem:[#allocation8 + $0x28] ss:$16 sps:$4 sm:$0xff]  }
 0x4ff   :  { %3710 = vpow2.f32 %v3432_v39  ;;  %v4967_v39 = vld [vmem:[#allocation8 + $0x48] ss:$16 sps:$4 sm:$0xff]   ;;  %v4970_v40 = vld [vmem:[#allocation8 + $0x24] ss:$16 sps:$4 sm:$0xff]   ;;  %v4973_v42 = vld [vmem:[#allocation8 + $0x2c] ss:$16 sps:$4 sm:$0xff]  }
 0x500   :  { %3712 = vpow2.f32 %v3433_v45  ;;  %v4982_v45 = vld [vmem:[#allocation8 + $0x4] ss:$16 sps:$4 sm:$0xff]   ;;  %v4985_v46 = vld [vmem:[#allocation8 + $0xc] ss:$16 sps:$4 sm:$0xff]  }
 0x501   :  { %3714 = vtanh.f32 %v1252_v0  ;;  %v4988_v0 = vld [vmem:[#allocation8] ss:$16 sps:$4 sm:$0xff]  }
 0x50a   :  { %v3709_v22 = vpop.eup %3708 }
 0x50b   :  { %v1262_v24 = vadd.f32 1.0, %v3709_v22  ;;  %v4991_v22 = vld [vmem:[#allocation8 + $0x8] ss:$16 sps:$4 sm:$0xff]  }
 0x50c   :  { %v3711_v19 = vpop.eup %3710 }
 0x50d   :  { %3716 = vrcp.f32 %v1262_v24  ;;  %v1263_v21 = vadd.f32 1.0, %v3711_v19  ;;  %v3713_v55 = vpop.eup %3712 }
 0x50e   :  { %v3715_v60 = vpop.eup %3714  ;;  %v1264_v41 = vadd.f32 1.0, %v3713_v55 }
 0x50f   :  { %3718 = vrcp.f32 %v1263_v21  ;;  %v6097_v21 = vld [vmem:[#allocation36_spill] sm:$0xff] }
 0x510   :  { %3720 = vrcp.f32 %v1264_v41 }
 0x51a   :  { %v3717_v16 = vpop.eup %3716 }
 0x51b   :  { %v1273_v58 = vmul.f32 %v3717_v16, %v3715_v60 }
 0x51c   :  { %v3719_v49 = vpop.eup %3718 }
 0x51d   :  { %v1272_v53 = vmul.f32 %v3719_v49, %v4833_v51  ;;  %v3721_v3 = vpop.eup %3720  ;;  %v4931_v51 = vld [vmem:[#allocation8 + $0xa8] ss:$16 sps:$4 sm:$0xff]   ;;  %v6098_v49 = vsel %vm4473_vm4, %v4524_v6, %v4448_v48  ;;  %v6100_v48 = vsel %vm4480_vm5, %v6081_v13, %v6080_v7 }
 0x51f   :  { %v4913_v20 = vadd.f32 %v1273_v58, %v1272_v53 }
 0x521   :  { %3722 = vtanh.f32 %v4913_v20 }
 0x52e   :  { %v3723_v9 = vpop.eup %3722 }
 0x52f   :  { %v4916_v61 = vmul.f32 %v3723_v9, %v3721_v3 }
 0x531   :  { %v1277_v57 = vpack.c.bf16 %v4916_v61, %v4916_v61 }
 0x533   :  { %1324 = vmatmul.mubr.bf16.vlgmr.msra.gmra.mxu0 %v1277_v57  ;;  %1365 = vmatmul.mubr.bf16.vlgmr.msra.gmra.mxu1 %v1277_v57 }
 0x534   :  { %1416 = vmatpush1.bf16.msra.mxu0 %v4840_v11  ;;  %1457 = vmatpush1.bf16.msra.mxu1 %v4843_v50 }
 0x535   :  { %1417 = vmatprep.subr.bf16.mxu0 %v4846_v8  ;;  %1458 = vmatprep.subr.bf16.mxu1 %v4849_v4 }
 0x536   :  { %1447 = vmatprep.mubr.bf16.mxu0 %v6070_v14  ;;  %1488 = vmatprep.mubr.bf16.mxu1 %v6070_v14 }
 0x538   :  { %1418 = vmatpush1.bf16.msra.mxu0 %v4854_v59  ;;  %1459 = vmatpush1.bf16.msra.mxu1 %v4857_v47 }
 0x539   :  { %1419 = vmatprep.subr.bf16.mxu0 %v4860_v15  ;;  %1460 = vmatprep.subr.bf16.mxu1 %v4863_v17 }
 0x53c   :  { %1420 = vmatpush1.bf16.msra.mxu0 %v4866_v18  ;;  %1461 = vmatpush1.bf16.msra.mxu1 %v4931_v51 }
 0x53d   :  { %1421 = vmatprep.subr.bf16.mxu0 %v4934_v27  ;;  %1462 = vmatprep.subr.bf16.mxu1 %v4937_v28 }
 0x540   :  { %1422 = vmatpush1.bf16.msra.mxu0 %v4940_v29  ;;  %1463 = vmatpush1.bf16.msra.mxu1 %v4943_v30 }
 0x541   :  { %1423 = vmatprep.subr.bf16.mxu0 %v4946_v31  ;;  %1464 = vmatprep.subr.bf16.mxu1 %v4949_v33 }
 0x544   :  { %1424 = vmatpush1.bf16.msra.mxu0 %v4952_v34  ;;  %1465 = vmatpush1.bf16.msra.mxu1 %v4955_v35 }
 0x545   :  { %1425 = vmatprep.subr.bf16.mxu0 %v4958_v36  ;;  %1466 = vmatprep.subr.bf16.mxu1 %v4961_v37 }
 0x548   :  { %1426 = vmatpush1.bf16.msra.mxu0 %v4964_v38  ;;  %1467 = vmatpush1.bf16.msra.mxu1 %v4967_v39 }
 0x549   :  { %1427 = vmatprep.subr.bf16.mxu0 %v4970_v40  ;;  %1468 = vmatprep.subr.bf16.mxu1 %v4973_v42 }
 0x54c   :  { %1428 = vmatpush1.bf16.msra.mxu0 %v4976_v43  ;;  %1469 = vmatpush1.bf16.msra.mxu1 %v4979_v44 }
 0x54d   :  { %1429 = vmatprep.subr.bf16.mxu0 %v4982_v45  ;;  %1470 = vmatprep.subr.bf16.mxu1 %v4985_v46 }
 0x550   :  { %1430 = vmatpush1.bf16.msra.mxu0 %v4988_v0  ;;  %1471 = vmatpush1.bf16.msra.mxu1 %v4991_v22 }
 0x551   :  { %1539 = vmatprep.subr.bf16.mxu0 %v4890_v25  ;;  %1580 = vmatprep.subr.bf16.mxu1 %v4893_v26  ;;  %v6099_v26 = vsel %vm4469_vm3, %v4513_v62, %v4443_v12 }
 0x5f3   :  { %v1325_v24 = vpop.f32.mrf.mxu0  ;;  %v1366_v19 = vpop.f32.mrf.mxu1 }
 0x5f4   :  { %v1373_v55 = vadd.f32 %v1325_v24, %v6097_v21  ;;  %v1375_v24 = vadd.f32 %v1366_v19, %v6099_v26  ;;  %v1661_v26 = vsel %vm164_vm2, %v4836_v63, %v4916_v61 }
 0x5f5   :  { %v1327_v60 = vpop.f32.mrf.mxu0  ;;  %v1368_v16 = vpop.f32.mrf.mxu1 }
 0x5f6   :  { %v3434_v58 = vmul.f32 -1.442695, %v1373_v55  ;;  %v1374_v41 = vadd.f32 %v1327_v60, %v6098_v49  ;;  %v3436_v21 = vmul.f32 -1.442695, %v1375_v24  ;;  %v1376_v6 = vadd.f32 %v1368_v16, %v6100_v48 }
 0x5f7   :  { %v1329_v53 = vpop.f32.mrf.mxu0  ;;  %v1370_v3 = vpop.f32.mrf.mxu1  ;;  %v1662_v24 = vsel %vm164_vm2, %v4916_v61, %v4836_v63 }
 0x5f8   :  { %3724 = vpow2.f32 %v3434_v58  ;;  %v3435_v9 = vmul.f32 -1.442695, %v1374_v41 }
 0x5f9   :  { %v1330_v25 = vpop.f32.mrf.mxu0  ;;  %v1371_v57 = vpop.f32.mrf.mxu1 }
 0x5fa   :  { %3726 = vpow2.f32 %v3435_v9 }
 0x5fb   :  { %3728 = vpow2.f32 %v3436_v21 }
 0x5fc   :  { %3730 = vtanh.f32 %v1376_v6 }
 0x605   :  { %v3725_v55 = vpop.eup %3724 }
 0x606   :  { %v1386_v60 = vadd.f32 1.0, %v3725_v55 }
 0x607   :  { %v3727_v58 = vpop.eup %3726 }
 0x608   :  { %3732 = vrcp.f32 %v1386_v60  ;;  %v1387_v49 = vadd.f32 1.0, %v3727_v58  ;;  %v3729_v41 = vpop.eup %3728  ;;  %v6107_v60 = vld [vmem:[#allocation43_spill] sm:$0xff] }
 0x609   :  { %v3731_v53 = vpop.eup %3730  ;;  %v1388_v19 = vadd.f32 1.0, %v3729_v41 }
 0x60a   :  { %3734 = vrcp.f32 %v1387_v49 }
 0x60b   :  { %3736 = vrcp.f32 %v1388_v19 }
 0x615   :  { %v3733_v3 = vpop.eup %3732 }
 0x616   :  { %v1397_v12 = vmul.f32 %v3733_v3, %v3731_v53  ;;  %v6108_v3 = vld [vmem:[#allocation42_spill] sm:$0xff] }
 0x617   :  { %v3735_v62 = vpop.eup %3734 }
 0x618   :  { %v1396_v9 = vmul.f32 %v3735_v62, %v4913_v20  ;;  %v3737_v7 = vpop.eup %3736 }
 0x61a   :  { %v5013_v25 = vadd.f32 %v1397_v12, %v1396_v9  ;;  %v6109_v12 = vld [vmem:[#allocation41_spill] sm:$0xff] }
 0x61b   :  { %v6110_v62 = vsel %vm4473_vm4, %v6108_v3, %v6109_v12 }
 0x61c   :  { %3738 = vtanh.f32 %v5013_v25 }
 0x629   :  { %v3739_v13 = vpop.eup %3738 }
 0x62a   :  { %v1400_v16 = vmul.f32 %v3739_v13, %v3737_v7 }
 0x62c   :  { %v1401_v21 = vpack.c.bf16 %v1400_v16, %v1400_v16  ;;  %v1658_v20 = vsel %vm164_vm2, %v4778_v1, %v1400_v16  ;;  %v1663_v48 = vsel %vm164_vm2, %v1400_v16, %v4778_v1 }
 0x62d   :  { %v5030_v6 = vpack.c.bf16 %v1661_v26, %v1658_v20  ;;  %v5032_v55 = vpack.c.bf16 %v1663_v48, %v1662_v24  ;;  %v6111_v26 = vld [vmem:[#allocation40_spill] sm:$0xff]  ;;  %v6112_v24 = vld [vmem:[#allocation39_spill] sm:$0xff] }
 0x62e   :  { %1448 = vmatmul.mubr.bf16.vlgmr.msra.gmra.mxu0 %v1401_v21  ;;  %1489 = vmatmul.mubr.bf16.vlgmr.msra.gmra.mxu1 %v1401_v21  ;;  %v6113_v21 = vsel %vm4469_vm3, %v6111_v26, %v6112_v24 }
 0x62f   :  { %1540 = vmatpush1.bf16.msra.mxu0 %v4840_v11  ;;  %1581 = vmatpush1.bf16.msra.mxu1 %v4843_v50  ;;  %v6102_v11 = vld [vmem:[#allocation38_spill] sm:$0xff] }
 0x630   :  { %1541 = vmatprep.subr.bf16.mxu0 %v4846_v8  ;;  %1582 = vmatprep.subr.bf16.mxu1 %v4849_v4 }
 0x631   :  { %1571 = vmatprep.mubr.bf16.mxu0 %v6070_v14  ;;  %1612 = vmatprep.mubr.bf16.mxu1 %v6070_v14 }
 0x633   :  { %1542 = vmatpush1.bf16.msra.mxu0 %v4854_v59  ;;  %1583 = vmatpush1.bf16.msra.mxu1 %v4857_v47  ;;  %v6103_v47 = vsel %vm4473_vm4, %v4566_v10, %v4436_v5 }
 0x634   :  { %1543 = vmatprep.subr.bf16.mxu0 %v4860_v15  ;;  %1584 = vmatprep.subr.bf16.mxu1 %v4863_v17 }
 0x637   :  { %1544 = vmatpush1.bf16.msra.mxu0 %v4866_v18  ;;  %1585 = vmatpush1.bf16.msra.mxu1 %v4931_v51 }
 0x638   :  { %1545 = vmatprep.subr.bf16.mxu0 %v4934_v27  ;;  %1586 = vmatprep.subr.bf16.mxu1 %v4937_v28  ;;  %v6104_v28 = vsel %vm4469_vm3, %v4555_v54, %v4431_v2 }
 0x63b   :  { %1546 = vmatpush1.bf16.msra.mxu0 %v4940_v29  ;;  %1587 = vmatpush1.bf16.msra.mxu1 %v4943_v30 }
 0x63c   :  { %1547 = vmatprep.subr.bf16.mxu0 %v4946_v31  ;;  %1588 = vmatprep.subr.bf16.mxu1 %v4949_v33  ;;  %v6105_v31 = vld [vmem:[#allocation26_spill] sm:$0xff] }
 0x63d   :  { %v6106_v5 = vsel %vm4480_vm5, %v4579_v52, %v6105_v31 }
 0x63f   :  { %1548 = vmatpush1.bf16.msra.mxu0 %v4952_v34  ;;  %1589 = vmatpush1.bf16.msra.mxu1 %v4955_v35 }
 0x640   :  { %1549 = vmatprep.subr.bf16.mxu0 %v4958_v36  ;;  %1590 = vmatprep.subr.bf16.mxu1 %v4961_v37 }
 0x643   :  { %1550 = vmatpush1.bf16.msra.mxu0 %v4964_v38  ;;  %1591 = vmatpush1.bf16.msra.mxu1 %v4967_v39 }
 0x644   :  { %1551 = vmatprep.subr.bf16.mxu0 %v4970_v40  ;;  %1592 = vmatprep.subr.bf16.mxu1 %v4973_v42 }
 0x647   :  { %1552 = vmatpush1.bf16.msra.mxu0 %v4976_v43  ;;  %1593 = vmatpush1.bf16.msra.mxu1 %v4979_v44 }
 0x648   :  { %1553 = vmatprep.subr.bf16.mxu0 %v4982_v45  ;;  %1594 = vmatprep.subr.bf16.mxu1 %v4985_v46 }
 0x64b   :  { %1554 = vmatpush1.bf16.msra.mxu0 %v4988_v0  ;;  %1595 = vmatpush1.bf16.msra.mxu1 %v4991_v22 }
 0x6ee   :  { %v1449_v1 = vpop.f32.mrf.mxu0  ;;  %v1490_v63 = vpop.f32.mrf.mxu1 }
 0x6ef   :  { %v1497_v50 = vadd.f32 %v1449_v1, %v6102_v11  ;;  %v1499_v29 = vadd.f32 %v1490_v63, %v6104_v28  ;;  %v6114_v1 = vld [vmem:[#allocation45_spill] sm:$0xff]  ;;  %v6115_v63 = vld [vmem:[#allocation44_spill] sm:$0xff] }
 0x6f0   :  { %v1451_v8 = vpop.f32.mrf.mxu0  ;;  %v1492_v4 = vpop.f32.mrf.mxu1  ;;  %v6116_v11 = vsel %vm4480_vm5, %v6114_v1, %v6115_v63 }
 0x6f1   :  { %v3437_v59 = vmul.f32 -1.442695, %v1497_v50  ;;  %v1498_v15 = vadd.f32 %v1451_v8, %v6103_v47  ;;  %v3439_v30 = vmul.f32 -1.442695, %v1499_v29  ;;  %v1500_v10 = vadd.f32 %v1492_v4, %v6106_v5 }
 0x6f2   :  { %v1453_v17 = vpop.f32.mrf.mxu0  ;;  %v1494_v18 = vpop.f32.mrf.mxu1 }
 0x6f3   :  { %3740 = vpow2.f32 %v3437_v59  ;;  %v3438_v61 = vmul.f32 -1.442695, %v1498_v15 }
 0x6f4   :  { %v1454_v51 = vpop.f32.mrf.mxu0  ;;  %v1495_v27 = vpop.f32.mrf.mxu1 }
 0x6f5   :  { %3742 = vpow2.f32 %v3438_v61 }
 0x6f6   :  { %3744 = vpow2.f32 %v3439_v30 }
 0x6f7   :  { %3746 = vtanh.f32 %v1500_v10  ;;  %v6117_v10 = vld [vmem:[#allocation23_spill] sm:$0xff] }
 0x700   :  { %v3741_v33 = vpop.eup %3740 }
 0x701   :  { %v1510_v34 = vadd.f32 1.0, %v3741_v33 }
 0x702   :  { %v3743_v35 = vpop.eup %3742 }
 0x703   :  { %3748 = vrcp.f32 %v1510_v34  ;;  %v1511_v36 = vadd.f32 1.0, %v3743_v35  ;;  %v3745_v37 = vpop.eup %3744  ;;  %v6118_v35 = vld [vmem:[#allocation46_spill] sm:$0xff] }
 0x704   :  { %v3747_v38 = vpop.eup %3746  ;;  %v1512_v40 = vadd.f32 1.0, %v3745_v37 }
 0x705   :  { %3750 = vrcp.f32 %v1511_v36 }
 0x706   :  { %3752 = vrcp.f32 %v1512_v40 }
 0x710   :  { %v3749_v39 = vpop.eup %3748 }
 0x711   :  { %v1521_v2 = vmul.f32 %v3749_v39, %v3747_v38 }
 0x712   :  { %v3751_v54 = vpop.eup %3750 }
 0x713   :  { %v1520_v42 = vmul.f32 %v3751_v54, %v5013_v25  ;;  %v3753_v52 = vpop.eup %3752 }
 0x715   :  { %v1522_v43 = vadd.f32 %v1521_v2, %v1520_v42 }
 0x717   :  { %3754 = vtanh.f32 %v1522_v43 }
 0x724   :  { %v3755_v44 = vpop.eup %3754 }
 0x725   :  { %v1524_v45 = vmul.f32 %v3755_v44, %v3753_v52 }
 0x727   :  { %v1525_v46 = vpack.c.bf16 %v1524_v45, %v1524_v45  ;;  %v1655_v33 = vsel %vm164_vm2, %v6117_v10, %v1524_v45  ;;  %v1664_v34 = vsel %vm164_vm2, %v1524_v45, %v6117_v10 }
 0x729   :  { %1572 = vmatmul.mubr.bf16.vlgmr.msra.gmra.mxu0 %v1525_v46  ;;  %1613 = vmatmul.mubr.bf16.vlgmr.msra.gmra.mxu1 %v1525_v46 }
 0x7e9   :  { %v1573_v0 = vpop.f32.mrf.mxu0  ;;  %v1614_v22 = vpop.f32.mrf.mxu1 }
 0x7ea   :  { %v1621_v58 = vadd.f32 %v1573_v0, %v6107_v60  ;;  %v1623_v20 = vadd.f32 %v1614_v22, %v6113_v21 }
 0x7eb   :  { %v1575_v49 = vpop.f32.mrf.mxu0  ;;  %v1616_v41 = vpop.f32.mrf.mxu1 }
 0x7ec   :  { %v3440_v53 = vmul.f32 -1.442695, %v1621_v58  ;;  %v1622_v19 = vadd.f32 %v1575_v49, %v6110_v62  ;;  %v3442_v48 = vmul.f32 -1.442695, %v1623_v20  ;;  %v1624_v50 = vadd.f32 %v1616_v41, %v6116_v11 }
 0x7ed   :  { %v1577_v9 = vpop.f32.mrf.mxu0  ;;  %v1618_v25 = vpop.f32.mrf.mxu1 }
 0x7ee   :  { %3756 = vpow2.f32 %v3440_v53  ;;  %v3441_v7 = vmul.f32 -1.442695, %v1622_v19 }
 0x7ef   :  { %v1578_v13 = vpop.f32.mrf.mxu0  ;;  %v1619_v16 = vpop.f32.mrf.mxu1 }
 0x7f0   :  { %3758 = vpow2.f32 %v3441_v7 }
 0x7f1   :  { %3760 = vpow2.f32 %v3442_v48 }
 0x7f2   :  { %3762 = vtanh.f32 %v1624_v50 }
 0x7fb   :  { %v3757_v8 = vpop.eup %3756 }
 0x7fc   :  { %v1634_v4 = vadd.f32 1.0, %v3757_v8 }
 0x7fd   :  { %v3759_v59 = vpop.eup %3758 }
 0x7fe   :  { %3764 = vrcp.f32 %v1634_v4  ;;  %v1635_v47 = vadd.f32 1.0, %v3759_v59  ;;  %v3761_v15 = vpop.eup %3760 }
 0x7ff   :  { %v3763_v17 = vpop.eup %3762  ;;  %v1636_v27 = vadd.f32 1.0, %v3761_v15 }
 0x800   :  { %3766 = vrcp.f32 %v1635_v47 }
 0x801   :  { %3768 = vrcp.f32 %v1636_v27 }
 0x80b   :  { %v3765_v18 = vpop.eup %3764 }
 0x80c   :  { %v1645_v61 = vmul.f32 %v3765_v18, %v3763_v17 }
 0x80d   :  { %v3767_v51 = vpop.eup %3766 }
 0x80e   :  { %v1644_v28 = vmul.f32 %v3767_v51, %v1522_v43  ;;  %v3769_v30 = vpop.eup %3768 }
 0x810   :  { %v1646_v29 = vadd.f32 %v1645_v61, %v1644_v28 }
 0x812   :  { %3770 = vtanh.f32 %v1646_v29 }
 0x81f   :  { %v3771_v31 = vpop.eup %3770 }
 0x820   :  { %v1648_v5 = vmul.f32 %v3771_v31, %v3769_v30 }
 0x822   :  { %v1652_v36 = vsel %vm164_vm2, %v6118_v35, %v1648_v5  ;;  %v1665_v37 = vsel %vm164_vm2, %v1648_v5, %v6118_v35 }
 0x823   :  { %v5111_v38 = vpack.c.bf16 %v1655_v33, %v1652_v36  ;;  %v5113_v39 = vpack.c.bf16 %v1665_v37, %v1664_v34 }
 0x824   :  { %4130 = dma.done.wait [#allocation7], 4096 }
 0x825   :  { %4131 = vsyncadd [#allocation7], 4294963200 }
 0x826   :  { %4132 = dma.done.wait [#allocation7 + $0x1], 4096 }
 0x827   :  { %4133 = vsyncadd [#allocation7 + $0x1], 4294963200 }
 0x828   :  { %4134 = dma.done.wait [#allocation7 + $0x2], 64 }
 0x829   :  { %4135 = vsyncadd [#allocation7 + $0x2], 4294967232  ;;  %1925 = vmatprep.mubr.bf16.mxu0 %v6070_v14  ;;  %1998 = vmatprep.mubr.bf16.mxu1 %v6070_v14  ;;  %v3804_v2 = vld [vmem:[#allocation4 + $0xe4] ss:$16 sps:$4 sm:$0xff]   ;;  %v3806_v54 = vld [vmem:[#allocation4 + $0xec] ss:$16 sps:$4 sm:$0xff]  }
 0x82a   :  { %1893 = vmatprep.subr.bf16.mxu0 %v3804_v2  ;;  %v3808_v40 = vld [vmem:[#allocation4 + $0xe0] ss:$16 sps:$4 sm:$0xff]   ;;  %v3809_v42 = vld [vmem:[#allocation4 + $0xe8] ss:$16 sps:$4 sm:$0xff]   ;;  %1966 = vmatprep.subr.bf16.mxu1 %v3806_v54  ;;  %v3810_v43 = vld [vmem:[#allocation4 + $0xc4] ss:$16 sps:$4 sm:$0xff]  }
 0x82b   :  { %1894 = vmatpush1.bf16.msra.mxu0 %v3808_v40  ;;  %1967 = vmatpush1.bf16.msra.mxu1 %v3809_v42  ;;  %v3812_v52 = vld [vmem:[#allocation4 + $0xcc] ss:$16 sps:$4 sm:$0xff]   ;;  %v3814_v44 = vld [vmem:[#allocation4 + $0xc0] ss:$16 sps:$4 sm:$0xff]   ;;  %v3815_v45 = vld [vmem:[#allocation4 + $0xc8] ss:$16 sps:$4 sm:$0xff]  }
 0x82c   :  { %1895 = vmatprep.subr.bf16.mxu0 %v3810_v43  ;;  %1968 = vmatprep.subr.bf16.mxu1 %v3812_v52  ;;  %v3816_v46 = vld [vmem:[#allocation4 + $0xa4] ss:$16 sps:$4 sm:$0xff]   ;;  %v3818_v0 = vld [vmem:[#allocation4 + $0xac] ss:$16 sps:$4 sm:$0xff]   ;;  %v3820_v22 = vld [vmem:[#allocation4 + $0xa0] ss:$16 sps:$4 sm:$0xff]  }
 0x82d   :  { %v3821_v60 = vld [vmem:[#allocation4 + $0xa8] ss:$16 sps:$4 sm:$0xff]   ;;  %v3822_v58 = vld [vmem:[#allocation4 + $0x84] ss:$16 sps:$4 sm:$0xff]   ;;  %v3824_v49 = vld [vmem:[#allocation4 + $0x8c] ss:$16 sps:$4 sm:$0xff]  }
 0x82e   :  { %v3826_v41 = vld [vmem:[#allocation4 + $0x80] ss:$16 sps:$4 sm:$0xff]   ;;  %v3827_v53 = vld [vmem:[#allocation4 + $0x88] ss:$16 sps:$4 sm:$0xff]   ;;  %v3828_v3 = vld [vmem:[#allocation4 + $0x64] ss:$16 sps:$4 sm:$0xff]  }
 0x82f   :  { %1896 = vmatpush1.bf16.msra.mxu0 %v3814_v44  ;;  %1969 = vmatpush1.bf16.msra.mxu1 %v3815_v45  ;;  %v3830_v12 = vld [vmem:[#allocation4 + $0x6c] ss:$16 sps:$4 sm:$0xff]   ;;  %v3832_v62 = vld [vmem:[#allocation4 + $0x60] ss:$16 sps:$4 sm:$0xff]   ;;  %v3833_v19 = vld [vmem:[#allocation4 + $0x68] ss:$16 sps:$4 sm:$0xff]  }
 0x830   :  { %1897 = vmatprep.subr.bf16.mxu0 %v3816_v46  ;;  %1970 = vmatprep.subr.bf16.mxu1 %v3818_v0  ;;  %v3834_v9 = vld [vmem:[#allocation4 + $0x44] ss:$16 sps:$4 sm:$0xff]   ;;  %v3836_v25 = vld [vmem:[#allocation4 + $0x4c] ss:$16 sps:$4 sm:$0xff]   ;;  %v3838_v7 = vld [vmem:[#allocation4 + $0x40] ss:$16 sps:$4 sm:$0xff]  }
 0x831   :  { %v3839_v13 = vld [vmem:[#allocation4 + $0x48] ss:$16 sps:$4 sm:$0xff]   ;;  %v3840_v16 = vld [vmem:[#allocation4 + $0x24] ss:$16 sps:$4 sm:$0xff]   ;;  %v3842_v26 = vld [vmem:[#allocation4 + $0x2c] ss:$16 sps:$4 sm:$0xff]  }
 0x832   :  { %v3844_v24 = vld [vmem:[#allocation4 + $0x20] ss:$16 sps:$4 sm:$0xff]   ;;  %v3845_v21 = vld [vmem:[#allocation4 + $0x28] ss:$16 sps:$4 sm:$0xff]   ;;  %v3846_v20 = vld [vmem:[#allocation4 + $0x4] ss:$16 sps:$4 sm:$0xff]  }
 0x833   :  { %1898 = vmatpush1.bf16.msra.mxu0 %v3820_v22  ;;  %1971 = vmatpush1.bf16.msra.mxu1 %v3821_v60  ;;  %v3848_v48 = vld [vmem:[#allocation4 + $0xc] ss:$16 sps:$4 sm:$0xff]   ;;  %v3850_v1 = vld [vmem:[#allocation4] ss:$16 sps:$4 sm:$0xff]   ;;  %v3851_v63 = vld [vmem:[#allocation4 + $0x8] ss:$16 sps:$4 sm:$0xff]  }
 0x834   :  { %1899 = vmatprep.subr.bf16.mxu0 %v3822_v58  ;;  %1972 = vmatprep.subr.bf16.mxu1 %v3824_v49  ;;  %v5117_v11 = vld [vmem:[#allocation5 + $0xe4] ss:$16 sps:$4 sm:$0xff]   ;;  %v5119_v50 = vld [vmem:[#allocation5 + $0xec] ss:$16 sps:$4 sm:$0xff]   ;;  %v5121_v8 = vld [vmem:[#allocation5 + $0xe0] ss:$16 sps:$4 sm:$0xff]  }
 0x835   :  { %6119 = vst [vmem:[#allocation21_spill] sm:$0xff] %v5117_v11  ;;  %6120 = vst [vmem:[#allocation22_spill] sm:$0xff] %v5119_v50  ;;  %v5123_v4 = vld [vmem:[#allocation5 + $0xe8] ss:$16 sps:$4 sm:$0xff]   ;;  %v5125_v59 = vld [vmem:[#allocation5 + $0xc4] ss:$16 sps:$4 sm:$0xff]  }
 0x836   :  { %v5129_v47 = vld [vmem:[#allocation5 + $0xcc] ss:$16 sps:$4 sm:$0xff]   ;;  %v5133_v15 = vld [vmem:[#allocation5 + $0xc0] ss:$16 sps:$4 sm:$0xff]   ;;  %v5137_v17 = vld [vmem:[#allocation5 + $0xc8] ss:$16 sps:$4 sm:$0xff]  }
 0x837   :  { %1900 = vmatpush1.bf16.msra.mxu0 %v3826_v41  ;;  %1973 = vmatpush1.bf16.msra.mxu1 %v3827_v53  ;;  %v5139_v18 = vld [vmem:[#allocation5 + $0xa4] ss:$16 sps:$4 sm:$0xff]   ;;  %v5143_v61 = vld [vmem:[#allocation5 + $0xac] ss:$16 sps:$4 sm:$0xff]   ;;  %v5147_v51 = vld [vmem:[#allocation5 + $0xa0] ss:$16 sps:$4 sm:$0xff]  }
 0x838   :  { %1901 = vmatprep.subr.bf16.mxu0 %v3828_v3  ;;  %1974 = vmatprep.subr.bf16.mxu1 %v3830_v12  ;;  %v5149_v27 = vld [vmem:[#allocation5 + $0xa8] ss:$16 sps:$4 sm:$0xff]   ;;  %v5153_v28 = vld [vmem:[#allocation5 + $0x84] ss:$16 sps:$4 sm:$0xff]   ;;  %v5157_v29 = vld [vmem:[#allocation5 + $0x8c] ss:$16 sps:$4 sm:$0xff]  }
 0x839   :  { %v5159_v30 = vld [vmem:[#allocation5 + $0x80] ss:$16 sps:$4 sm:$0xff]   ;;  %v5161_v31 = vld [vmem:[#allocation5 + $0x88] ss:$16 sps:$4 sm:$0xff]   ;;  %v5165_v5 = vld [vmem:[#allocation5 + $0x64] ss:$16 sps:$4 sm:$0xff]  }
 0x83a   :  { %v5167_v10 = vld [vmem:[#allocation5 + $0x6c] ss:$16 sps:$4 sm:$0xff]   ;;  %v5179_v33 = vld [vmem:[#allocation5 + $0x68] ss:$16 sps:$4 sm:$0xff]   ;;  %v5183_v34 = vld [vmem:[#allocation5 + $0x44] ss:$16 sps:$4 sm:$0xff]  }
 0x83b   :  { %1902 = vmatpush1.bf16.msra.mxu0 %v3832_v62  ;;  %1975 = vmatpush1.bf16.msra.mxu1 %v3833_v19  ;;  %v5185_v35 = vld [vmem:[#allocation5 + $0x4c] ss:$16 sps:$4 sm:$0xff]   ;;  %v5191_v36 = vld [vmem:[#allocation5 + $0x40] ss:$16 sps:$4 sm:$0xff]   ;;  %v5193_v37 = vld [vmem:[#allocation5 + $0x48] ss:$16 sps:$4 sm:$0xff]  }
 0x83c   :  { %1903 = vmatprep.subr.bf16.mxu0 %v3834_v9  ;;  %1976 = vmatprep.subr.bf16.mxu1 %v3836_v25  ;;  %v5199_v2 = vld [vmem:[#allocation5 + $0x2c] ss:$16 sps:$4 sm:$0xff]   ;;  %v5207_v54 = vld [vmem:[#allocation5 + $0x28] ss:$16 sps:$4 sm:$0xff]   ;;  %v5211_v40 = vld [vmem:[#allocation5 + $0x4] ss:$16 sps:$4 sm:$0xff]  }
 0x83d   :  { %v5213_v42 = vld [vmem:[#allocation5 + $0xc] ss:$16 sps:$4 sm:$0xff]   ;;  %v5219_v43 = vld [vmem:[#allocation5] ss:$16 sps:$4 sm:$0xff]   ;;  %v5221_v52 = vld [vmem:[#allocation5 + $0x8] ss:$16 sps:$4 sm:$0xff]  }
 0x83e   :  { %6121 = vst [vmem:[#allocation27_spill] sm:$0xff] %v5219_v43  ;;  %6122 = vst [vmem:[#allocation37_spill] sm:$0xff] %v5221_v52  ;;  %v6123_v46 = vld [vmem:[#allocation24_spill] sm:$0xff]  ;;  %vm4143_vm6 = vmmov 0   ;;  %vm3328_vm8 = vcmask 80896  }
 0x83f   :  { %1904 = vmatpush1.bf16.msra.mxu0 %v3838_v7  ;;  %1977 = vmatpush1.bf16.msra.mxu1 %v3839_v13  ;;  %v6124_v0 = vsub.s32 2, %v6123_v46  ;;  %v6125_v49 = vsub.s32 0, %v6123_v46  ;;  %v6126_v53 = vsub.s32 3, %v6123_v46  ;;  %v6127_v19 = vsub.s32 1, %v6123_v46  ;;  %vm3215_vm7 = vmpackc.low %vm164_vm2, %vm164_vm2 }
 0x840   :  { %1905 = vmatprep.subr.bf16.mxu0 %v3840_v16  ;;  %1978 = vmatprep.subr.bf16.mxu1 %v3842_v26 }
 0x843   :  { %1906 = vmatpush1.bf16.msra.mxu0 %v3844_v24  ;;  %1979 = vmatpush1.bf16.msra.mxu1 %v3845_v21 }
 0x844   :  { %1907 = vmatprep.subr.bf16.mxu0 %v3846_v20  ;;  %1980 = vmatprep.subr.bf16.mxu1 %v3848_v48 }
 0x847   :  { %1908 = vmatpush1.bf16.msra.mxu0 %v3850_v1  ;;  %1981 = vmatpush1.bf16.msra.mxu1 %v3851_v63 }
 0x848   :  { %2275 = vmatprep.subr.bf16.mxu0 %v5117_v11  ;;  %2316 = vmatprep.subr.bf16.mxu1 %v5119_v50 }
 0x84a   :  { %1926 = vmatmul.mubr.bf16.vlgmr.msra.gmra.mxu0 %v5111_v38  ;;  %1999 = vmatmul.mubr.bf16.vlgmr.msra.gmra.mxu1 %v5111_v38  ;;  %v5197_v38 = vld [vmem:[#allocation5 + $0x24] ss:$16 sps:$4 sm:$0xff]  }
 0x84b   :  { %2276 = vmatpush1.bf16.msra.mxu0 %v5121_v8  ;;  %2317 = vmatpush1.bf16.msra.mxu1 %v5123_v4 }
 0x84c   :  { %2277 = vmatprep.subr.bf16.mxu0 %v5125_v59  ;;  %2318 = vmatprep.subr.bf16.mxu1 %v5129_v47 }
 0x84d   :  { %1935 = vmatprep.mubr.bf16.mxu0 %v6070_v14  ;;  %2008 = vmatprep.mubr.bf16.mxu1 %v6070_v14 }
 0x84f   :  { %2278 = vmatpush1.bf16.msra.mxu0 %v5133_v15  ;;  %2319 = vmatpush1.bf16.msra.mxu1 %v5137_v17 }
 0x850   :  { %2279 = vmatprep.subr.bf16.mxu0 %v5139_v18  ;;  %2320 = vmatprep.subr.bf16.mxu1 %v5143_v61 }
 0x852   :  { %1936 = vmatmul.mubr.bf16.gmra.mxu0 %v5030_v6  ;;  %2009 = vmatmul.mubr.bf16.gmra.mxu1 %v5030_v6  ;;  %v5177_v6 = vld [vmem:[#allocation5 + $0x60] ss:$16 sps:$4 sm:$0xff]  }
 0x853   :  { %2280 = vmatpush1.bf16.msra.mxu0 %v5147_v51  ;;  %2321 = vmatpush1.bf16.msra.mxu1 %v5149_v27 }
 0x854   :  { %2281 = vmatprep.subr.bf16.mxu0 %v5153_v28  ;;  %2322 = vmatprep.subr.bf16.mxu1 %v5157_v29 }
 0x855   :  { %1945 = vmatprep.mubr.bf16.mxu0 %v6070_v14  ;;  %2018 = vmatprep.mubr.bf16.mxu1 %v6070_v14 }
 0x857   :  { %2282 = vmatpush1.bf16.msra.mxu0 %v5159_v30  ;;  %2323 = vmatpush1.bf16.msra.mxu1 %v5161_v31 }
 0x858   :  { %2283 = vmatprep.subr.bf16.mxu0 %v5165_v5  ;;  %2324 = vmatprep.subr.bf16.mxu1 %v5167_v10 }
 0x85a   :  { %1946 = vmatmul.mubr.bf16.gmra.mxu0 %v5032_v55  ;;  %2019 = vmatmul.mubr.bf16.gmra.mxu1 %v5032_v55  ;;  %v5205_v55 = vld [vmem:[#allocation5 + $0x20] ss:$16 sps:$4 sm:$0xff]  }
 0x85b   :  { %2284 = vmatpush1.bf16.msra.mxu0 %v5177_v6  ;;  %2325 = vmatpush1.bf16.msra.mxu1 %v5179_v33 }
 0x85c   :  { %2285 = vmatprep.subr.bf16.mxu0 %v5183_v34  ;;  %2326 = vmatprep.subr.bf16.mxu1 %v5185_v35 }
 0x85d   :  { %1955 = vmatprep.mubr.bf16.mxu0 %v6070_v14  ;;  %2028 = vmatprep.mubr.bf16.mxu1 %v6070_v14 }
 0x85f   :  { %2286 = vmatpush1.bf16.msra.mxu0 %v5191_v36  ;;  %2327 = vmatpush1.bf16.msra.mxu1 %v5193_v37 }
 0x860   :  { %2287 = vmatprep.subr.bf16.mxu0 %v5197_v38  ;;  %2328 = vmatprep.subr.bf16.mxu1 %v5199_v2 }
 0x862   :  { %1956 = vmatmul.mubr.bf16.gmra.mxu0 %v5113_v39  ;;  %2029 = vmatmul.mubr.bf16.gmra.mxu1 %v5113_v39  ;;  %v1711_v39 = vld [vmem:[#allocation6] sm:$0xf] }
 0x863   :  { %2288 = vmatpush1.bf16.msra.mxu0 %v5205_v55  ;;  %2329 = vmatpush1.bf16.msra.mxu1 %v5207_v54  ;;  %v5273_v22 = vrot.slane %v1711_v39, %v6124_v0  ;;  %v5281_v41 = vrot.slane %v1711_v39, %v6125_v49  ;;  %v5285_v3 = vrot.slane %v1711_v39, %v6126_v53 }
 0x864   :  { %2289 = vmatprep.subr.bf16.mxu0 %v5211_v40  ;;  %2330 = vmatprep.subr.bf16.mxu1 %v5213_v42  ;;  %v5289_v9 = vrot.slane %v1711_v39, %v6127_v19 }
 0x865   :  { %2307 = vmatprep.mubr.bf16.mxu0 %v6070_v14  ;;  %2348 = vmatprep.mubr.bf16.mxu1 %v6070_v14 }
 0x867   :  { %2290 = vmatpush1.bf16.msra.mxu0 %v5219_v43  ;;  %2331 = vmatpush1.bf16.msra.mxu1 %v5221_v52 }
 0x868   :  { %2398 = vmatprep.subr.bf16.mxu0 %v5117_v11  ;;  %2439 = vmatprep.subr.bf16.mxu1 %v5119_v50 }
 0x86a   :  { %2308 = vmatmul.mubr.bf16.vlgmr.msra.gmra.mxu0 %v6070_v14  ;;  %2349 = vmatmul.mubr.bf16.vlgmr.msra.gmra.mxu1 %v6070_v14 }
 0x86b   :  { %2399 = vmatpush1.bf16.msra.mxu0 %v5121_v8  ;;  %2440 = vmatpush1.bf16.msra.mxu1 %v5123_v4 }
 0x86c   :  { %2400 = vmatprep.subr.bf16.mxu0 %v5125_v59  ;;  %2441 = vmatprep.subr.bf16.mxu1 %v5129_v47 }
 0x86d   :  { %2430 = vmatprep.mubr.bf16.mxu0 %v6070_v14  ;;  %2471 = vmatprep.mubr.bf16.mxu1 %v6070_v14 }
 0x86f   :  { %2401 = vmatpush1.bf16.msra.mxu0 %v5133_v15  ;;  %2442 = vmatpush1.bf16.msra.mxu1 %v5137_v17 }
 0x870   :  { %2402 = vmatprep.subr.bf16.mxu0 %v5139_v18  ;;  %2443 = vmatprep.subr.bf16.mxu1 %v5143_v61 }
 0x873   :  { %2403 = vmatpush1.bf16.msra.mxu0 %v5147_v51  ;;  %2444 = vmatpush1.bf16.msra.mxu1 %v5149_v27 }
 0x874   :  { %2404 = vmatprep.subr.bf16.mxu0 %v5153_v28  ;;  %2445 = vmatprep.subr.bf16.mxu1 %v5157_v29 }
 0x877   :  { %2405 = vmatpush1.bf16.msra.mxu0 %v5159_v30  ;;  %2446 = vmatpush1.bf16.msra.mxu1 %v5161_v31 }
 0x878   :  { %2406 = vmatprep.subr.bf16.mxu0 %v5165_v5  ;;  %2447 = vmatprep.subr.bf16.mxu1 %v5167_v10 }
 0x87b   :  { %2407 = vmatpush1.bf16.msra.mxu0 %v5177_v6  ;;  %2448 = vmatpush1.bf16.msra.mxu1 %v5179_v33 }
 0x87c   :  { %2408 = vmatprep.subr.bf16.mxu0 %v5183_v34  ;;  %2449 = vmatprep.subr.bf16.mxu1 %v5185_v35 }
 0x87f   :  { %2409 = vmatpush1.bf16.msra.mxu0 %v5191_v36  ;;  %2450 = vmatpush1.bf16.msra.mxu1 %v5193_v37 }
 0x880   :  { %2410 = vmatprep.subr.bf16.mxu0 %v5197_v38  ;;  %2451 = vmatprep.subr.bf16.mxu1 %v5199_v2 }
 0x883   :  { %2411 = vmatpush1.bf16.msra.mxu0 %v5205_v55  ;;  %2452 = vmatpush1.bf16.msra.mxu1 %v5207_v54 }
 0x884   :  { %2412 = vmatprep.subr.bf16.mxu0 %v5211_v40  ;;  %2453 = vmatprep.subr.bf16.mxu1 %v5213_v42 }
 0x887   :  { %2413 = vmatpush1.bf16.msra.mxu0 %v5219_v43  ;;  %2454 = vmatpush1.bf16.msra.mxu1 %v5221_v52 }
 0x888   :  { %2521 = vmatprep.subr.bf16.mxu0 %v5117_v11  ;;  %2562 = vmatprep.subr.bf16.mxu1 %v5119_v50 }
 0x90a   :  { %v5267_v44 = vpop.f32.mrf.mxu0  ;;  %v5269_v45 = vpop.f32.mrf.mxu1 }
 0x90c   :  { %v5275_v60 = vpop.f32.mrf.mxu0  ;;  %v5277_v58 = vpop.f32.mrf.mxu1 }
 0x90e   :  { %v1931_v12 = vpop.f32.mrf.mxu0  ;;  %v2004_v62 = vpop.f32.mrf.mxu1 }
 0x90f   :  { %v5292_v25 = vadd.f32 %v1931_v12, %v5281_v41  ;;  %v5295_v7 = vadd.f32 %v2004_v62, %v5273_v22 }
 0x910   :  { %v1933_v13 = vpop.f32.mrf.mxu0  ;;  %v2006_v16 = vpop.f32.mrf.mxu1 }
 0x911   :  { %v5298_v26 = vadd.f32 %v1933_v13, %v5289_v9  ;;  %v5301_v24 = vadd.f32 %v2006_v16, %v5285_v3 }
 0x912   :  { %v1937_v21 = vpop.f32.mrf.mxu0  ;;  %v2010_v20 = vpop.f32.mrf.mxu1 }
 0x913   :  { %6128 = vst [vmem:[#allocation33_spill] sm:$0xff] %v5301_v24  ;;  %v1938_v48 = vadd.f32 %v1937_v21, %v5281_v41  ;;  %v5305_v1 = vadd.f32 %v2010_v20, %v5273_v22 }
 0x914   :  { %v1939_v63 = vpop.f32.mrf.mxu0  ;;  %v2012_v39 = vpop.f32.mrf.mxu1 }
 0x915   :  { %v5308_v46 = vadd.f32 %v1939_v63, %v5289_v9  ;;  %v5311_v0 = vadd.f32 %v2012_v39, %v5285_v3 }
 0x916   :  { %v1941_v49 = vpop.f32.mrf.mxu0  ;;  %v2014_v53 = vpop.f32.mrf.mxu1 }
 0x917   :  { %6129 = vst [vmem:[#allocation29_spill] sm:$0xff] %v5311_v0  ;;  %v1942_v12 = vadd.f32 %v1941_v49, %v5281_v41  ;;  %v5315_v62 = vadd.f32 %v2014_v53, %v5273_v22 }
 0x918   :  { %v1943_v19 = vpop.f32.mrf.mxu0  ;;  %v2016_v13 = vpop.f32.mrf.mxu1 }
 0x919   :  { %6130 = vst [vmem:[#allocation32_spill] sm:$0xff] %v5315_v62  ;;  %v5318_v16 = vadd.f32 %v1943_v19, %v5289_v9  ;;  %v5321_v21 = vadd.f32 %v2016_v13, %v5285_v3 }
 0x91a   :  { %v1947_v20 = vpop.f32.mrf.mxu0  ;;  %v2020_v63 = vpop.f32.mrf.mxu1 }
 0x91b   :  { %6131 = vst [vmem:[#allocation28_spill] sm:$0xff] %v5318_v16  ;;  %6132 = vst [vmem:[#allocation31_spill] sm:$0xff] %v5321_v21  ;;  %v1948_v39 = vadd.f32 %v1947_v20, %v5281_v41  ;;  %v5325_v50 = vadd.f32 %v2020_v63, %v5273_v22  ;;  %v1928_v21 = vadd.f32 %v5267_v44, %v5281_v41 }
 0x91c   :  { %v1949_v11 = vpop.f32.mrf.mxu0  ;;  %v2022_v49 = vpop.f32.mrf.mxu1 }
 0x91d   :  { %6133 = vst [vmem:[#allocation30_spill] sm:$0xff] %v5325_v50  ;;  %v5328_v53 = vadd.f32 %v1949_v11, %v5289_v9  ;;  %v5331_v52 = vadd.f32 %v2022_v49, %v5285_v3  ;;  %v5335_v19 = vsel %vm164_vm2, %v1942_v12, %v1948_v39  ;;  %v5343_v43 = vsel %vm164_vm2, %v1948_v39, %v1942_v12 }
 0x91e   :  { %6136 = vst [vmem:[#allocation36_spill] sm:$0xff] %v5335_v19  ;;  %v1951_v20 = vpop.f32.mrf.mxu0  ;;  %v2024_v63 = vpop.f32.mrf.mxu1  ;;  %6137 = vst [vmem:[#allocation38_spill] sm:$0xff] %v5343_v43 }
 0x91f   :  { %6134 = vst [vmem:[#allocation35_spill] sm:$0xff] %v5328_v53  ;;  %6135 = vst [vmem:[#allocation34_spill] sm:$0xff] %v5331_v52  ;;  %v1952_v49 = vadd.f32 %v1951_v20, %v5281_v41  ;;  %v5351_v19 = vadd.f32 %v2024_v63, %v5273_v22 }
 0x920   :  { %v1953_v39 = vpop.f32.mrf.mxu0  ;;  %v2026_v43 = vpop.f32.mrf.mxu1 }
 0x921   :  { %6138 = vst [vmem:[#allocation26_spill] sm:$0xff] %v5351_v19  ;;  %v5370_v11 = vadd.f32 %v1953_v39, %v5289_v9  ;;  %v5373_v13 = vadd.f32 %v2026_v43, %v5285_v3  ;;  %v5377_v12 = vsel %vm164_vm2, %v1938_v48, %v1952_v49  ;;  %v5385_v63 = vsel %vm164_vm2, %v1952_v49, %v1938_v48 }
 0x922   :  { %v1957_v50 = vpop.f32.mrf.mxu0  ;;  %v2030_v62 = vpop.f32.mrf.mxu1  ;;  %6140 = vst [vmem:[#allocation42_spill] sm:$0xff] %v5385_v63 }
 0x923   :  { %6139 = vst [vmem:[#allocation43_spill] sm:$0xff] %v5373_v13  ;;  %v1958_v39 = vadd.f32 %v1957_v50, %v5281_v41  ;;  %v5393_v52 = vadd.f32 %v2030_v62, %v5273_v22 }
 0x924   :  { %v1959_v49 = vpop.f32.mrf.mxu0  ;;  %v2032_v63 = vpop.f32.mrf.mxu1 }
 0x925   :  { %v5412_v43 = vadd.f32 %v1959_v49, %v5289_v9  ;;  %v5415_v20 = vadd.f32 %v2032_v63, %v5285_v3  ;;  %v5420_v48 = vsel %vm164_vm2, %v5292_v25, %v1958_v39  ;;  %v5431_v63 = vsel %vm164_vm2, %v1958_v39, %v5292_v25 }
 0x926   :  { %v1961_v62 = vpop.f32.mrf.mxu0  ;;  %v2034_v53 = vpop.f32.mrf.mxu1  ;;  %6142 = vst [vmem:[#allocation40_spill] sm:$0xff] %v5431_v63  ;;  %v5451_v39 = vadd.f32 %v5269_v45, %v5273_v22 }
 0x927   :  { %6141 = vst [vmem:[#allocation41_spill] sm:$0xff] %v5415_v20  ;;  %v1962_v16 = vadd.f32 %v1961_v62, %v5281_v41  ;;  %v5439_v13 = vadd.f32 %v2034_v53, %v5273_v22  ;;  %v5463_v62 = vadd.f32 %v5275_v60, %v5289_v9  ;;  %v5475_v41 = vadd.f32 %v5277_v58, %v5285_v3 }
 0x928   :  { %6144 = vst [vmem:[#allocation45_spill] sm:$0xff] %v5451_v39  ;;  %v1963_v49 = vpop.f32.mrf.mxu0  ;;  %v2036_v50 = vpop.f32.mrf.mxu1 }
 0x929   :  { %6143 = vst [vmem:[#allocation39_spill] sm:$0xff] %v5439_v13  ;;  %6145 = vst [vmem:[#allocation44_spill] sm:$0xff] %v5463_v62  ;;  %v5466_v25 = vadd.f32 %v1963_v49, %v5289_v9  ;;  %v5469_v45 = vadd.f32 %v2036_v50, %v5285_v3  ;;  %v2111_v22 = vsel %vm164_vm2, %v1928_v21, %v1962_v16 }
 0x92a   :  { %6148 = vst [vmem:[#allocation24_spill] sm:$0xff] %v5475_v41  ;;  %v2309_v44 = vpop.f32.mrf.mxu0  ;;  %v2350_v63 = vpop.f32.mrf.mxu1  ;;  %v5479_v53 = vsel %vm164_vm2, %v1962_v16, %v1928_v21  ;;  %v2113_v19 = vsel %vm4469_vm3, %v5451_v39, %v5439_v13 }
 0x92b   :  { %6146 = vst [vmem:[#allocation23_spill] sm:$0xff] %v5466_v25  ;;  %6147 = vst [vmem:[#allocation46_spill] sm:$0xff] %v5469_v45  ;;  %v2357_v9 = vadd.f32 %v2309_v44, %v2111_v22  ;;  %v2112_v50 = vsel %vm4473_vm4, %v5463_v62, %v5466_v25  ;;  %v2359_v3 = vadd.f32 %v2350_v63, %v2113_v19 }
 0x92c   :  { %6149 = vst [vmem:[#allocation47_spill] sm:$0xff] %v5479_v53  ;;  %v2311_v49 = vpop.f32.mrf.mxu0  ;;  %v2352_v58 = vpop.f32.mrf.mxu1  ;;  %v2114_v16 = vsel %vm4480_vm5, %v5475_v41, %v5469_v45  ;;  %v6157_v45 = vsel %vm4480_vm5, %v5301_v24, %v5415_v20 }
 0x92d   :  { %v3507_v21 = vmul.f32 -1.442695, %v2357_v9  ;;  %v2358_v60 = vadd.f32 %v2311_v49, %v2112_v50  ;;  %v3509_v9 = vmul.f32 -1.442695, %v2359_v3  ;;  %v2360_v49 = vadd.f32 %v2352_v58, %v2114_v16 }
 0x92e   :  { %v2313_v44 = vpop.f32.mrf.mxu0  ;;  %v2354_v22 = vpop.f32.mrf.mxu1 }
 0x92f   :  { %3908 = vpow2.f32 %v3507_v21  ;;  %v3508_v57 = vmul.f32 -1.442695, %v2358_v60 }
 0x930   :  { %v2314_v53 = vpop.f32.mrf.mxu0  ;;  %v2355_v0 = vpop.f32.mrf.mxu1 }
 0x931   :  { %3910 = vpow2.f32 %v3508_v57 }
 0x932   :  { %3912 = vpow2.f32 %v3509_v9  ;;  %v6195_v56 = vld [vmem:[#allocation46_spill] sm:$0xff] }
 0x93c   :  { %v3909_v50 = vpop.eup %3908 }
 0x93d   :  { %v2370_v44 = vadd.f32 1.0, %v3909_v50  ;;  %v6152_v50 = vld [vmem:[#allocation37_spill] sm:$0xff] }
 0x93e   :  { %v3911_v21 = vpop.eup %3910 }
 0x93f   :  { %3914 = vrcp.f32 %v2370_v44  ;;  %v2371_v0 = vadd.f32 1.0, %v3911_v21  ;;  %v3913_v57 = vpop.eup %3912  ;;  %v6154_v44 = vld [vmem:[#allocation22_spill] sm:$0xff] }
 0x940   :  { %3916 = vtanh.f32 %v2360_v49  ;;  %v2372_v19 = vadd.f32 1.0, %v3913_v57  ;;  %v6153_v49 = vld [vmem:[#allocation21_spill] sm:$0xff] }
 0x941   :  { %3918 = vrcp.f32 %v2371_v0 }
 0x942   :  { %3920 = vrcp.f32 %v2372_v19  ;;  %v6155_v19 = vsel %vm4473_vm4, %v5298_v26, %v5412_v43 }
 0x94c   :  { %v3915_v53 = vpop.eup %3914 }
 0x94d   :  { %v3917_v60 = vpop.eup %3916 }
 0x94e   :  { %v3919_v22 = vpop.eup %3918  ;;  %v2381_v39 = vmul.f32 %v3917_v60, %v3915_v53 }
 0x94f   :  { %v2380_v63 = vmul.f32 0.0, %v3919_v22  ;;  %v3921_v58 = vpop.eup %3920 }
 0x951   :  { %v5505_v13 = vadd.f32 %v2381_v39, %v2380_v63  ;;  %v6151_v39 = vld [vmem:[#allocation27_spill] sm:$0xff] }
 0x953   :  { %3922 = vtanh.f32 %v5505_v13 }
 0x960   :  { %v3923_v3 = vpop.eup %3922 }
 0x961   :  { %v2384_v16 = vmul.f32 %v3923_v3, %v3921_v58 }
 0x963   :  { %v5508_v9 = vpack.c.bf16 %v2384_v16, %v2384_v16 }
 0x965   :  { %6150 = vst [vmem:[#allocation48_spill] sm:$0xff] %v5508_v9  ;;  %2431 = vmatmul.mubr.bf16.vlgmr.msra.gmra.mxu0 %v5508_v9  ;;  %2472 = vmatmul.mubr.bf16.vlgmr.msra.gmra.mxu1 %v5508_v9 }
 0x966   :  { %2522 = vmatpush1.bf16.msra.mxu0 %v5121_v8  ;;  %2563 = vmatpush1.bf16.msra.mxu1 %v5123_v4 }
 0x967   :  { %2523 = vmatprep.subr.bf16.mxu0 %v5125_v59  ;;  %2564 = vmatprep.subr.bf16.mxu1 %v5129_v47 }
 0x968   :  { %2553 = vmatprep.mubr.bf16.mxu0 %v6070_v14  ;;  %2594 = vmatprep.mubr.bf16.mxu1 %v6070_v14 }
 0x96a   :  { %2524 = vmatpush1.bf16.msra.mxu0 %v5133_v15  ;;  %2565 = vmatpush1.bf16.msra.mxu1 %v5137_v17 }
 0x96b   :  { %2525 = vmatprep.subr.bf16.mxu0 %v5139_v18  ;;  %2566 = vmatprep.subr.bf16.mxu1 %v5143_v61 }
 0x96e   :  { %2526 = vmatpush1.bf16.msra.mxu0 %v5147_v51  ;;  %2567 = vmatpush1.bf16.msra.mxu1 %v5149_v27 }
 0x96f   :  { %2527 = vmatprep.subr.bf16.mxu0 %v5153_v28  ;;  %2568 = vmatprep.subr.bf16.mxu1 %v5157_v29 }
 0x972   :  { %2528 = vmatpush1.bf16.msra.mxu0 %v5159_v30  ;;  %2569 = vmatpush1.bf16.msra.mxu1 %v5161_v31 }
 0x973   :  { %2529 = vmatprep.subr.bf16.mxu0 %v5165_v5  ;;  %2570 = vmatprep.subr.bf16.mxu1 %v5167_v10 }
 0x976   :  { %2530 = vmatpush1.bf16.msra.mxu0 %v5177_v6  ;;  %2571 = vmatpush1.bf16.msra.mxu1 %v5179_v33 }
 0x977   :  { %2531 = vmatprep.subr.bf16.mxu0 %v5183_v34  ;;  %2572 = vmatprep.subr.bf16.mxu1 %v5185_v35 }
 0x97a   :  { %2532 = vmatpush1.bf16.msra.mxu0 %v5191_v36  ;;  %2573 = vmatpush1.bf16.msra.mxu1 %v5193_v37 }
 0x97b   :  { %2533 = vmatprep.subr.bf16.mxu0 %v5197_v38  ;;  %2574 = vmatprep.subr.bf16.mxu1 %v5199_v2 }
 0x97e   :  { %2534 = vmatpush1.bf16.msra.mxu0 %v5205_v55  ;;  %2575 = vmatpush1.bf16.msra.mxu1 %v5207_v54 }
 0x97f   :  { %2535 = vmatprep.subr.bf16.mxu0 %v5211_v40  ;;  %2576 = vmatprep.subr.bf16.mxu1 %v5213_v42 }
 0x982   :  { %2536 = vmatpush1.bf16.msra.mxu0 %v6151_v39  ;;  %2577 = vmatpush1.bf16.msra.mxu1 %v6152_v50 }
 0x983   :  { %2644 = vmatprep.subr.bf16.mxu0 %v6153_v49  ;;  %2685 = vmatprep.subr.bf16.mxu1 %v6154_v44 }
 0xa25   :  { %v2432_v21 = vpop.f32.mrf.mxu0  ;;  %v2473_v0 = vpop.f32.mrf.mxu1 }
 0xa26   :  { %v2480_v57 = vadd.f32 %v2432_v21, %v5420_v48  ;;  %v6156_v48 = vsel %vm4469_vm3, %v5295_v7, %v5393_v52 }
 0xa27   :  { %v2434_v53 = vpop.f32.mrf.mxu0  ;;  %v2475_v60 = vpop.f32.mrf.mxu1  ;;  %v2482_v21 = vadd.f32 %v2473_v0, %v6156_v48 }
 0xa28   :  { %v3510_v22 = vmul.f32 -1.442695, %v2480_v57  ;;  %v2481_v63 = vadd.f32 %v2434_v53, %v6155_v19  ;;  %v2483_v53 = vadd.f32 %v2475_v60, %v6157_v45 }
 0xa29   :  { %v2436_v58 = vpop.f32.mrf.mxu0  ;;  %v2477_v3 = vpop.f32.mrf.mxu1  ;;  %v3512_v57 = vmul.f32 -1.442695, %v2482_v21 }
 0xa2a   :  { %3924 = vpow2.f32 %v3510_v22  ;;  %v3511_v16 = vmul.f32 -1.442695, %v2481_v63 }
 0xa2b   :  { %v2437_v9 = vpop.f32.mrf.mxu0  ;;  %v2478_v41 = vpop.f32.mrf.mxu1 }
 0xa2c   :  { %3926 = vpow2.f32 %v3511_v16 }
 0xa2d   :  { %3928 = vpow2.f32 %v3512_v57 }
 0xa2e   :  { %3930 = vtanh.f32 %v2483_v53 }
 0xa37   :  { %v3925_v19 = vpop.eup %3924 }
 0xa38   :  { %v2493_v58 = vadd.f32 1.0, %v3925_v19 }
 0xa39   :  { %v3927_v22 = vpop.eup %3926 }
 0xa3a   :  { %3932 = vrcp.f32 %v2493_v58  ;;  %v2494_v41 = vadd.f32 1.0, %v3927_v22  ;;  %v3929_v9 = vpop.eup %3928 }
 0xa3b   :  { %v3931_v63 = vpop.eup %3930  ;;  %v2495_v48 = vadd.f32 1.0, %v3929_v9 }
 0xa3c   :  { %3934 = vrcp.f32 %v2494_v41 }
 0xa3d   :  { %3936 = vrcp.f32 %v2495_v48 }
 0xa47   :  { %v3933_v3 = vpop.eup %3932 }
 0xa48   :  { %v2504_v16 = vmul.f32 %v3933_v3, %v3931_v63  ;;  %v6158_v63 = vsel %vm4473_vm4, %v5308_v46, %v5370_v11 }
 0xa49   :  { %v3935_v0 = vpop.eup %3934 }
 0xa4a   :  { %v2503_v21 = vmul.f32 %v3935_v0, %v5505_v13  ;;  %v3937_v45 = vpop.eup %3936 }
 0xa4c   :  { %v5563_v62 = vadd.f32 %v2504_v16, %v2503_v21 }
 0xa4e   :  { %3938 = vtanh.f32 %v5563_v62 }
 0xa5b   :  { %v3939_v60 = vpop.eup %3938 }
 0xa5c   :  { %v2507_v57 = vmul.f32 %v3939_v60, %v3937_v45 }
 0xa5e   :  { %v2508_v53 = vpack.c.bf16 %v2507_v57, %v2507_v57 }
 0xa60   :  { %2554 = vmatmul.mubr.bf16.vlgmr.msra.gmra.mxu0 %v2508_v53  ;;  %2595 = vmatmul.mubr.bf16.vlgmr.msra.gmra.mxu1 %v2508_v53 }
 0xa61   :  { %2645 = vmatpush1.bf16.msra.mxu0 %v5121_v8  ;;  %2686 = vmatpush1.bf16.msra.mxu1 %v5123_v4 }
 0xa62   :  { %2646 = vmatprep.subr.bf16.mxu0 %v5125_v59  ;;  %2687 = vmatprep.subr.bf16.mxu1 %v5129_v47 }
 0xa63   :  { %2676 = vmatprep.mubr.bf16.mxu0 %v6070_v14  ;;  %2717 = vmatprep.mubr.bf16.mxu1 %v6070_v14 }
 0xa65   :  { %2647 = vmatpush1.bf16.msra.mxu0 %v5133_v15  ;;  %2688 = vmatpush1.bf16.msra.mxu1 %v5137_v17 }
 0xa66   :  { %2648 = vmatprep.subr.bf16.mxu0 %v5139_v18  ;;  %2689 = vmatprep.subr.bf16.mxu1 %v5143_v61 }
 0xa69   :  { %2649 = vmatpush1.bf16.msra.mxu0 %v5147_v51  ;;  %2690 = vmatpush1.bf16.msra.mxu1 %v5149_v27 }
 0xa6a   :  { %2650 = vmatprep.subr.bf16.mxu0 %v5153_v28  ;;  %2691 = vmatprep.subr.bf16.mxu1 %v5157_v29 }
 0xa6d   :  { %2651 = vmatpush1.bf16.msra.mxu0 %v5159_v30  ;;  %2692 = vmatpush1.bf16.msra.mxu1 %v5161_v31 }
 0xa6e   :  { %2652 = vmatprep.subr.bf16.mxu0 %v5165_v5  ;;  %2693 = vmatprep.subr.bf16.mxu1 %v5167_v10 }
 0xa71   :  { %2653 = vmatpush1.bf16.msra.mxu0 %v5177_v6  ;;  %2694 = vmatpush1.bf16.msra.mxu1 %v5179_v33 }
 0xa72   :  { %2654 = vmatprep.subr.bf16.mxu0 %v5183_v34  ;;  %2695 = vmatprep.subr.bf16.mxu1 %v5185_v35 }
 0xa75   :  { %2655 = vmatpush1.bf16.msra.mxu0 %v5191_v36  ;;  %2696 = vmatpush1.bf16.msra.mxu1 %v5193_v37 }
 0xa76   :  { %2656 = vmatprep.subr.bf16.mxu0 %v5197_v38  ;;  %2697 = vmatprep.subr.bf16.mxu1 %v5199_v2 }
 0xa79   :  { %2657 = vmatpush1.bf16.msra.mxu0 %v5205_v55  ;;  %2698 = vmatpush1.bf16.msra.mxu1 %v5207_v54 }
 0xa7a   :  { %2658 = vmatprep.subr.bf16.mxu0 %v5211_v40  ;;  %2699 = vmatprep.subr.bf16.mxu1 %v5213_v42 }
 0xa7d   :  { %2659 = vmatpush1.bf16.msra.mxu0 %v6151_v39  ;;  %2700 = vmatpush1.bf16.msra.mxu1 %v6152_v50 }
 0xa7e   :  { %2759 = vmatprep.subr.bf16.mxu0 %v6153_v49  ;;  %2800 = vmatprep.subr.bf16.mxu1 %v6154_v44 }
 0xb20   :  { %v2555_v13 = vpop.f32.mrf.mxu0  ;;  %v2596_v19 = vpop.f32.mrf.mxu1 }
 0xb21   :  { %v2603_v58 = vadd.f32 %v2555_v13, %v5377_v12  ;;  %v6159_v12 = vld [vmem:[#allocation26_spill] sm:$0xff]  ;;  %v6161_v13 = vld [vmem:[#allocation29_spill] sm:$0xff] }
 0xb22   :  { %v2557_v22 = vpop.f32.mrf.mxu0  ;;  %v2598_v41 = vpop.f32.mrf.mxu1  ;;  %v6160_v60 = vsel %vm4469_vm3, %v5305_v1, %v6159_v12 }
 0xb23   :  { %v3513_v9 = vmul.f32 -1.442695, %v2603_v58  ;;  %v2604_v3 = vadd.f32 %v2557_v22, %v6158_v63  ;;  %v2605_v57 = vadd.f32 %v2596_v19, %v6160_v60  ;;  %v6162_v58 = vld [vmem:[#allocation43_spill] sm:$0xff] }
 0xb24   :  { %v2559_v16 = vpop.f32.mrf.mxu0  ;;  %v2600_v0 = vpop.f32.mrf.mxu1  ;;  %v6163_v25 = vsel %vm4480_vm5, %v6161_v13, %v6162_v58 }
 0xb25   :  { %3940 = vpow2.f32 %v3513_v9  ;;  %v3514_v48 = vmul.f32 -1.442695, %v2604_v3  ;;  %v3515_v53 = vmul.f32 -1.442695, %v2605_v57  ;;  %v2606_v22 = vadd.f32 %v2598_v41, %v6163_v25 }
 0xb26   :  { %v2560_v21 = vpop.f32.mrf.mxu0  ;;  %v2601_v45 = vpop.f32.mrf.mxu1 }
 0xb27   :  { %3942 = vpow2.f32 %v3514_v48 }
 0xb28   :  { %3944 = vpow2.f32 %v3515_v53 }
 0xb29   :  { %3946 = vtanh.f32 %v2606_v22 }
 0xb32   :  { %v3941_v63 = vpop.eup %3940 }
 0xb33   :  { %v2616_v16 = vadd.f32 1.0, %v3941_v63 }
 0xb34   :  { %v3943_v9 = vpop.eup %3942 }
 0xb35   :  { %3948 = vrcp.f32 %v2616_v16  ;;  %v2617_v3 = vadd.f32 1.0, %v3943_v9  ;;  %v3945_v0 = vpop.eup %3944 }
 0xb36   :  { %v3947_v48 = vpop.eup %3946  ;;  %v2618_v60 = vadd.f32 1.0, %v3945_v0  ;;  %v6166_v0 = vld [vmem:[#allocation35_spill] sm:$0xff] }
 0xb37   :  { %3950 = vrcp.f32 %v2617_v3  ;;  %v6165_v3 = vld [vmem:[#allocation28_spill] sm:$0xff] }
 0xb38   :  { %3952 = vrcp.f32 %v2618_v60 }
 0xb42   :  { %v3949_v21 = vpop.eup %3948 }
 0xb43   :  { %v2627_v45 = vmul.f32 %v3949_v21, %v3947_v48  ;;  %v6167_v48 = vsel %vm4473_vm4, %v6165_v3, %v6166_v0 }
 0xb44   :  { %v3951_v19 = vpop.eup %3950 }
 0xb45   :  { %v2626_v57 = vmul.f32 %v3951_v19, %v5563_v62  ;;  %v3953_v25 = vpop.eup %3952 }
 0xb47   :  { %v5617_v24 = vadd.f32 %v2627_v45, %v2626_v57 }
 0xb49   :  { %3954 = vtanh.f32 %v5617_v24 }
 0xb56   :  { %v3955_v41 = vpop.eup %3954 }
 0xb57   :  { %v2630_v53 = vmul.f32 %v3955_v41, %v3953_v25  ;;  %v6169_v25 = vld [vmem:[#allocation30_spill] sm:$0xff] }
 0xb59   :  { %v2631_v22 = vpack.c.bf16 %v2630_v53, %v2630_v53 }
 0xb5b   :  { %2677 = vmatmul.mubr.bf16.vlgmr.msra.gmra.mxu0 %v2631_v22  ;;  %2718 = vmatmul.mubr.bf16.vlgmr.msra.gmra.mxu1 %v2631_v22 }
 0xb5c   :  { %2760 = vmatpush1.bf16.msra.mxu0 %v5121_v8  ;;  %2801 = vmatpush1.bf16.msra.mxu1 %v5123_v4 }
 0xb5d   :  { %2761 = vmatprep.subr.bf16.mxu0 %v5125_v59  ;;  %2802 = vmatprep.subr.bf16.mxu1 %v5129_v47  ;;  %v6164_v59 = vld [vmem:[#allocation36_spill] sm:$0xff] }
 0xb5e   :  { %2791 = vmatprep.mubr.bf16.mxu0 %v6070_v14  ;;  %2832 = vmatprep.mubr.bf16.mxu1 %v6070_v14 }
 0xb60   :  { %2762 = vmatpush1.bf16.msra.mxu0 %v5133_v15  ;;  %2803 = vmatpush1.bf16.msra.mxu1 %v5137_v17 }
 0xb61   :  { %2763 = vmatprep.subr.bf16.mxu0 %v5139_v18  ;;  %2804 = vmatprep.subr.bf16.mxu1 %v5143_v61 }
 0xb64   :  { %2764 = vmatpush1.bf16.msra.mxu0 %v5147_v51  ;;  %2805 = vmatpush1.bf16.msra.mxu1 %v5149_v27 }
 0xb65   :  { %2765 = vmatprep.subr.bf16.mxu0 %v5153_v28  ;;  %2806 = vmatprep.subr.bf16.mxu1 %v5157_v29 }
 0xb68   :  { %2766 = vmatpush1.bf16.msra.mxu0 %v5159_v30  ;;  %2807 = vmatpush1.bf16.msra.mxu1 %v5161_v31 }
 0xb69   :  { %2767 = vmatprep.subr.bf16.mxu0 %v5165_v5  ;;  %2808 = vmatprep.subr.bf16.mxu1 %v5167_v10 }
 0xb6c   :  { %2768 = vmatpush1.bf16.msra.mxu0 %v5177_v6  ;;  %2809 = vmatpush1.bf16.msra.mxu1 %v5179_v33 }
 0xb6d   :  { %2769 = vmatprep.subr.bf16.mxu0 %v5183_v34  ;;  %2810 = vmatprep.subr.bf16.mxu1 %v5185_v35 }
 0xb70   :  { %2770 = vmatpush1.bf16.msra.mxu0 %v5191_v36  ;;  %2811 = vmatpush1.bf16.msra.mxu1 %v5193_v37 }
 0xb71   :  { %2771 = vmatprep.subr.bf16.mxu0 %v5197_v38  ;;  %2812 = vmatprep.subr.bf16.mxu1 %v5199_v2 }
 0xb74   :  { %2772 = vmatpush1.bf16.msra.mxu0 %v5205_v55  ;;  %2813 = vmatpush1.bf16.msra.mxu1 %v5207_v54 }
 0xb75   :  { %2773 = vmatprep.subr.bf16.mxu0 %v5211_v40  ;;  %2814 = vmatprep.subr.bf16.mxu1 %v5213_v42 }
 0xb78   :  { %2774 = vmatpush1.bf16.msra.mxu0 %v6151_v39  ;;  %2815 = vmatpush1.bf16.msra.mxu1 %v6152_v50 }
 0xb79   :  { %2874 = vmatprep.subr.bf16.mxu0 %v6153_v49  ;;  %2915 = vmatprep.subr.bf16.mxu1 %v6154_v44  ;;  %v6168_v44 = vld [vmem:[#allocation32_spill] sm:$0xff] }
 0xb7a   :  { %v6170_v41 = vsel %vm4469_vm3, %v6168_v44, %v6169_v25 }
 0xc1b   :  { %v2678_v8 = vpop.f32.mrf.mxu0  ;;  %v2719_v4 = vpop.f32.mrf.mxu1 }
 0xc1c   :  { %v2726_v62 = vadd.f32 %v2678_v8, %v6164_v59  ;;  %v2728_v53 = vadd.f32 %v2719_v4, %v6170_v41  ;;  %v6171_v8 = vld [vmem:[#allocation31_spill] sm:$0xff]  ;;  %v6172_v59 = vld [vmem:[#allocation34_spill] sm:$0xff] }
 0xc1d   :  { %v2680_v63 = vpop.f32.mrf.mxu0  ;;  %v2721_v16 = vpop.f32.mrf.mxu1 }
 0xc1e   :  { %v3516_v9 = vmul.f32 -1.442695, %v2726_v62  ;;  %v2727_v21 = vadd.f32 %v2680_v63, %v6167_v48  ;;  %v3518_v22 = vmul.f32 -1.442695, %v2728_v53  ;;  %v6173_v62 = vsel %vm4480_vm5, %v6171_v8, %v6172_v59 }
 0xc1f   :  { %v2682_v45 = vpop.f32.mrf.mxu0  ;;  %v2723_v19 = vpop.f32.mrf.mxu1  ;;  %v2729_v63 = vadd.f32 %v2721_v16, %v6173_v62 }
 0xc20   :  { %3956 = vpow2.f32 %v3516_v9  ;;  %v3517_v60 = vmul.f32 -1.442695, %v2727_v21 }
 0xc21   :  { %v2683_v49 = vpop.f32.mrf.mxu0  ;;  %v2724_v57 = vpop.f32.mrf.mxu1 }
 0xc22   :  { %3958 = vpow2.f32 %v3517_v60 }
 0xc23   :  { %3960 = vpow2.f32 %v3518_v22 }
 0xc24   :  { %3962 = vtanh.f32 %v2729_v63 }
 0xc2d   :  { %v3957_v48 = vpop.eup %3956 }
 0xc2e   :  { %v2739_v45 = vadd.f32 1.0, %v3957_v48  ;;  %v5674_v48 = vld [vmem:[#allocation5 + $0xe0] ss:$16 sps:$4 sm:$0xff]  }
 0xc2f   :  { %v3959_v9 = vpop.eup %3958 }
 0xc30   :  { %3964 = vrcp.f32 %v2739_v45  ;;  %v2740_v21 = vadd.f32 1.0, %v3959_v9  ;;  %v3961_v19 = vpop.eup %3960  ;;  %v5677_v45 = vld [vmem:[#allocation5 + $0xe8] ss:$16 sps:$4 sm:$0xff]  }
 0xc31   :  { %v3963_v60 = vpop.eup %3962  ;;  %v2741_v41 = vadd.f32 1.0, %v3961_v19 }
 0xc32   :  { %3966 = vrcp.f32 %v2740_v21 }
 0xc33   :  { %3968 = vrcp.f32 %v2741_v41  ;;  %v5755_v41 = vld [vmem:[#allocation5 + $0xac] ss:$16 sps:$4 sm:$0xff]  }
 0xc3d   :  { %v3965_v49 = vpop.eup %3964 }
 0xc3e   :  { %v2750_v57 = vmul.f32 %v3965_v49, %v3963_v60  ;;  %v5741_v49 = vld [vmem:[#allocation5 + $0xcc] ss:$16 sps:$4 sm:$0xff]  }
 0xc3f   :  { %v3967_v4 = vpop.eup %3966 }
 0xc40   :  { %v2749_v53 = vmul.f32 %v3967_v4, %v5617_v24  ;;  %v3969_v16 = vpop.eup %3968  ;;  %v5680_v24 = vld [vmem:[#allocation5 + $0xc4] ss:$16 sps:$4 sm:$0xff]  }
 0xc41   :  { %v5752_v4 = vld [vmem:[#allocation5 + $0xa4] ss:$16 sps:$4 sm:$0xff]  }
 0xc42   :  { %v5671_v20 = vadd.f32 %v2750_v57, %v2749_v53  ;;  %v5749_v57 = vld [vmem:[#allocation5 + $0xc8] ss:$16 sps:$4 sm:$0xff]   ;;  %v5758_v53 = vld [vmem:[#allocation5 + $0xa0] ss:$16 sps:$4 sm:$0xff]  }
 0xc44   :  { %3970 = vtanh.f32 %v5671_v20 }
 0xc51   :  { %v3971_v22 = vpop.eup %3970 }
 0xc52   :  { %v2753_v62 = vmul.f32 %v3971_v22, %v3969_v16  ;;  %v5761_v16 = vld [vmem:[#allocation5 + $0xa8] ss:$16 sps:$4 sm:$0xff]   ;;  %v5764_v22 = vld [vmem:[#allocation5 + $0x84] ss:$16 sps:$4 sm:$0xff]  }
 0xc54   :  { %v2754_v63 = vpack.c.bf16 %v2753_v62, %v2753_v62  ;;  %v5767_v62 = vld [vmem:[#allocation5 + $0x8c] ss:$16 sps:$4 sm:$0xff]  }
 0xc56   :  { %2792 = vmatmul.mubr.bf16.vlgmr.msra.gmra.mxu0 %v2754_v63  ;;  %2833 = vmatmul.mubr.bf16.vlgmr.msra.gmra.mxu1 %v2754_v63  ;;  %v5770_v63 = vld [vmem:[#allocation5 + $0x80] ss:$16 sps:$4 sm:$0xff]  }
 0xc57   :  { %2875 = vmatpush1.bf16.msra.mxu0 %v5674_v48  ;;  %2916 = vmatpush1.bf16.msra.mxu1 %v5677_v45 }
 0xc58   :  { %2876 = vmatprep.subr.bf16.mxu0 %v5680_v24  ;;  %2917 = vmatprep.subr.bf16.mxu1 %v5129_v47  ;;  %v5712_v47 = vld [vmem:[#allocation5 + $0xe4] ss:$16 sps:$4 sm:$0xff]  }
 0xc59   :  { %2906 = vmatprep.mubr.bf16.mxu0 %v6070_v14  ;;  %2947 = vmatprep.mubr.bf16.mxu1 %v6070_v14 }
 0xc5b   :  { %2877 = vmatpush1.bf16.msra.mxu0 %v5133_v15  ;;  %2918 = vmatpush1.bf16.msra.mxu1 %v5137_v17  ;;  %v5715_v15 = vld [vmem:[#allocation5 + $0xec] ss:$16 sps:$4 sm:$0xff]  }
 0xc5c   :  { %2878 = vmatprep.subr.bf16.mxu0 %v5139_v18  ;;  %2919 = vmatprep.subr.bf16.mxu1 %v5143_v61  ;;  %v6174_v61 = vld [vmem:[#allocation38_spill] sm:$0xff] }
 0xc5f   :  { %2879 = vmatpush1.bf16.msra.mxu0 %v5147_v51  ;;  %2920 = vmatpush1.bf16.msra.mxu1 %v5149_v27 }
 0xc60   :  { %2880 = vmatprep.subr.bf16.mxu0 %v5153_v28  ;;  %2921 = vmatprep.subr.bf16.mxu1 %v5157_v29 }
 0xc63   :  { %2881 = vmatpush1.bf16.msra.mxu0 %v5159_v30  ;;  %2922 = vmatpush1.bf16.msra.mxu1 %v5161_v31  ;;  %v6175_v30 = vsel %vm4473_vm4, %v6166_v0, %v6165_v3 }
 0xc64   :  { %2882 = vmatprep.subr.bf16.mxu0 %v5165_v5  ;;  %2923 = vmatprep.subr.bf16.mxu1 %v5167_v10 }
 0xc67   :  { %2883 = vmatpush1.bf16.msra.mxu0 %v5177_v6  ;;  %2924 = vmatpush1.bf16.msra.mxu1 %v5179_v33 }
 0xc68   :  { %2884 = vmatprep.subr.bf16.mxu0 %v5183_v34  ;;  %2925 = vmatprep.subr.bf16.mxu1 %v5185_v35  ;;  %v6176_v35 = vsel %vm4469_vm3, %v6169_v25, %v6168_v44 }
 0xc6b   :  { %2885 = vmatpush1.bf16.msra.mxu0 %v5191_v36  ;;  %2926 = vmatpush1.bf16.msra.mxu1 %v5193_v37 }
 0xc6c   :  { %2886 = vmatprep.subr.bf16.mxu0 %v5197_v38  ;;  %2927 = vmatprep.subr.bf16.mxu1 %v5199_v2  ;;  %v6177_v38 = vsel %vm4480_vm5, %v6172_v59, %v6171_v8 }
 0xc6f   :  { %2887 = vmatpush1.bf16.msra.mxu0 %v5205_v55  ;;  %2928 = vmatpush1.bf16.msra.mxu1 %v5207_v54 }
 0xc70   :  { %2888 = vmatprep.subr.bf16.mxu0 %v5211_v40  ;;  %2929 = vmatprep.subr.bf16.mxu1 %v5213_v42 }
 0xc73   :  { %2889 = vmatpush1.bf16.msra.mxu0 %v6151_v39  ;;  %2930 = vmatpush1.bf16.msra.mxu1 %v6152_v50 }
 0xc74   :  { %2989 = vmatprep.subr.bf16.mxu0 %v5712_v47  ;;  %3030 = vmatprep.subr.bf16.mxu1 %v5715_v15 }
 0xd16   :  { %v2793_v17 = vpop.f32.mrf.mxu0  ;;  %v2834_v18 = vpop.f32.mrf.mxu1 }
 0xd17   :  { %v2841_v51 = vadd.f32 %v2793_v17, %v6174_v61  ;;  %v2843_v36 = vadd.f32 %v2834_v18, %v6176_v35  ;;  %v5773_v17 = vld [vmem:[#allocation5 + $0x88] ss:$16 sps:$4 sm:$0xff]   ;;  %v5776_v18 = vld [vmem:[#allocation5 + $0x64] ss:$16 sps:$4 sm:$0xff]   ;;  %v5779_v61 = vld [vmem:[#allocation5 + $0x6c] ss:$16 sps:$4 sm:$0xff]  }
 0xd18   :  { %v2795_v27 = vpop.f32.mrf.mxu0  ;;  %v2836_v28 = vpop.f32.mrf.mxu1  ;;  %v5815_v35 = vld [vmem:[#allocation5 + $0xc] ss:$16 sps:$4 sm:$0xff]  }
 0xd19   :  { %v3519_v29 = vmul.f32 -1.442695, %v2841_v51  ;;  %v2842_v31 = vadd.f32 %v2795_v27, %v6175_v30  ;;  %v3521_v37 = vmul.f32 -1.442695, %v2843_v36  ;;  %v2844_v2 = vadd.f32 %v2836_v28, %v6177_v38  ;;  %v5782_v51 = vld [vmem:[#allocation5 + $0x60] ss:$16 sps:$4 sm:$0xff]  }
 0xd1a   :  { %v2797_v5 = vpop.f32.mrf.mxu0  ;;  %v2838_v10 = vpop.f32.mrf.mxu1  ;;  %v5785_v27 = vld [vmem:[#allocation5 + $0x68] ss:$16 sps:$4 sm:$0xff]   ;;  %v5788_v28 = vld [vmem:[#allocation5 + $0x44] ss:$16 sps:$4 sm:$0xff]   ;;  %v5794_v30 = vld [vmem:[#allocation5 + $0x40] ss:$16 sps:$4 sm:$0xff]  }
 0xd1b   :  { %3972 = vpow2.f32 %v3519_v29  ;;  %v3520_v6 = vmul.f32 -1.442695, %v2842_v31  ;;  %v5791_v29 = vld [vmem:[#allocation5 + $0x4c] ss:$16 sps:$4 sm:$0xff]   ;;  %v5797_v31 = vld [vmem:[#allocation5 + $0x48] ss:$16 sps:$4 sm:$0xff]  }
 0xd1c   :  { %v2798_v33 = vpop.f32.mrf.mxu0  ;;  %v2839_v34 = vpop.f32.mrf.mxu1  ;;  %v5800_v5 = vld [vmem:[#allocation5 + $0x24] ss:$16 sps:$4 sm:$0xff]   ;;  %v5803_v10 = vld [vmem:[#allocation5 + $0x2c] ss:$16 sps:$4 sm:$0xff]   ;;  %v5818_v36 = vld [vmem:[#allocation5] ss:$16 sps:$4 sm:$0xff]  }
 0xd1d   :  { %3974 = vpow2.f32 %v3520_v6  ;;  %v5806_v6 = vld [vmem:[#allocation5 + $0x20] ss:$16 sps:$4 sm:$0xff]   ;;  %v5809_v33 = vld [vmem:[#allocation5 + $0x28] ss:$16 sps:$4 sm:$0xff]   ;;  %v5812_v34 = vld [vmem:[#allocation5 + $0x4] ss:$16 sps:$4 sm:$0xff]  }
 0xd1e   :  { %3976 = vpow2.f32 %v3521_v37  ;;  %v5821_v37 = vld [vmem:[#allocation5 + $0x8] ss:$16 sps:$4 sm:$0xff]  }
 0xd1f   :  { %3978 = vtanh.f32 %v2844_v2 }
 0xd28   :  { %v3973_v55 = vpop.eup %3972 }
 0xd29   :  { %v2854_v54 = vadd.f32 1.0, %v3973_v55  ;;  %v6178_v55 = vld [vmem:[#allocation42_spill] sm:$0xff] }
 0xd2a   :  { %v3975_v40 = vpop.eup %3974 }
 0xd2b   :  { %3980 = vrcp.f32 %v2854_v54  ;;  %v2855_v42 = vadd.f32 1.0, %v3975_v40  ;;  %v3977_v39 = vpop.eup %3976 }
 0xd2c   :  { %v3979_v50 = vpop.eup %3978  ;;  %v2856_v25 = vadd.f32 1.0, %v3977_v39 }
 0xd2d   :  { %3982 = vrcp.f32 %v2855_v42 }
 0xd2e   :  { %3984 = vrcp.f32 %v2856_v25 }
 0xd38   :  { %v3981_v3 = vpop.eup %3980 }
 0xd39   :  { %v2865_v0 = vmul.f32 %v3981_v3, %v3979_v50  ;;  %v6179_v50 = vsel %vm4473_vm4, %v5370_v11, %v5308_v46  ;;  %v6181_v46 = vsel %vm4480_vm5, %v6162_v58, %v6161_v13 }
 0xd3a   :  { %v3983_v44 = vpop.eup %3982 }
 0xd3b   :  { %v2864_v9 = vmul.f32 %v3983_v44, %v5671_v20  ;;  %v3985_v8 = vpop.eup %3984  ;;  %v5746_v20 = vld [vmem:[#allocation5 + $0xc0] ss:$16 sps:$4 sm:$0xff]  }
 0xd3d   :  { %v5735_v21 = vadd.f32 %v2865_v0, %v2864_v9 }
 0xd3f   :  { %3986 = vtanh.f32 %v5735_v21 }
 0xd4c   :  { %v3987_v59 = vpop.eup %3986 }
 0xd4d   :  { %v2868_v19 = vmul.f32 %v3987_v59, %v3985_v8 }
 0xd4f   :  { %v2869_v60 = vpack.c.bf16 %v2868_v19, %v2868_v19 }
 0xd51   :  { %2907 = vmatmul.mubr.bf16.vlgmr.msra.gmra.mxu0 %v2869_v60  ;;  %2948 = vmatmul.mubr.bf16.vlgmr.msra.gmra.mxu1 %v2869_v60 }
 0xd52   :  { %2990 = vmatpush1.bf16.msra.mxu0 %v5674_v48  ;;  %3031 = vmatpush1.bf16.msra.mxu1 %v5677_v45 }
 0xd53   :  { %2991 = vmatprep.subr.bf16.mxu0 %v5680_v24  ;;  %3032 = vmatprep.subr.bf16.mxu1 %v5741_v49 }
 0xd54   :  { %3021 = vmatprep.mubr.bf16.mxu0 %v6070_v14  ;;  %3062 = vmatprep.mubr.bf16.mxu1 %v6070_v14 }
 0xd56   :  { %2992 = vmatpush1.bf16.msra.mxu0 %v5746_v20  ;;  %3033 = vmatpush1.bf16.msra.mxu1 %v5749_v57 }
 0xd57   :  { %2993 = vmatprep.subr.bf16.mxu0 %v5752_v4  ;;  %3034 = vmatprep.subr.bf16.mxu1 %v5755_v41 }
 0xd5a   :  { %2994 = vmatpush1.bf16.msra.mxu0 %v5758_v53  ;;  %3035 = vmatpush1.bf16.msra.mxu1 %v5761_v16 }
 0xd5b   :  { %2995 = vmatprep.subr.bf16.mxu0 %v5764_v22  ;;  %3036 = vmatprep.subr.bf16.mxu1 %v5767_v62 }
 0xd5e   :  { %2996 = vmatpush1.bf16.msra.mxu0 %v5770_v63  ;;  %3037 = vmatpush1.bf16.msra.mxu1 %v5773_v17 }
 0xd5f   :  { %2997 = vmatprep.subr.bf16.mxu0 %v5776_v18  ;;  %3038 = vmatprep.subr.bf16.mxu1 %v5779_v61 }
 0xd62   :  { %2998 = vmatpush1.bf16.msra.mxu0 %v5782_v51  ;;  %3039 = vmatpush1.bf16.msra.mxu1 %v5785_v27 }
 0xd63   :  { %2999 = vmatprep.subr.bf16.mxu0 %v5788_v28  ;;  %3040 = vmatprep.subr.bf16.mxu1 %v5791_v29 }
 0xd66   :  { %3000 = vmatpush1.bf16.msra.mxu0 %v5794_v30  ;;  %3041 = vmatpush1.bf16.msra.mxu1 %v5797_v31 }
 0xd67   :  { %3001 = vmatprep.subr.bf16.mxu0 %v5800_v5  ;;  %3042 = vmatprep.subr.bf16.mxu1 %v5803_v10 }
 0xd6a   :  { %3002 = vmatpush1.bf16.msra.mxu0 %v5806_v6  ;;  %3043 = vmatpush1.bf16.msra.mxu1 %v5809_v33 }
 0xd6b   :  { %3003 = vmatprep.subr.bf16.mxu0 %v5812_v34  ;;  %3044 = vmatprep.subr.bf16.mxu1 %v5815_v35 }
 0xd6e   :  { %3004 = vmatpush1.bf16.msra.mxu0 %v5818_v36  ;;  %3045 = vmatpush1.bf16.msra.mxu1 %v5821_v37 }
 0xd6f   :  { %3104 = vmatprep.subr.bf16.mxu0 %v5712_v47  ;;  %3145 = vmatprep.subr.bf16.mxu1 %v5715_v15  ;;  %v6180_v15 = vsel %vm4469_vm3, %v6159_v12, %v5305_v1 }
 0xe11   :  { %v2908_v38 = vpop.f32.mrf.mxu0  ;;  %v2949_v2 = vpop.f32.mrf.mxu1 }
 0xe12   :  { %v2956_v54 = vadd.f32 %v2908_v38, %v6178_v55  ;;  %v2958_v8 = vadd.f32 %v2949_v2, %v6180_v15  ;;  %v3902_v15 = vld [vmem:[%s5956_s7 + $0x28] sm:$0xff]  }
 0xe13   :  { %v2910_v40 = vpop.f32.mrf.mxu0  ;;  %v2951_v42 = vpop.f32.mrf.mxu1 }
 0xe14   :  { %v3522_v39 = vmul.f32 -1.442695, %v2956_v54  ;;  %v2957_v3 = vadd.f32 %v2910_v40, %v6179_v50  ;;  %v3524_v59 = vmul.f32 -1.442695, %v2958_v8  ;;  %v2959_v11 = vadd.f32 %v2951_v42, %v6181_v46  ;;  %v3903_v8 = vld [vmem:[%s5956_s7 + $0x20] sm:$0xff]   ;;  %v3905_v46 = vld [vmem:[%s5956_s7 + $0x10] sm:$0xff]  }
 0xe15   :  { %v2912_v0 = vpop.f32.mrf.mxu0  ;;  %v2953_v44 = vpop.f32.mrf.mxu1 }
 0xe16   :  { %3988 = vpow2.f32 %v3522_v39  ;;  %v3523_v25 = vmul.f32 -1.442695, %v2957_v3 }
 0xe17   :  { %v2913_v47 = vpop.f32.mrf.mxu0  ;;  %v2954_v9 = vpop.f32.mrf.mxu1 }
 0xe18   :  { %3990 = vpow2.f32 %v3523_v25  ;;  %v3900_v25 = vld [vmem:[%s5956_s7 + $0x38] sm:$0xff]   ;;  %v4142_v47 = vmov 0.0   ;;  %v3901_v9 = vld [vmem:[%s5956_s7 + $0x30] sm:$0xff]  }
 0xe19   :  { %3992 = vpow2.f32 %v3524_v59  ;;  %v3904_v59 = vld [vmem:[%s5956_s7 + $0x18] sm:$0xff]  }
 0xe1a   :  { %3994 = vtanh.f32 %v2959_v11  ;;  %v3906_v11 = vld [vmem:[%s5956_s7 + $0x8] sm:$0xff]  }
 0xe23   :  { %v3989_v19 = vpop.eup %3988 }
 0xe24   :  { %v2969_v60 = vadd.f32 1.0, %v3989_v19  ;;  %v3907_v19 = vld [vmem:[%s5956_s7] sm:$0xff]  }
 0xe25   :  { %v3991_v38 = vpop.eup %3990 }
 0xe26   :  { %3996 = vrcp.f32 %v2969_v60  ;;  %v2970_v55 = vadd.f32 1.0, %v3991_v38  ;;  %v3993_v54 = vpop.eup %3992 }
 0xe27   :  { %v3995_v40 = vpop.eup %3994  ;;  %v2971_v2 = vadd.f32 1.0, %v3993_v54 }
 0xe28   :  { %3998 = vrcp.f32 %v2970_v55  ;;  %v6188_v55 = vld [vmem:[#allocation47_spill] sm:$0xff] }
 0xe29   :  { %4000 = vrcp.f32 %v2971_v2  ;;  %v6190_v2 = vld [vmem:[#allocation44_spill] sm:$0xff] }
 0xe33   :  { %v3997_v39 = vpop.eup %3996 }
 0xe34   :  { %v2980_v1 = vmul.f32 %v3997_v39, %v3995_v40 }
 0xe35   :  { %v3999_v12 = vpop.eup %3998 }
 0xe36   :  { %v2979_v50 = vmul.f32 %v3999_v12, %v5735_v21  ;;  %v4001_v13 = vpop.eup %4000  ;;  %v6189_v12 = vld [vmem:[#allocation23_spill] sm:$0xff] }
 0xe38   :  { %v5843_v3 = vadd.f32 %v2980_v1, %v2979_v50  ;;  %v6191_v50 = vsel %vm4473_vm4, %v6189_v12, %v6190_v2 }
 0xe3a   :  { %4002 = vtanh.f32 %v5843_v3 }
 0xe47   :  { %v4003_v58 = vpop.eup %4002 }
 0xe48   :  { %v2983_v42 = vmul.f32 %v4003_v58, %v4001_v13 }
 0xe4a   :  { %v2984_v0 = vpack.c.bf16 %v2983_v42, %v2983_v42 }
 0xe4c   :  { %3022 = vmatmul.mubr.bf16.vlgmr.msra.gmra.mxu0 %v2984_v0  ;;  %3063 = vmatmul.mubr.bf16.vlgmr.msra.gmra.mxu1 %v2984_v0 }
 0xe4d   :  { %3105 = vmatpush1.bf16.msra.mxu0 %v5674_v48  ;;  %3146 = vmatpush1.bf16.msra.mxu1 %v5677_v45  ;;  %v6182_v45 = vld [vmem:[#allocation40_spill] sm:$0xff] }
 0xe4e   :  { %3106 = vmatprep.subr.bf16.mxu0 %v5680_v24  ;;  %3147 = vmatprep.subr.bf16.mxu1 %v5741_v49 }
 0xe4f   :  { %3136 = vmatprep.mubr.bf16.mxu0 %v6070_v14  ;;  %3177 = vmatprep.mubr.bf16.mxu1 %v6070_v14 }
 0xe51   :  { %3107 = vmatpush1.bf16.msra.mxu0 %v5746_v20  ;;  %3148 = vmatpush1.bf16.msra.mxu1 %v5749_v57  ;;  %v6183_v57 = vsel %vm4473_vm4, %v5412_v43, %v5298_v26 }
 0xe52   :  { %3108 = vmatprep.subr.bf16.mxu0 %v5752_v4  ;;  %3149 = vmatprep.subr.bf16.mxu1 %v5755_v41 }
 0xe55   :  { %3109 = vmatpush1.bf16.msra.mxu0 %v5758_v53  ;;  %3150 = vmatpush1.bf16.msra.mxu1 %v5761_v16 }
 0xe56   :  { %3110 = vmatprep.subr.bf16.mxu0 %v5764_v22  ;;  %3151 = vmatprep.subr.bf16.mxu1 %v5767_v62 }
 0xe59   :  { %3111 = vmatpush1.bf16.msra.mxu0 %v5770_v63  ;;  %3152 = vmatpush1.bf16.msra.mxu1 %v5773_v17  ;;  %v6184_v63 = vsel %vm4469_vm3, %v5393_v52, %v5295_v7 }
 0xe5a   :  { %3112 = vmatprep.subr.bf16.mxu0 %v5776_v18  ;;  %3153 = vmatprep.subr.bf16.mxu1 %v5779_v61  ;;  %v6185_v61 = vld [vmem:[#allocation41_spill] sm:$0xff] }
 0xe5d   :  { %3113 = vmatpush1.bf16.msra.mxu0 %v5782_v51  ;;  %3154 = vmatpush1.bf16.msra.mxu1 %v5785_v27  ;;  %v6186_v51 = vld [vmem:[#allocation33_spill] sm:$0xff] }
 0xe5e   :  { %3114 = vmatprep.subr.bf16.mxu0 %v5788_v28  ;;  %3155 = vmatprep.subr.bf16.mxu1 %v5791_v29  ;;  %v6187_v26 = vsel %vm4480_vm5, %v6185_v61, %v6186_v51 }
 0xe61   :  { %3115 = vmatpush1.bf16.msra.mxu0 %v5794_v30  ;;  %3156 = vmatpush1.bf16.msra.mxu1 %v5797_v31 }
 0xe62   :  { %3116 = vmatprep.subr.bf16.mxu0 %v5800_v5  ;;  %3157 = vmatprep.subr.bf16.mxu1 %v5803_v10 }
 0xe65   :  { %3117 = vmatpush1.bf16.msra.mxu0 %v5806_v6  ;;  %3158 = vmatpush1.bf16.msra.mxu1 %v5809_v33 }
 0xe66   :  { %3118 = vmatprep.subr.bf16.mxu0 %v5812_v34  ;;  %3159 = vmatprep.subr.bf16.mxu1 %v5815_v35 }
 0xe69   :  { %3119 = vmatpush1.bf16.msra.mxu0 %v5818_v36  ;;  %3160 = vmatpush1.bf16.msra.mxu1 %v5821_v37 }
 0xe6a   :  { %3552 = vmatprep.subr.bf16.mxu0 %v4142_v47 }
 0xf0c   :  { %v3023_v14 = vpop.f32.mrf.mxu0  ;;  %v3064_v48 = vpop.f32.mrf.mxu1 }
 0xf0d   :  { %v3071_v24 = vadd.f32 %v3023_v14, %v6182_v45  ;;  %v3073_v17 = vadd.f32 %v3064_v48, %v6184_v63  ;;  %v6192_v48 = vld [vmem:[#allocation39_spill] sm:$0xff]  ;;  %v6193_v45 = vld [vmem:[#allocation45_spill] sm:$0xff] }
 0xf0e   :  { %v3025_v21 = vpop.f32.mrf.mxu0  ;;  %v3066_v49 = vpop.f32.mrf.mxu1 }
 0xf0f   :  { %v3525_v20 = vmul.f32 -1.442695, %v3071_v24  ;;  %v3072_v4 = vadd.f32 %v3025_v21, %v6183_v57  ;;  %v3527_v18 = vmul.f32 -1.442695, %v3073_v17  ;;  %v3074_v43 = vadd.f32 %v3066_v49, %v6187_v26 }
 0xf10   :  { %v3027_v41 = vpop.f32.mrf.mxu0  ;;  %v3068_v53 = vpop.f32.mrf.mxu1  ;;  %v6194_v24 = vsel %vm4469_vm3, %v6192_v48, %v6193_v45 }
 0xf11   :  { %4004 = vpow2.f32 %v3525_v20  ;;  %v3526_v16 = vmul.f32 -1.442695, %v3072_v4  ;;  %v6196_v20 = vld [vmem:[#allocation24_spill] sm:$0xff] }
 0xf12   :  { %v3028_v22 = vpop.f32.mrf.mxu0  ;;  %v3069_v62 = vpop.f32.mrf.mxu1  ;;  %v6197_v57 = vsel %vm4480_vm5, %v6195_v56, %v6196_v20 }
 0xf13   :  { %4006 = vpow2.f32 %v3526_v16 }
 0xf14   :  { %4008 = vpow2.f32 %v3527_v18 }
 0xf15   :  { %4010 = vtanh.f32 %v3074_v43 }
 0xf1e   :  { %v4005_v27 = vpop.eup %4004 }
 0xf1f   :  { %v3084_v28 = vadd.f32 1.0, %v4005_v27 }
 0xf20   :  { %v4007_v29 = vpop.eup %4006 }
 0xf21   :  { %4012 = vrcp.f32 %v3084_v28  ;;  %v3085_v30 = vadd.f32 1.0, %v4007_v29  ;;  %v4009_v31 = vpop.eup %4008 }
 0xf22   :  { %v4011_v5 = vpop.eup %4010  ;;  %v3086_v6 = vadd.f32 1.0, %v4009_v31 }
 0xf23   :  { %4014 = vrcp.f32 %v3085_v30  ;;  %v6199_v30 = vld [vmem:[#allocation48_spill] sm:$0xff] }
 0xf24   :  { %4016 = vrcp.f32 %v3086_v6 }
 0xf2e   :  { %v4013_v10 = vpop.eup %4012 }
 0xf2f   :  { %v3095_v52 = vmul.f32 %v4013_v10, %v4011_v5  ;;  %v3531_v5 = vld [vmem:[%s5957_s8] ss:$0 sm:$0xff] }
 0xf30   :  { %v4015_v7 = vpop.eup %4014 }
 0xf31   :  { %v3094_v33 = vmul.f32 %v4015_v7, %v5843_v3  ;;  %v4017_v35 = vpop.eup %4016 }
 0xf33   :  { %v5895_v34 = vadd.f32 %v3095_v52, %v3094_v33 }
 0xf35   :  { %4018 = vtanh.f32 %v5895_v34 }
 0xf42   :  { %v4019_v36 = vpop.eup %4018 }
 0xf43   :  { %v3098_v37 = vmul.f32 %v4019_v36, %v4017_v35 }
 0xf45   :  { %v3099_v44 = vpack.c.bf16 %v3098_v37, %v3098_v37 }
 0xf47   :  { %3137 = vmatmul.mubr.bf16.vlgmr.msra.gmra.mxu0 %v3099_v44  ;;  %3178 = vmatmul.mubr.bf16.vlgmr.msra.gmra.mxu1 %v3099_v44 }
 0xf48   :  { %3553 = vmatpush3.bf16.msra.mxu0 %v3900_v25  ;;  %3568 = vmatprep.mubr.msk.bf16.mxu0 %vm4143_vm6, %v4142_v47 }
 0xf49   :  { %3554 = vmatprep.subr.bf16.mxu0 %v4142_v47 }
 0xf4c   :  { %3555 = vmatpush3.bf16.msra.mxu0 %v3901_v9 }
 0xf4d   :  { %3556 = vmatprep.subr.bf16.mxu0 %v4142_v47 }
 0xf50   :  { %3557 = vmatpush3.bf16.msra.mxu0 %v3902_v15 }
 0xf51   :  { %3558 = vmatprep.subr.bf16.mxu0 %v4142_v47 }
 0xf54   :  { %3559 = vmatpush3.bf16.msra.mxu0 %v3903_v8 }
 0xf55   :  { %3560 = vmatprep.subr.bf16.mxu0 %v4142_v47 }
 0xf58   :  { %3561 = vmatpush3.bf16.msra.mxu0 %v3904_v59 }
 0xf59   :  { %3562 = vmatprep.subr.bf16.mxu0 %v4142_v47 }
 0xf5c   :  { %3563 = vmatpush3.bf16.msra.mxu0 %v3905_v46 }
 0xf5d   :  { %3564 = vmatprep.subr.bf16.mxu0 %v4142_v47 }
 0xf60   :  { %3565 = vmatpush3.bf16.msra.mxu0 %v3906_v11 }
 0xf61   :  { %3566 = vmatprep.subr.bf16.mxu0 %v4142_v47 }
 0xf64   :  { %3567 = vmatpush3.bf16.msra.mxu0 %v3907_v19 }
0x1007   :  { %v3138_v60 = vpop.f32.mrf.mxu0  ;;  %v3179_v38 = vpop.f32.mrf.mxu1 }
0x1008   :  { %v3186_v54 = vadd.f32 %v3138_v60, %v6188_v55  ;;  %v3188_v21 = vadd.f32 %v3179_v38, %v6194_v24 }
0x1009   :  { %v3140_v40 = vpop.f32.mrf.mxu0  ;;  %v3181_v39 = vpop.f32.mrf.mxu1 }
0x100a   :  { %v3528_v1 = vmul.f32 -1.442695, %v3186_v54  ;;  %v3187_v3 = vadd.f32 %v3140_v40, %v6191_v50  ;;  %v3530_v49 = vmul.f32 -1.442695, %v3188_v21  ;;  %v3189_v4 = vadd.f32 %v3181_v39, %v6197_v57 }
0x100b   :  { %v3142_v13 = vpop.f32.mrf.mxu0  ;;  %v3183_v58 = vpop.f32.mrf.mxu1 }
0x100c   :  { %4020 = vpow2.f32 %v3528_v1  ;;  %v3529_v42 = vmul.f32 -1.442695, %v3187_v3 }
0x100d   :  { %v3143_v0 = vpop.f32.mrf.mxu0  ;;  %v3184_v14 = vpop.f32.mrf.mxu1 }
0x100e   :  { %4022 = vpow2.f32 %v3529_v42 }
0x100f   :  { %4024 = vpow2.f32 %v3530_v49 }
0x1010   :  { %4026 = vtanh.f32 %v3189_v4 }
0x1019   :  { %v4021_v41 = vpop.eup %4020 }
0x101a   :  { %v3199_v53 = vadd.f32 1.0, %v4021_v41 }
0x101b   :  { %v4023_v16 = vpop.eup %4022 }
0x101c   :  { %4028 = vrcp.f32 %v3199_v53  ;;  %v3200_v22 = vadd.f32 1.0, %v4023_v16  ;;  %v4025_v32 = vpop.eup %4024 }
0x101d   :  { %v4027_v62 = vpop.eup %4026  ;;  %v3201_v61 = vadd.f32 1.0, %v4025_v32 }
0x101e   :  { %4030 = vrcp.f32 %v3200_v22 }
0x101f   :  { %4032 = vrcp.f32 %v3201_v61 }
0x1029   :  { %v4029_v63 = vpop.eup %4028 }
0x102a   :  { %v3210_v17 = vmul.f32 %v4029_v63, %v4027_v62 }
0x102b   :  { %v4031_v18 = vpop.eup %4030 }
0x102c   :  { %v3209_v23 = vmul.f32 %v4031_v18, %v5895_v34  ;;  %v4033_v26 = vpop.eup %4032 }
0x102e   :  { %v3211_v51 = vadd.f32 %v3210_v17, %v3209_v23 }
0x1030   :  { %4034 = vtanh.f32 %v3211_v51 }
0x103d   :  { %v4035_v43 = vpop.eup %4034 }
0x103e   :  { %v3213_v27 = vmul.f32 %v4035_v43, %v4033_v26 }
0x1040   :  { %v3214_v29 = vpack.c.bf16 %v3213_v27, %v3213_v27 }
0x1042   :  { %v3216_v31 = vsel %vm3215_vm7, %v3214_v29, %v6199_v30 }
0x1043   :  { %3569 = vmatmul.mubr.bf16.vlgmr.msra.gmra.mxu0 %v3216_v31 }
0x1103   :  { %v3322_v10 = vpop.f32.mrf.mxu0 }
0x1104   :  { %v3323_v52 = vadd.f32 %v3531_v5, %v3322_v10 }
0x1105   :  { %v3570_v7 = vpop.f32.mrf.mxu0 }
0x1106   :  { %3329 = vst.msk [vmem:[%s5958_s9] sm:$0xff] %vm3328_vm8, %v3323_v52 }
0x1107   :  { %v3325_v6 = vpop.f32.mrf.mxu0 }
0x1109   :  { %v3571_v33 = vpop.f32.mrf.mxu0 }
0x110a   :  { %3334 = vsyncpa [#allocation9], 1 }
0x110b   :  { %3335 = vsyncmov [#allocation7] }
0x110e   :  { %s3336_s20 = vpop.sfrf %3335 }
0x110f   :  { %p3540_p1 = scmp.ne.s32.totalorder %s3336_s20, 0 }
0x1111   :  { %3340 = shalt.err (%p3540_p1)  }
0x1112   :  { %3342 = vsyncmov [#allocation7 + $0x1] }
0x1115   :  { %s3343_s1 = vpop.sfrf %3342 }
0x1116   :  { %p3541_p2 = scmp.ne.s32.totalorder %s3343_s1, 0 }
0x1118   :  { %3347 = shalt.err (%p3541_p2)  }
0x1119   :  { %3349 = vsyncmov [#allocation7 + $0x2] }
0x111c   :  { %s3350_s8 = vpop.sfrf %3349 }
0x111d   :  { %p3542_p3 = scmp.ne.s32.totalorder %s3350_s8, 0 }
0x111f   :  { %3354 = shalt.err (%p3542_p3)  }

</bundles_post_ra>
